<compile_context>
chip_gen: v7x
topology: tpu7x:2x2x1
jax: 0.10.0
libtpu: 0.0.40
codegen_flags: <defaults>
</compile_context>

<pallas_src>
import functools

import jax
import jax.numpy as jnp
from jax.experimental import pallas as pl
from jax.experimental.pallas import tpu as pltpu


# Safe on v5e/v6e (128 MiB physical) and v7x (64 MiB physical) VMEM.
_VMEM_LIMIT = 32 * 1024 * 1024


def _pick_bm(m, cap=512):
    """Largest row tile (multiple of 8) dividing m, up to `cap` rows."""
    if m <= cap:
        return m
    for d in (512, 256, 128, 64, 32, 16, 8):
        if d <= cap and m % d == 0:
            return d
    return m


# ----------------------------------------------------------------------------
# Kernel 1: stacked GEMM  o[g] = act(x[g] @ w[g] + b), row-tiled & pipelined.
# Used for the strided encoder convs (im2col patches, G=1) and the decoder
# transposed convs (sub-pixel phase decomposition, G=4).
# ----------------------------------------------------------------------------
def _gemm_bias_act_kernel(x_ref, w_ref, b_ref, o_ref, *, relu_in, relu_out):
    x = x_ref[0]                                        # (bm, K) f32
    if relu_in:
        x = jnp.maximum(x, 0.0)
    acc = jnp.dot(x.astype(jnp.bfloat16), w_ref[0],     # bf16 MXU, f32 accum
                  preferred_element_type=jnp.float32)
    acc = acc + b_ref[...]
    if relu_out:
        acc = jnp.maximum(acc, 0.0)
    o_ref[0] = acc.astype(o_ref.dtype)


def gemm_bias_act(x_stack, w_stack, b_row, *, relu_in=False, relu_out=False):
    g, m, k = x_stack.shape
    n = w_stack.shape[-1]
    bm = _pick_bm(m)
    return pl.pallas_call(
        functools.partial(_gemm_bias_act_kernel,
                          relu_in=relu_in, relu_out=relu_out),
        out_shape=jax.ShapeDtypeStruct((g, m, n), jnp.float32),
        grid=(g, m // bm),
        in_specs=[
            pl.BlockSpec((1, bm, k), lambda gi, mi: (gi, mi, 0)),
            pl.BlockSpec((1, k, n), lambda gi, mi: (gi, 0, 0)),
            pl.BlockSpec((1, n), lambda gi, mi: (0, 0)),
        ],
        out_specs=pl.BlockSpec((1, bm, n), lambda gi, mi: (gi, mi, 0)),
        compiler_params=pltpu.CompilerParams(
            dimension_semantics=("parallel", "parallel"),
            vmem_limit_bytes=_VMEM_LIMIT),
    )(x_stack, w_stack, b_row)


# ----------------------------------------------------------------------------
# Kernel 2: fused bottleneck
#   enc conv3x3 -> residual stack -> ReLU -> pre-VQ 1x1 -> VQ ->
#   dec conv3x3 -> residual stack          (gridded over batch)
# Outputs the decoder residual-stack activations (pre trailing ReLU, fused into
# the next kernel's relu_in) plus the accumulated VQ squared error.
# ----------------------------------------------------------------------------
def _middle_kernel(h_ref, ew3_ref, eb3_ref, er3_ref, er1_ref,
                   pw_ref, pb_ref, emb_ref, esq_ref,
                   dw1_ref, db1_ref, dr3_ref, dr1_ref,
                   out_ref, sse_ref, pad_c_ref, pad_d_ref, *, num_res):
    _, H, W, C = out_ref.shape
    HW = H * W
    D = emb_ref.shape[1]
    n_codes = emb_ref.shape[0]

    @pl.when(pl.program_id(0) == 0)
    def _init():
        sse_ref[...] = jnp.zeros_like(sse_ref)

    # zero-padded scratch rings for the in-kernel 3x3 convolutions
    pad_c_ref[...] = jnp.zeros_like(pad_c_ref)
    pad_d_ref[...] = jnp.zeros_like(pad_d_ref)

    def conv3x3(x_hwc, w9, pad, cout):
        cin = x_hwc.shape[-1]
        pad[1:H + 1, 1:W + 1, :] = x_hwc
        acc = jnp.zeros((HW, cout), jnp.float32)
        for t in range(9):
            di, dj = divmod(t, 3)
            xm = pad[di:di + H, dj:dj + W, :].reshape(HW, cin)
            acc = acc + jnp.dot(xm.astype(jnp.bfloat16), w9[t],
                                preferred_element_type=jnp.float32)
        return acc

    def res_stack(y, w3_ref, w1_ref):
        # y + conv1x1(relu(conv3x3(relu(y)))) per layer (bias-free residual convs)
        for l in range(num_res):
            w9 = w3_ref[l]                             # (9, C, nrh) bf16
            hid = conv3x3(jnp.maximum(y, 0.0).reshape(H, W, C),
                          w9, pad_c_ref, w9.shape[2])
            y = y + jnp.dot(jnp.maximum(hid, 0.0), w1_ref[l],
                            preferred_element_type=jnp.float32)
        return y

    # --- encoder tail --------------------------------------------------------
    y = conv3x3(h_ref[0], ew3_ref[...], pad_c_ref, C) + eb3_ref[...]   # (HW, C)
    y = res_stack(y, er3_ref, er1_ref)

    # --- trailing ReLU + 1x1 pre-VQ conv -------------------------------------
    z_e = jnp.dot(jnp.maximum(y, 0.0), pw_ref[...],
                  preferred_element_type=jnp.float32) + pb_ref[...]    # (HW, D)

    # --- vector quantization (codebook resident in VMEM) ---------------------
    emb = emb_ref[...]                                                 # (K, D)
    z2 = jnp.sum(z_e * z_e, axis=1, keepdims=True)                     # (HW, 1)
    ze = jax.lax.dot_general(z_e, emb, (((1,), (1,)), ((), ())),
                             preferred_element_type=jnp.float32)       # (HW, K)
    dist = z2 - 2.0 * ze + esq_ref[...]                                # (HW, K)
    iota = jax.lax.broadcasted_iota(jnp.int32, dist.shape, 1)
    dmin = jnp.min(dist, axis=1, keepdims=True)
    idx = jnp.min(jnp.where(dist <= dmin, iota, n_codes),
                  axis=1, keepdims=True)
    onehot = (iota == idx).astype(jnp.float32)
    zq = jnp.dot(onehot, emb, preferred_element_type=jnp.float32)      # (HW, D)

    diff = zq - z_e
    sse_ref[...] += jnp.sum(jnp.sum(diff * diff, axis=1, keepdims=True),
                            axis=0, keepdims=True)

    # --- decoder head (straight-through value: the quantized code) -----------
    yd = conv3x3(zq.reshape(H, W, D), dw1_ref[...], pad_d_ref, C) + db1_ref[...]
    yd = res_stack(yd, dr3_ref, dr1_ref)
    # trailing ReLU of the decoder residual stack is fused as relu_in of the
    # first transposed conv in the wrapper.
    out_ref[0] = yd.reshape(H, W, C)


def middle_fused(h, p, *, beta, use_moving_avg):
    bsz, hh, ww, nh = h.shape
    num_res = p["enc_res_w3"].shape[0]
    nrh = p["enc_res_w3"].shape[3]
    d_dim = p["embedding"].shape[1]
    n_codes = p["embedding"].shape[0]

    d_out, sse = pl.pallas_call(
        functools.partial(_middle_kernel, num_res=num_res),
        out_shape=(jax.ShapeDtypeStruct((bsz, hh, ww, nh), jnp.float32),
                   jax.ShapeDtypeStruct((1, 1), jnp.float32)),
        grid=(bsz,),
        in_specs=[
            pl.BlockSpec((1, hh, ww, nh), lambda i: (i, 0, 0, 0)),      # h
            pl.BlockSpec((9, nh, nh), lambda i: (0, 0, 0)),             # enc_w3
            pl.BlockSpec((1, nh), lambda i: (0, 0)),                    # enc_b3
            pl.BlockSpec((num_res, 9, nh, nrh), lambda i: (0, 0, 0, 0)),
            pl.BlockSpec((num_res, nrh, nh), lambda i: (0, 0, 0)),
            pl.BlockSpec((nh, d_dim), lambda i: (0, 0)),                # pre_vq_w
            pl.BlockSpec((1, d_dim), lambda i: (0, 0)),                 # pre_vq_b
            pl.BlockSpec((n_codes, d_dim), lambda i: (0, 0)),           # embedding
            pl.BlockSpec((1, n_codes), lambda i: (0, 0)),               # emb_sq
            pl.BlockSpec((9, d_dim, nh), lambda i: (0, 0, 0)),          # dec_w1
            pl.BlockSpec((1, nh), lambda i: (0, 0)),                    # dec_b1
            pl.BlockSpec((num_res, 9, nh, nrh), lambda i: (0, 0, 0, 0)),
            pl.BlockSpec((num_res, nrh, nh), lambda i: (0, 0, 0)),
        ],
        out_specs=(pl.BlockSpec((1, hh, ww, nh), lambda i: (i, 0, 0, 0)),
                   pl.BlockSpec((1, 1), lambda i: (0, 0))),
        scratch_shapes=[pltpu.VMEM((hh + 2, ww + 2, nh), jnp.float32),
                        pltpu.VMEM((hh + 2, ww + 2, d_dim), jnp.float32)],
        compiler_params=pltpu.CompilerParams(
            # the (1,1) loss block is revisited/accumulated across grid steps
            dimension_semantics=("arbitrary",),
            vmem_limit_bytes=_VMEM_LIMIT),
    )(h, p["enc_w3"], p["enc_b3"], p["enc_res_w3"], p["enc_res_w1"],
      p["pre_vq_w"], p["pre_vq_b"], p["embedding"], p["emb_sq"],
      p["dec_w1"], p["dec_b1"], p["dec_res_w3"], p["dec_res_w1"])

    e_latent = sse[0, 0] / float(bsz * hh * ww * d_dim)
    if use_moving_avg:
        vq_loss = beta * e_latent
    else:
        # q_latent_loss == e_latent_loss numerically in the forward pass
        vq_loss = (1.0 + beta) * e_latent
    return vq_loss, d_out


# ----------------------------------------------------------------------------
# Conv wrappers (patch building is plain-JAX glue; all FLOPs run in Pallas)
# ----------------------------------------------------------------------------
def conv4x4_s2(x, w_gemm, b_row, *, relu_in=False, relu_out=False):
    """Conv2d(k=4, s=2, p=1) via im2col + row-tiled GEMM kernel."""
    bsz, h, w, c = x.shape
    ho, wo = h // 2, w // 2
    xp = jnp.pad(x, ((0, 0), (1, 1), (1, 1), (0, 0)))
    taps = [xp[:, ky:ky + 2 * ho:2, kx:kx + 2 * wo:2, :]
            for ky in range(4) for kx in range(4)]
    patches = jnp.concatenate(taps, axis=-1).reshape(1, bsz * ho * wo, 16 * c)
    n = w_gemm.shape[-1]
    y = gemm_bias_act(patches, w_gemm, b_row, relu_in=relu_in, relu_out=relu_out)
    return y.reshape(bsz, ho, wo, n)


def conv_transpose4x4_s2(x, w_phases, b_row, *, relu_in=False, relu_out=False):
    """ConvTranspose2d(k=4, s=2, p=1) via sub-pixel phase decomposition.

    Each of the 4 output phases is a 2x2-tap convolution over the (1-padded)
    input; no zero-dilated input, no wasted MXU FLOPs.  All 4 phases run in a
    single stacked pallas_call.
    """
    bsz, h, w, c = x.shape
    n = w_phases.shape[-1]
    xp = jnp.pad(x, ((0, 0), (1, 1), (1, 1), (0, 0)))
    phases = []
    for py in (0, 1):
        for px in (0, 1):
            taps = [xp[:, py + dy:py + dy + h, px + dx:px + dx + w, :]
                    for dy in (0, 1) for dx in (0, 1)]
            phases.append(jnp.concatenate(taps, axis=-1).reshape(bsz * h * w, 4 * c))
    x_ph = jnp.stack(phases, axis=0)                       # (4, B*H*W, 4C)
    y = gemm_bias_act(x_ph, w_phases, b_row,
                      relu_in=relu_in, relu_out=relu_out)  # (4, B*H*W, n)
    y = y.reshape(2, 2, bsz, h, w, n)                      # (py, px, b, m, n, c)
    y = jnp.transpose(y, (2, 3, 0, 4, 1, 5)).reshape(bsz, 2 * h, 2 * w, n)
    return y


# ----------------------------------------------------------------------------
# Parameter init (deterministic, torch-style layout) and one-time prep
# ----------------------------------------------------------------------------
def init_params(key, *, num_hiddens=32, num_residual_layers=2,
                num_residual_hiddens=8, num_embeddings=16, embedding_dim=8):
    keys = iter(jax.random.split(key, 64))

    def w(shape, scale=0.05):
        return (scale * jax.random.normal(next(keys), shape)).astype(jnp.float32)

    def bias(n):
        return (0.01 * jax.random.normal(next(keys), (n,))).astype(jnp.float32)

    nh, nrh = num_hiddens, num_residual_hiddens
    return {
        "enc_w1": w((nh // 2, 3, 4, 4)), "enc_b1": bias(nh // 2),
        "enc_w2": w((nh, nh // 2, 4, 4)), "enc_b2": bias(nh),
        "enc_w3": w((nh, nh, 3, 3)), "enc_b3": bias(nh),
        "enc_res": [(w((nrh, nh, 3, 3)), w((nh, nrh, 1, 1)))
                    for _ in range(num_residual_layers)],
        "pre_vq_w": w((embedding_dim, nh, 1, 1)), "pre_vq_b": bias(embedding_dim),
        "embedding": w((num_embeddings, embedding_dim), scale=0.5),
        "dec_w1": w((nh, embedding_dim, 3, 3)), "dec_b1": bias(nh),
        "dec_res": [(w((nrh, nh, 3, 3)), w((nh, nrh, 1, 1)))
                    for _ in range(num_residual_layers)],
        "dec_t1_w": w((nh, nh // 2, 4, 4)), "dec_t1_b": bias(nh // 2),  # IOHW
        "dec_t2_w": w((nh // 2, 3, 4, 4)), "dec_t2_b": bias(3),         # IOHW
    }


def prepare_params(p):
    """One-time conversion to kernel-ready layouts (hoisted out of the forward)."""
    f32, bf16 = jnp.float32, jnp.bfloat16

    def conv_gemm_w(w_oihw):           # (O,I,kh,kw) -> (1, kh*kw*I, O) bf16
        o, i, kh, kw = w_oihw.shape
        return jnp.transpose(w_oihw, (2, 3, 1, 0)).reshape(1, kh * kw * i, o).astype(bf16)

    def conv3x3_w(w_oihw):             # (O,I,3,3) -> (9, I, O) bf16
        o, i, _, _ = w_oihw.shape
        return jnp.transpose(w_oihw, (2, 3, 1, 0)).reshape(9, i, o).astype(bf16)

    def convt_phase_w(w_iohw):         # (I,O,4,4) -> (4, 4I, O) bf16 (sub-pixel)
        phases = []
        for py in (0, 1):
            for px in (0, 1):
                taps = [w_iohw[:, :, 3 - py - 2 * dy, 3 - px - 2 * dx]
                        for dy in (0, 1) for dx in (0, 1)]
                phases.append(jnp.concatenate(taps, axis=0))     # (4I, O)
        return jnp.stack(phases, axis=0).astype(bf16)

    def bias_row(b):
        return b.reshape(1, -1).astype(f32)

    emb = p["embedding"].astype(f32)
    return {
        "enc_w1": conv_gemm_w(p["enc_w1"]), "enc_b1": bias_row(p["enc_b1"]),
        "enc_w2": conv_gemm_w(p["enc_w2"]), "enc_b2": bias_row(p["enc_b2"]),
        "enc_w3": conv3x3_w(p["enc_w3"]), "enc_b3": bias_row(p["enc_b3"]),
        "enc_res_w3": jnp.stack([conv3x3_w(w3) for w3, _ in p["enc_res"]], 0),
        "enc_res_w1": jnp.stack([jnp.transpose(w1[:, :, 0, 0], (1, 0))
                                 for _, w1 in p["enc_res"]], 0).astype(f32),
        "pre_vq_w": jnp.transpose(p["pre_vq_w"][:, :, 0, 0], (1, 0)).astype(f32),
        "pre_vq_b": bias_row(p["pre_vq_b"]),
        "embedding": emb,
        "emb_sq": jnp.sum(emb * emb, axis=1).reshape(1, -1),
        "dec_w1": conv3x3_w(p["dec_w1"]), "dec_b1": bias_row(p["dec_b1"]),
        "dec_res_w3": jnp.stack([conv3x3_w(w3) for w3, _ in p["dec_res"]], 0),
        "dec_res_w1": jnp.stack([jnp.transpose(w1[:, :, 0, 0], (1, 0))
                                 for _, w1 in p["dec_res"]], 0).astype(f32),
        "dec_t1_w": convt_phase_w(p["dec_t1_w"]), "dec_t1_b": bias_row(p["dec_t1_b"]),
        "dec_t2_w": convt_phase_w(p["dec_t2_w"]), "dec_t2_b": bias_row(p["dec_t2_b"]),
    }


# ----------------------------------------------------------------------------
# Full forward
# ----------------------------------------------------------------------------
def vqvae_forward(prep, x_nchw, *, beta=0.25, use_moving_avg=True):
    x = jnp.transpose(x_nchw, (0, 2, 3, 1))                   # NCHW -> NHWC

    # ---- Encoder (strided convs) ----
    h = conv4x4_s2(x, prep["enc_w1"], prep["enc_b1"], relu_out=True)
    h = conv4x4_s2(h, prep["enc_w2"], prep["enc_b2"], relu_out=True)

    # ---- Fused bottleneck: enc conv3 + res stack + pre-VQ + VQ + dec conv1 +
    #      dec res stack (single Pallas kernel, intermediates stay in VMEM) ----
    vq_loss, d = middle_fused(h, prep, beta=beta, use_moving_avg=use_moving_avg)
    # TODO(synk): EMA codebook updates (decay/eps buffers) are training-only
    # mutable state and are not part of the forward computation implemented here.

    # ---- Decoder (transposed convs via sub-pixel phases) ----
    # residual-stack trailing ReLU fused as relu_in of the first transposed conv
    d = conv_transpose4x4_s2(d, prep["dec_t1_w"], prep["dec_t1_b"],
                             relu_in=True, relu_out=True)
    x_recon = conv_transpose4x4_s2(d, prep["dec_t2_w"], prep["dec_t2_b"])

    return vq_loss, jnp.transpose(x_recon, (0, 3, 1, 2))      # NHWC -> NCHW


if __name__ == "__main__":
    key = jax.random.PRNGKey(0)
    pkey, xkey = jax.random.split(key)

    params = init_params(pkey, num_hiddens=32, num_residual_layers=2,
                         num_residual_hiddens=8, num_embeddings=16,
                         embedding_dim=8)
    prep = prepare_params(params)          # one-time weight-layout prep
    x = jax.random.normal(xkey, (2, 3, 16, 16), jnp.float32)

    fwd = jax.jit(functools.partial(vqvae_forward, beta=0.25))
    vq_loss, x_recon = fwd(prep, x)
    jax.block_until_ready((vq_loss, x_recon))

    assert x_recon.shape == (2, 3, 16, 16), x_recon.shape
    assert vq_loss.shape == (), vq_loss.shape
    assert jnp.isfinite(vq_loss) and bool(jnp.all(jnp.isfinite(x_recon)))
    print("KERNEL_OK")
</pallas_src>

<mosaic_0001>
module attributes {stable_mosaic.version = 11 : i64} {
  func.func @_gemm_bias_act_kernel(%arg0: i32, %arg1: i32, %arg2: memref<1x128x48xf32, #tpu.memory_space<vmem>>, %arg3: memref<1x48x16xbf16, #tpu.memory_space<vmem>>, %arg4: memref<1x16xf32, #tpu.memory_space<vmem>>, %arg5: memref<1x128x16xf32, #tpu.memory_space<vmem>>) attributes {dimension_semantics = [#tpu.dimension_semantics<parallel>, #tpu.dimension_semantics<parallel>], iteration_bounds = array<i64: 1, 1>, scalar_prefetch = 0 : i64, scratch_operands = 0 : i64, tpu.core_type = #tpu.core_type<tc>, window_params = [{transform_indices = @transform_0, window_bounds = array<i64: 1, 128, 48>}, {transform_indices = @transform_1, window_bounds = array<i64: 1, 48, 16>}, {pipeline_mode = #tpu.pipeline_mode<synchronous>, transform_indices = @transform_2, window_bounds = array<i64: 1, 16>}, {transform_indices = @transform_3, window_bounds = array<i64: 1, 128, 16>}]} {
    %c0 = arith.constant 0 : index
    %c0_0 = arith.constant 0 : index
    %c0_1 = arith.constant 0 : index
    %0 = vector.load %arg2[%c0, %c0_0, %c0_1] : memref<1x128x48xf32, #tpu.memory_space<vmem>>, vector<1x128x48xf32>
    %1 = vector.shape_cast %0 : vector<1x128x48xf32> to vector<128x48xf32>
    %2 = arith.truncf %1 : vector<128x48xf32> to vector<128x48xbf16>
    %c0_2 = arith.constant 0 : index
    %c0_3 = arith.constant 0 : index
    %c0_4 = arith.constant 0 : index
    %3 = vector.load %arg3[%c0_2, %c0_3, %c0_4] : memref<1x48x16xbf16, #tpu.memory_space<vmem>>, vector<1x48x16xbf16>
    %4 = vector.shape_cast %3 : vector<1x48x16xbf16> to vector<48x16xbf16>
    %cst = arith.constant dense<0.000000e+00> : vector<128x16xf32>
    %5 = tpu.matmul %2, %4, %cst {dimension_numbers = #tpu.dot_dimension_numbers<[1], [0], [0], [1], [0, 0, 1, 1], [], []>} : vector<128x48xbf16>, vector<48x16xbf16>, vector<128x16xf32> -> vector<128x16xf32>
    %c0_5 = arith.constant 0 : index
    %c0_6 = arith.constant 0 : index
    %6 = vector.load %arg4[%c0_5, %c0_6] : memref<1x16xf32, #tpu.memory_space<vmem>>, vector<1x16xf32>
    %7 = vector.broadcast %6 : vector<1x16xf32> to vector<128x16xf32>
    %8 = arith.addf %5, %7 : vector<128x16xf32>
    %cst_7 = arith.constant 0.000000e+00 : f32
    %9 = vector.broadcast %cst_7 : f32 to vector<128x16xf32>
    %10 = arith.maximumf %8, %9 : vector<128x16xf32>
    %c0_8 = arith.constant 0 : index
    %c0_9 = arith.constant 0 : index
    %c0_10 = arith.constant 0 : index
    %11 = vector.load %arg5[%c0_8, %c0_9, %c0_10] : memref<1x128x16xf32, #tpu.memory_space<vmem>>, vector<1x128x16xf32>
    %12 = vector.shape_cast %11 : vector<1x128x16xf32> to vector<128x16xf32>
    %13 = vector.shape_cast %10 : vector<128x16xf32> to vector<1x128x16xf32>
    tpu.vector_store %arg5[%c0_8, %c0_9, %c0_10], %13 {strides = array<i32>} : memref<1x128x16xf32, #tpu.memory_space<vmem>>, vector<1x128x16xf32>,
    return
  }
  func.func @transform_0(%arg0: i32, %arg1: i32) -> (i32, i32, i32) {
    %c0_i32 = arith.constant 0 : i32
    %c0_i32_0 = arith.constant 0 : i32
    return %arg0, %arg1, %c0_i32 : i32, i32, i32
  }
  func.func @transform_1(%arg0: i32, %arg1: i32) -> (i32, i32, i32) {
    %c0_i32 = arith.constant 0 : i32
    %c0_i32_0 = arith.constant 0 : i32
    %c0_i32_1 = arith.constant 0 : i32
    return %arg0, %c0_i32, %c0_i32_0 : i32, i32, i32
  }
  func.func @transform_2(%arg0: i32, %arg1: i32) -> (i32, i32) {
    %c0_i32 = arith.constant 0 : i32
    %c0_i32_0 = arith.constant 0 : i32
    %c0_i32_1 = arith.constant 0 : i32
    return %c0_i32, %c0_i32_0 : i32, i32
  }
  func.func @transform_3(%arg0: i32, %arg1: i32) -> (i32, i32, i32) {
    %c0_i32 = arith.constant 0 : i32
    %c0_i32_0 = arith.constant 0 : i32
    return %arg0, %arg1, %c0_i32 : i32, i32, i32
  }
}

module attributes {stable_mosaic.version = 11 : i64} {
  func.func @_gemm_bias_act_kernel(%arg0: i32, %arg1: i32, %arg2: memref<1x32x256xf32, #tpu.memory_space<vmem>>, %arg3: memref<1x256x32xbf16, #tpu.memory_space<vmem>>, %arg4: memref<1x32xf32, #tpu.memory_space<vmem>>, %arg5: memref<1x32x32xf32, #tpu.memory_space<vmem>>) attributes {dimension_semantics = [#tpu.dimension_semantics<parallel>, #tpu.dimension_semantics<parallel>], iteration_bounds = array<i64: 1, 1>, scalar_prefetch = 0 : i64, scratch_operands = 0 : i64, tpu.core_type = #tpu.core_type<tc>, window_params = [{transform_indices = @transform_0, window_bounds = array<i64: 1, 32, 256>}, {transform_indices = @transform_1, window_bounds = array<i64: 1, 256, 32>}, {pipeline_mode = #tpu.pipeline_mode<synchronous>, transform_indices = @transform_2, window_bounds = array<i64: 1, 32>}, {transform_indices = @transform_3, window_bounds = array<i64: 1, 32, 32>}]} {
    %c0 = arith.constant 0 : index
    %c0_0 = arith.constant 0 : index
    %c0_1 = arith.constant 0 : index
    %0 = vector.load %arg2[%c0, %c0_0, %c0_1] : memref<1x32x256xf32, #tpu.memory_space<vmem>>, vector<1x32x256xf32>
    %1 = vector.shape_cast %0 : vector<1x32x256xf32> to vector<32x256xf32>
    %2 = arith.truncf %1 : vector<32x256xf32> to vector<32x256xbf16>
    %c0_2 = arith.constant 0 : index
    %c0_3 = arith.constant 0 : index
    %c0_4 = arith.constant 0 : index
    %3 = vector.load %arg3[%c0_2, %c0_3, %c0_4] : memref<1x256x32xbf16, #tpu.memory_space<vmem>>, vector<1x256x32xbf16>
    %4 = vector.shape_cast %3 : vector<1x256x32xbf16> to vector<256x32xbf16>
    %cst = arith.constant dense<0.000000e+00> : vector<32x32xf32>
    %5 = tpu.matmul %2, %4, %cst {dimension_numbers = #tpu.dot_dimension_numbers<[1], [0], [0], [1], [0, 0, 1, 1], [], []>} : vector<32x256xbf16>, vector<256x32xbf16>, vector<32x32xf32> -> vector<32x32xf32>
    %c0_5 = arith.constant 0 : index
    %c0_6 = arith.constant 0 : index
    %6 = vector.load %arg4[%c0_5, %c0_6] : memref<1x32xf32, #tpu.memory_space<vmem>>, vector<1x32xf32>
    %7 = vector.broadcast %6 : vector<1x32xf32> to vector<32x32xf32>
    %8 = arith.addf %5, %7 : vector<32x32xf32>
    %cst_7 = arith.constant 0.000000e+00 : f32
    %9 = vector.broadcast %cst_7 : f32 to vector<32x32xf32>
    %10 = arith.maximumf %8, %9 : vector<32x32xf32>
    %c0_8 = arith.constant 0 : index
    %c0_9 = arith.constant 0 : index
    %c0_10 = arith.constant 0 : index
    %11 = vector.load %arg5[%c0_8, %c0_9, %c0_10] : memref<1x32x32xf32, #tpu.memory_space<vmem>>, vector<1x32x32xf32>
    %12 = vector.shape_cast %11 : vector<1x32x32xf32> to vector<32x32xf32>
    %13 = vector.shape_cast %10 : vector<32x32xf32> to vector<1x32x32xf32>
    tpu.vector_store %arg5[%c0_8, %c0_9, %c0_10], %13 {strides = array<i32>} : memref<1x32x32xf32, #tpu.memory_space<vmem>>, vector<1x32x32xf32>,
    return
  }
  func.func @transform_0(%arg0: i32, %arg1: i32) -> (i32, i32, i32) {
    %c0_i32 = arith.constant 0 : i32
    %c0_i32_0 = arith.constant 0 : i32
    return %arg0, %arg1, %c0_i32 : i32, i32, i32
  }
  func.func @transform_1(%arg0: i32, %arg1: i32) -> (i32, i32, i32) {
    %c0_i32 = arith.constant 0 : i32
    %c0_i32_0 = arith.constant 0 : i32
    %c0_i32_1 = arith.constant 0 : i32
    return %arg0, %c0_i32, %c0_i32_0 : i32, i32, i32
  }
  func.func @transform_2(%arg0: i32, %arg1: i32) -> (i32, i32) {
    %c0_i32 = arith.constant 0 : i32
    %c0_i32_0 = arith.constant 0 : i32
    %c0_i32_1 = arith.constant 0 : i32
    return %c0_i32, %c0_i32_0 : i32, i32
  }
  func.func @transform_3(%arg0: i32, %arg1: i32) -> (i32, i32, i32) {
    %c0_i32 = arith.constant 0 : i32
    %c0_i32_0 = arith.constant 0 : i32
    return %arg0, %arg1, %c0_i32 : i32, i32, i32
  }
}

module attributes {stable_mosaic.version = 11 : i64} {
  func.func @_middle_kernel(%arg0: i32, %arg1: memref<1x4x4x32xf32, #tpu.memory_space<vmem>>, %arg2: memref<9x32x32xbf16, #tpu.memory_space<vmem>>, %arg3: memref<1x32xf32, #tpu.memory_space<vmem>>, %arg4: memref<2x9x32x8xbf16, #tpu.memory_space<vmem>>, %arg5: memref<2x8x32xf32, #tpu.memory_space<vmem>>, %arg6: memref<32x8xf32, #tpu.memory_space<vmem>>, %arg7: memref<1x8xf32, #tpu.memory_space<vmem>>, %arg8: memref<16x8xf32, #tpu.memory_space<vmem>>, %arg9: memref<1x16xf32, #tpu.memory_space<vmem>>, %arg10: memref<9x8x32xbf16, #tpu.memory_space<vmem>>, %arg11: memref<1x32xf32, #tpu.memory_space<vmem>>, %arg12: memref<2x9x32x8xbf16, #tpu.memory_space<vmem>>, %arg13: memref<2x8x32xf32, #tpu.memory_space<vmem>>, %arg14: memref<1x4x4x32xf32, #tpu.memory_space<vmem>>, %arg15: memref<1x1xf32, #tpu.memory_space<vmem>>, %arg16: memref<6x6x32xf32, #tpu.memory_space<vmem>>, %arg17: memref<6x6x8xf32, #tpu.memory_space<vmem>>) attributes {dimension_semantics = [#tpu.dimension_semantics<arbitrary>], iteration_bounds = array<i64: 2>, scalar_prefetch = 0 : i64, scratch_operands = 2 : i64, tpu.core_type = #tpu.core_type<tc>, window_params = [{transform_indices = @transform_0, window_bounds = array<i64: 1, 4, 4, 32>}, {pipeline_mode = #tpu.pipeline_mode<synchronous>, transform_indices = @transform_1, window_bounds = array<i64: 9, 32, 32>}, {pipeline_mode = #tpu.pipeline_mode<synchronous>, transform_indices = @transform_2, window_bounds = array<i64: 1, 32>}, {pipeline_mode = #tpu.pipeline_mode<synchronous>, transform_indices = @transform_3, window_bounds = array<i64: 2, 9, 32, 8>}, {pipeline_mode = #tpu.pipeline_mode<synchronous>, transform_indices = @transform_4, window_bounds = array<i64: 2, 8, 32>}, {pipeline_mode = #tpu.pipeline_mode<synchronous>, transform_indices = @transform_5, window_bounds = array<i64: 32, 8>}, {pipeline_mode = #tpu.pipeline_mode<synchronous>, transform_indices = @transform_6, window_bounds = array<i64: 1, 8>}, {pipeline_mode = #tpu.pipeline_mode<synchronous>, transform_indices = @transform_7, window_bounds = array<i64: 16, 8>}, {pipeline_mode = #tpu.pipeline_mode<synchronous>, transform_indices = @transform_8, window_bounds = array<i64: 1, 16>}, {pipeline_mode = #tpu.pipeline_mode<synchronous>, transform_indices = @transform_9, window_bounds = array<i64: 9, 8, 32>}, {pipeline_mode = #tpu.pipeline_mode<synchronous>, transform_indices = @transform_10, window_bounds = array<i64: 1, 32>}, {pipeline_mode = #tpu.pipeline_mode<synchronous>, transform_indices = @transform_11, window_bounds = array<i64: 2, 9, 32, 8>}, {pipeline_mode = #tpu.pipeline_mode<synchronous>, transform_indices = @transform_12, window_bounds = array<i64: 2, 8, 32>}, {transform_indices = @transform_13, window_bounds = array<i64: 1, 4, 4, 32>}, {pipeline_mode = #tpu.pipeline_mode<synchronous>, transform_indices = @transform_14, window_bounds = array<i64: 1, 1>}]} {
    %c0_i32 = arith.constant 0 : i32
    %0 = arith.cmpi eq, %arg0, %c0_i32 : i32
    %1 = arith.extui %0 : i1 to i32
    %c0_i32_0 = arith.constant 0 : i32
    %2 = arith.cmpi ne, %1, %c0_i32_0 : i32
    scf.if %2 {
      %cst_325 = arith.constant 0.000000e+00 : f32
      %498 = vector.broadcast %cst_325 : f32 to vector<1x1xf32>
      %c0_326 = arith.constant 0 : index
      %c0_327 = arith.constant 0 : index
      %499 = vector.load %arg15[%c0_326, %c0_327] : memref<1x1xf32, #tpu.memory_space<vmem>>, vector<1x1xf32>
      tpu.vector_store %arg15[%c0_326, %c0_327], %498 {strides = array<i32>} : memref<1x1xf32, #tpu.memory_space<vmem>>, vector<1x1xf32>,
    } else {
    }
    %cst = arith.constant 0.000000e+00 : f32
    %3 = vector.broadcast %cst : f32 to vector<6x6x32xf32>
    %c0 = arith.constant 0 : index
    %c0_1 = arith.constant 0 : index
    %c0_2 = arith.constant 0 : index
    %4 = vector.load %arg16[%c0, %c0_1, %c0_2] : memref<6x6x32xf32, #tpu.memory_space<vmem>>, vector<6x6x32xf32>
    tpu.vector_store %arg16[%c0, %c0_1, %c0_2], %3 {strides = array<i32>} : memref<6x6x32xf32, #tpu.memory_space<vmem>>, vector<6x6x32xf32>,
    %cst_3 = arith.constant 0.000000e+00 : f32
    %5 = vector.broadcast %cst_3 : f32 to vector<6x6x8xf32>
    %c0_4 = arith.constant 0 : index
    %c0_5 = arith.constant 0 : index
    %c0_6 = arith.constant 0 : index
    %6 = vector.load %arg17[%c0_4, %c0_5, %c0_6] : memref<6x6x8xf32, #tpu.memory_space<vmem>>, vector<6x6x8xf32>
    tpu.vector_store %arg17[%c0_4, %c0_5, %c0_6], %5 {strides = array<i32>} : memref<6x6x8xf32, #tpu.memory_space<vmem>>, vector<6x6x8xf32>,
    %c0_7 = arith.constant 0 : index
    %c0_8 = arith.constant 0 : index
    %c0_9 = arith.constant 0 : index
    %c0_10 = arith.constant 0 : index
    %7 = vector.load %arg1[%c0_7, %c0_8, %c0_9, %c0_10] : memref<1x4x4x32xf32, #tpu.memory_space<vmem>>, vector<1x4x4x32xf32>
    %8 = vector.shape_cast %7 : vector<1x4x4x32xf32> to vector<4x4x32xf32>
    %c0_11 = arith.constant 0 : index
    %c0_12 = arith.constant 0 : index
    %c0_13 = arith.constant 0 : index
    %9 = vector.load %arg2[%c0_11, %c0_12, %c0_13] : memref<9x32x32xbf16, #tpu.memory_space<vmem>>, vector<9x32x32xbf16>
    %c1 = arith.constant 1 : index
    %c1_14 = arith.constant 1 : index
    %c0_15 = arith.constant 0 : index
    %10 = vector.load %arg16[%c1, %c1_14, %c0_15] : memref<6x6x32xf32, #tpu.memory_space<vmem>>, vector<4x4x32xf32>
    tpu.vector_store %arg16[%c1, %c1_14, %c0_15], %8 {strides = array<i32>} : memref<6x6x32xf32, #tpu.memory_space<vmem>>, vector<4x4x32xf32>,
    %cst_16 = arith.constant 0.000000e+00 : f32
    %11 = vector.broadcast %cst_16 : f32 to vector<16x32xf32>
    %c0_17 = arith.constant 0 : index
    %c0_18 = arith.constant 0 : index
    %c0_19 = arith.constant 0 : index
    %12 = vector.load %arg16[%c0_17, %c0_18, %c0_19] : memref<6x6x32xf32, #tpu.memory_space<vmem>>, vector<4x4x32xf32>
    %13 = vector.shape_cast %12 : vector<4x4x32xf32> to vector<16x32xf32>
    %14 = arith.truncf %13 : vector<16x32xf32> to vector<16x32xbf16>
    %15 = vector.extract_strided_slice %9 {offsets = [0, 0, 0], sizes = [1, 32, 32], strides = [1, 1, 1]} : vector<9x32x32xbf16> to vector<1x32x32xbf16>
    %16 = vector.shape_cast %15 : vector<1x32x32xbf16> to vector<32x32xbf16>
    %cst_20 = arith.constant dense<0.000000e+00> : vector<16x32xf32>
    %17 = tpu.matmul %14, %16, %cst_20 {dimension_numbers = #tpu.dot_dimension_numbers<[1], [0], [0], [1], [0, 0, 1, 1], [], []>} : vector<16x32xbf16>, vector<32x32xbf16>, vector<16x32xf32> -> vector<16x32xf32>
    %18 = arith.addf %11, %17 : vector<16x32xf32>
    %c0_21 = arith.constant 0 : index
    %c1_22 = arith.constant 1 : index
    %c0_23 = arith.constant 0 : index
    %19 = vector.load %arg16[%c0_21, %c1_22, %c0_23] : memref<6x6x32xf32, #tpu.memory_space<vmem>>, vector<4x4x32xf32>
    %20 = vector.shape_cast %19 : vector<4x4x32xf32> to vector<16x32xf32>
    %21 = arith.truncf %20 : vector<16x32xf32> to vector<16x32xbf16>
    %22 = vector.extract_strided_slice %9 {offsets = [1, 0, 0], sizes = [1, 32, 32], strides = [1, 1, 1]} : vector<9x32x32xbf16> to vector<1x32x32xbf16>
    %23 = vector.shape_cast %22 : vector<1x32x32xbf16> to vector<32x32xbf16>
    %cst_24 = arith.constant dense<0.000000e+00> : vector<16x32xf32>
    %24 = tpu.matmul %21, %23, %cst_24 {dimension_numbers = #tpu.dot_dimension_numbers<[1], [0], [0], [1], [0, 0, 1, 1], [], []>} : vector<16x32xbf16>, vector<32x32xbf16>, vector<16x32xf32> -> vector<16x32xf32>
    %25 = arith.addf %18, %24 : vector<16x32xf32>
    %c0_25 = arith.constant 0 : index
    %c2 = arith.constant 2 : index
    %c0_26 = arith.constant 0 : index
    %26 = vector.load %arg16[%c0_25, %c2, %c0_26] : memref<6x6x32xf32, #tpu.memory_space<vmem>>, vector<4x4x32xf32>
    %27 = vector.shape_cast %26 : vector<4x4x32xf32> to vector<16x32xf32>
    %28 = arith.truncf %27 : vector<16x32xf32> to vector<16x32xbf16>
    %29 = vector.extract_strided_slice %9 {offsets = [2, 0, 0], sizes = [1, 32, 32], strides = [1, 1, 1]} : vector<9x32x32xbf16> to vector<1x32x32xbf16>
    %30 = vector.shape_cast %29 : vector<1x32x32xbf16> to vector<32x32xbf16>
    %cst_27 = arith.constant dense<0.000000e+00> : vector<16x32xf32>
    %31 = tpu.matmul %28, %30, %cst_27 {dimension_numbers = #tpu.dot_dimension_numbers<[1], [0], [0], [1], [0, 0, 1, 1], [], []>} : vector<16x32xbf16>, vector<32x32xbf16>, vector<16x32xf32> -> vector<16x32xf32>
    %32 = arith.addf %25, %31 : vector<16x32xf32>
    %c1_28 = arith.constant 1 : index
    %c0_29 = arith.constant 0 : index
    %c0_30 = arith.constant 0 : index
    %33 = vector.load %arg16[%c1_28, %c0_29, %c0_30] : memref<6x6x32xf32, #tpu.memory_space<vmem>>, vector<4x4x32xf32>
    %34 = vector.shape_cast %33 : vector<4x4x32xf32> to vector<16x32xf32>
    %35 = arith.truncf %34 : vector<16x32xf32> to vector<16x32xbf16>
    %36 = vector.extract_strided_slice %9 {offsets = [3, 0, 0], sizes = [1, 32, 32], strides = [1, 1, 1]} : vector<9x32x32xbf16> to vector<1x32x32xbf16>
    %37 = vector.shape_cast %36 : vector<1x32x32xbf16> to vector<32x32xbf16>
    %cst_31 = arith.constant dense<0.000000e+00> : vector<16x32xf32>
    %38 = tpu.matmul %35, %37, %cst_31 {dimension_numbers = #tpu.dot_dimension_numbers<[1], [0], [0], [1], [0, 0, 1, 1], [], []>} : vector<16x32xbf16>, vector<32x32xbf16>, vector<16x32xf32> -> vector<16x32xf32>
    %39 = arith.addf %32, %38 : vector<16x32xf32>
    %c1_32 = arith.constant 1 : index
    %c1_33 = arith.constant 1 : index
    %c0_34 = arith.constant 0 : index
    %40 = vector.load %arg16[%c1_32, %c1_33, %c0_34] : memref<6x6x32xf32, #tpu.memory_space<vmem>>, vector<4x4x32xf32>
    %41 = vector.shape_cast %40 : vector<4x4x32xf32> to vector<16x32xf32>
    %42 = arith.truncf %41 : vector<16x32xf32> to vector<16x32xbf16>
    %43 = vector.extract_strided_slice %9 {offsets = [4, 0, 0], sizes = [1, 32, 32], strides = [1, 1, 1]} : vector<9x32x32xbf16> to vector<1x32x32xbf16>
    %44 = vector.shape_cast %43 : vector<1x32x32xbf16> to vector<32x32xbf16>
    %cst_35 = arith.constant dense<0.000000e+00> : vector<16x32xf32>
    %45 = tpu.matmul %42, %44, %cst_35 {dimension_numbers = #tpu.dot_dimension_numbers<[1], [0], [0], [1], [0, 0, 1, 1], [], []>} : vector<16x32xbf16>, vector<32x32xbf16>, vector<16x32xf32> -> vector<16x32xf32>
    %46 = arith.addf %39, %45 : vector<16x32xf32>
    %c1_36 = arith.constant 1 : index
    %c2_37 = arith.constant 2 : index
    %c0_38 = arith.constant 0 : index
    %47 = vector.load %arg16[%c1_36, %c2_37, %c0_38] : memref<6x6x32xf32, #tpu.memory_space<vmem>>, vector<4x4x32xf32>
    %48 = vector.shape_cast %47 : vector<4x4x32xf32> to vector<16x32xf32>
    %49 = arith.truncf %48 : vector<16x32xf32> to vector<16x32xbf16>
    %50 = vector.extract_strided_slice %9 {offsets = [5, 0, 0], sizes = [1, 32, 32], strides = [1, 1, 1]} : vector<9x32x32xbf16> to vector<1x32x32xbf16>
    %51 = vector.shape_cast %50 : vector<1x32x32xbf16> to vector<32x32xbf16>
    %cst_39 = arith.constant dense<0.000000e+00> : vector<16x32xf32>
    %52 = tpu.matmul %49, %51, %cst_39 {dimension_numbers = #tpu.dot_dimension_numbers<[1], [0], [0], [1], [0, 0, 1, 1], [], []>} : vector<16x32xbf16>, vector<32x32xbf16>, vector<16x32xf32> -> vector<16x32xf32>
    %53 = arith.addf %46, %52 : vector<16x32xf32>
    %c2_40 = arith.constant 2 : index
    %c0_41 = arith.constant 0 : index
    %c0_42 = arith.constant 0 : index
    %54 = vector.load %arg16[%c2_40, %c0_41, %c0_42] : memref<6x6x32xf32, #tpu.memory_space<vmem>>, vector<4x4x32xf32>
    %55 = vector.shape_cast %54 : vector<4x4x32xf32> to vector<16x32xf32>
    %56 = arith.truncf %55 : vector<16x32xf32> to vector<16x32xbf16>
    %57 = vector.extract_strided_slice %9 {offsets = [6, 0, 0], sizes = [1, 32, 32], strides = [1, 1, 1]} : vector<9x32x32xbf16> to vector<1x32x32xbf16>
    %58 = vector.shape_cast %57 : vector<1x32x32xbf16> to vector<32x32xbf16>
    %cst_43 = arith.constant dense<0.000000e+00> : vector<16x32xf32>
    %59 = tpu.matmul %56, %58, %cst_43 {dimension_numbers = #tpu.dot_dimension_numbers<[1], [0], [0], [1], [0, 0, 1, 1], [], []>} : vector<16x32xbf16>, vector<32x32xbf16>, vector<16x32xf32> -> vector<16x32xf32>
    %60 = arith.addf %53, %59 : vector<16x32xf32>
    %c2_44 = arith.constant 2 : index
    %c1_45 = arith.constant 1 : index
    %c0_46 = arith.constant 0 : index
    %61 = vector.load %arg16[%c2_44, %c1_45, %c0_46] : memref<6x6x32xf32, #tpu.memory_space<vmem>>, vector<4x4x32xf32>
    %62 = vector.shape_cast %61 : vector<4x4x32xf32> to vector<16x32xf32>
    %63 = arith.truncf %62 : vector<16x32xf32> to vector<16x32xbf16>
    %64 = vector.extract_strided_slice %9 {offsets = [7, 0, 0], sizes = [1, 32, 32], strides = [1, 1, 1]} : vector<9x32x32xbf16> to vector<1x32x32xbf16>
    %65 = vector.shape_cast %64 : vector<1x32x32xbf16> to vector<32x32xbf16>
    %cst_47 = arith.constant dense<0.000000e+00> : vector<16x32xf32>
    %66 = tpu.matmul %63, %65, %cst_47 {dimension_numbers = #tpu.dot_dimension_numbers<[1], [0], [0], [1], [0, 0, 1, 1], [], []>} : vector<16x32xbf16>, vector<32x32xbf16>, vector<16x32xf32> -> vector<16x32xf32>
    %67 = arith.addf %60, %66 : vector<16x32xf32>
    %c2_48 = arith.constant 2 : index
    %c2_49 = arith.constant 2 : index
    %c0_50 = arith.constant 0 : index
    %68 = vector.load %arg16[%c2_48, %c2_49, %c0_50] : memref<6x6x32xf32, #tpu.memory_space<vmem>>, vector<4x4x32xf32>
    %69 = vector.shape_cast %68 : vector<4x4x32xf32> to vector<16x32xf32>
    %70 = arith.truncf %69 : vector<16x32xf32> to vector<16x32xbf16>
    %71 = vector.extract_strided_slice %9 {offsets = [8, 0, 0], sizes = [1, 32, 32], strides = [1, 1, 1]} : vector<9x32x32xbf16> to vector<1x32x32xbf16>
    %72 = vector.shape_cast %71 : vector<1x32x32xbf16> to vector<32x32xbf16>
    %cst_51 = arith.constant dense<0.000000e+00> : vector<16x32xf32>
    %73 = tpu.matmul %70, %72, %cst_51 {dimension_numbers = #tpu.dot_dimension_numbers<[1], [0], [0], [1], [0, 0, 1, 1], [], []>} : vector<16x32xbf16>, vector<32x32xbf16>, vector<16x32xf32> -> vector<16x32xf32>
    %74 = arith.addf %67, %73 : vector<16x32xf32>
    %c0_52 = arith.constant 0 : index
    %c0_53 = arith.constant 0 : index
    %75 = vector.load %arg3[%c0_52, %c0_53] : memref<1x32xf32, #tpu.memory_space<vmem>>, vector<1x32xf32>
    %76 = vector.broadcast %75 : vector<1x32xf32> to vector<16x32xf32>
    %77 = arith.addf %74, %76 : vector<16x32xf32>
    %c0_54 = arith.constant 0 : index
    %c0_55 = arith.constant 0 : index
    %c0_56 = arith.constant 0 : index
    %c0_57 = arith.constant 0 : index
    %78 = vector.load %arg4[%c0_54, %c0_55, %c0_56, %c0_57] : memref<2x9x32x8xbf16, #tpu.memory_space<vmem>>, vector<1x9x32x8xbf16>
    %79 = vector.shape_cast %78 : vector<1x9x32x8xbf16> to vector<9x32x8xbf16>
    %cst_58 = arith.constant 0.000000e+00 : f32
    %80 = vector.broadcast %cst_58 : f32 to vector<16x32xf32>
    %81 = arith.maximumf %77, %80 : vector<16x32xf32>
    %82 = vector.shape_cast %81 : vector<16x32xf32> to vector<4x4x32xf32>
    %c1_59 = arith.constant 1 : index
    %c1_60 = arith.constant 1 : index
    %c0_61 = arith.constant 0 : index
    %83 = vector.load %arg16[%c1_59, %c1_60, %c0_61] : memref<6x6x32xf32, #tpu.memory_space<vmem>>, vector<4x4x32xf32>
    tpu.vector_store %arg16[%c1_59, %c1_60, %c0_61], %82 {strides = array<i32>} : memref<6x6x32xf32, #tpu.memory_space<vmem>>, vector<4x4x32xf32>,
    %cst_62 = arith.constant 0.000000e+00 : f32
    %84 = vector.broadcast %cst_62 : f32 to vector<16x8xf32>
    %c0_63 = arith.constant 0 : index
    %c0_64 = arith.constant 0 : index
    %c0_65 = arith.constant 0 : index
    %85 = vector.load %arg16[%c0_63, %c0_64, %c0_65] : memref<6x6x32xf32, #tpu.memory_space<vmem>>, vector<4x4x32xf32>
    %86 = vector.shape_cast %85 : vector<4x4x32xf32> to vector<16x32xf32>
    %87 = arith.truncf %86 : vector<16x32xf32> to vector<16x32xbf16>
    %88 = vector.extract_strided_slice %79 {offsets = [0, 0, 0], sizes = [1, 32, 8], strides = [1, 1, 1]} : vector<9x32x8xbf16> to vector<1x32x8xbf16>
    %89 = vector.shape_cast %88 : vector<1x32x8xbf16> to vector<32x8xbf16>
    %cst_66 = arith.constant dense<0.000000e+00> : vector<16x8xf32>
    %90 = tpu.matmul %87, %89, %cst_66 {dimension_numbers = #tpu.dot_dimension_numbers<[1], [0], [0], [1], [0, 0, 1, 1], [], []>} : vector<16x32xbf16>, vector<32x8xbf16>, vector<16x8xf32> -> vector<16x8xf32>
    %91 = arith.addf %84, %90 : vector<16x8xf32>
    %c0_67 = arith.constant 0 : index
    %c1_68 = arith.constant 1 : index
    %c0_69 = arith.constant 0 : index
    %92 = vector.load %arg16[%c0_67, %c1_68, %c0_69] : memref<6x6x32xf32, #tpu.memory_space<vmem>>, vector<4x4x32xf32>
    %93 = vector.shape_cast %92 : vector<4x4x32xf32> to vector<16x32xf32>
    %94 = arith.truncf %93 : vector<16x32xf32> to vector<16x32xbf16>
    %95 = vector.extract_strided_slice %79 {offsets = [1, 0, 0], sizes = [1, 32, 8], strides = [1, 1, 1]} : vector<9x32x8xbf16> to vector<1x32x8xbf16>
    %96 = vector.shape_cast %95 : vector<1x32x8xbf16> to vector<32x8xbf16>
    %cst_70 = arith.constant dense<0.000000e+00> : vector<16x8xf32>
    %97 = tpu.matmul %94, %96, %cst_70 {dimension_numbers = #tpu.dot_dimension_numbers<[1], [0], [0], [1], [0, 0, 1, 1], [], []>} : vector<16x32xbf16>, vector<32x8xbf16>, vector<16x8xf32> -> vector<16x8xf32>
    %98 = arith.addf %91, %97 : vector<16x8xf32>
    %c0_71 = arith.constant 0 : index
    %c2_72 = arith.constant 2 : index
    %c0_73 = arith.constant 0 : index
    %99 = vector.load %arg16[%c0_71, %c2_72, %c0_73] : memref<6x6x32xf32, #tpu.memory_space<vmem>>, vector<4x4x32xf32>
    %100 = vector.shape_cast %99 : vector<4x4x32xf32> to vector<16x32xf32>
    %101 = arith.truncf %100 : vector<16x32xf32> to vector<16x32xbf16>
    %102 = vector.extract_strided_slice %79 {offsets = [2, 0, 0], sizes = [1, 32, 8], strides = [1, 1, 1]} : vector<9x32x8xbf16> to vector<1x32x8xbf16>
    %103 = vector.shape_cast %102 : vector<1x32x8xbf16> to vector<32x8xbf16>
    %cst_74 = arith.constant dense<0.000000e+00> : vector<16x8xf32>
    %104 = tpu.matmul %101, %103, %cst_74 {dimension_numbers = #tpu.dot_dimension_numbers<[1], [0], [0], [1], [0, 0, 1, 1], [], []>} : vector<16x32xbf16>, vector<32x8xbf16>, vector<16x8xf32> -> vector<16x8xf32>
    %105 = arith.addf %98, %104 : vector<16x8xf32>
    %c1_75 = arith.constant 1 : index
    %c0_76 = arith.constant 0 : index
    %c0_77 = arith.constant 0 : index
    %106 = vector.load %arg16[%c1_75, %c0_76, %c0_77] : memref<6x6x32xf32, #tpu.memory_space<vmem>>, vector<4x4x32xf32>
    %107 = vector.shape_cast %106 : vector<4x4x32xf32> to vector<16x32xf32>
    %108 = arith.truncf %107 : vector<16x32xf32> to vector<16x32xbf16>
    %109 = vector.extract_strided_slice %79 {offsets = [3, 0, 0], sizes = [1, 32, 8], strides = [1, 1, 1]} : vector<9x32x8xbf16> to vector<1x32x8xbf16>
    %110 = vector.shape_cast %109 : vector<1x32x8xbf16> to vector<32x8xbf16>
    %cst_78 = arith.constant dense<0.000000e+00> : vector<16x8xf32>
    %111 = tpu.matmul %108, %110, %cst_78 {dimension_numbers = #tpu.dot_dimension_numbers<[1], [0], [0], [1], [0, 0, 1, 1], [], []>} : vector<16x32xbf16>, vector<32x8xbf16>, vector<16x8xf32> -> vector<16x8xf32>
    %112 = arith.addf %105, %111 : vector<16x8xf32>
    %c1_79 = arith.constant 1 : index
    %c1_80 = arith.constant 1 : index
    %c0_81 = arith.constant 0 : index
    %113 = vector.load %arg16[%c1_79, %c1_80, %c0_81] : memref<6x6x32xf32, #tpu.memory_space<vmem>>, vector<4x4x32xf32>
    %114 = vector.shape_cast %113 : vector<4x4x32xf32> to vector<16x32xf32>
    %115 = arith.truncf %114 : vector<16x32xf32> to vector<16x32xbf16>
    %116 = vector.extract_strided_slice %79 {offsets = [4, 0, 0], sizes = [1, 32, 8], strides = [1, 1, 1]} : vector<9x32x8xbf16> to vector<1x32x8xbf16>
    %117 = vector.shape_cast %116 : vector<1x32x8xbf16> to vector<32x8xbf16>
    %cst_82 = arith.constant dense<0.000000e+00> : vector<16x8xf32>
    %118 = tpu.matmul %115, %117, %cst_82 {dimension_numbers = #tpu.dot_dimension_numbers<[1], [0], [0], [1], [0, 0, 1, 1], [], []>} : vector<16x32xbf16>, vector<32x8xbf16>, vector<16x8xf32> -> vector<16x8xf32>
    %119 = arith.addf %112, %118 : vector<16x8xf32>
    %c1_83 = arith.constant 1 : index
    %c2_84 = arith.constant 2 : index
    %c0_85 = arith.constant 0 : index
    %120 = vector.load %arg16[%c1_83, %c2_84, %c0_85] : memref<6x6x32xf32, #tpu.memory_space<vmem>>, vector<4x4x32xf32>
    %121 = vector.shape_cast %120 : vector<4x4x32xf32> to vector<16x32xf32>
    %122 = arith.truncf %121 : vector<16x32xf32> to vector<16x32xbf16>
    %123 = vector.extract_strided_slice %79 {offsets = [5, 0, 0], sizes = [1, 32, 8], strides = [1, 1, 1]} : vector<9x32x8xbf16> to vector<1x32x8xbf16>
    %124 = vector.shape_cast %123 : vector<1x32x8xbf16> to vector<32x8xbf16>
    %cst_86 = arith.constant dense<0.000000e+00> : vector<16x8xf32>
    %125 = tpu.matmul %122, %124, %cst_86 {dimension_numbers = #tpu.dot_dimension_numbers<[1], [0], [0], [1], [0, 0, 1, 1], [], []>} : vector<16x32xbf16>, vector<32x8xbf16>, vector<16x8xf32> -> vector<16x8xf32>
    %126 = arith.addf %119, %125 : vector<16x8xf32>
    %c2_87 = arith.constant 2 : index
    %c0_88 = arith.constant 0 : index
    %c0_89 = arith.constant 0 : index
    %127 = vector.load %arg16[%c2_87, %c0_88, %c0_89] : memref<6x6x32xf32, #tpu.memory_space<vmem>>, vector<4x4x32xf32>
    %128 = vector.shape_cast %127 : vector<4x4x32xf32> to vector<16x32xf32>
    %129 = arith.truncf %128 : vector<16x32xf32> to vector<16x32xbf16>
    %130 = vector.extract_strided_slice %79 {offsets = [6, 0, 0], sizes = [1, 32, 8], strides = [1, 1, 1]} : vector<9x32x8xbf16> to vector<1x32x8xbf16>
    %131 = vector.shape_cast %130 : vector<1x32x8xbf16> to vector<32x8xbf16>
    %cst_90 = arith.constant dense<0.000000e+00> : vector<16x8xf32>
    %132 = tpu.matmul %129, %131, %cst_90 {dimension_numbers = #tpu.dot_dimension_numbers<[1], [0], [0], [1], [0, 0, 1, 1], [], []>} : vector<16x32xbf16>, vector<32x8xbf16>, vector<16x8xf32> -> vector<16x8xf32>
    %133 = arith.addf %126, %132 : vector<16x8xf32>
    %c2_91 = arith.constant 2 : index
    %c1_92 = arith.constant 1 : index
    %c0_93 = arith.constant 0 : index
    %134 = vector.load %arg16[%c2_91, %c1_92, %c0_93] : memref<6x6x32xf32, #tpu.memory_space<vmem>>, vector<4x4x32xf32>
    %135 = vector.shape_cast %134 : vector<4x4x32xf32> to vector<16x32xf32>
    %136 = arith.truncf %135 : vector<16x32xf32> to vector<16x32xbf16>
    %137 = vector.extract_strided_slice %79 {offsets = [7, 0, 0], sizes = [1, 32, 8], strides = [1, 1, 1]} : vector<9x32x8xbf16> to vector<1x32x8xbf16>
    %138 = vector.shape_cast %137 : vector<1x32x8xbf16> to vector<32x8xbf16>
    %cst_94 = arith.constant dense<0.000000e+00> : vector<16x8xf32>
    %139 = tpu.matmul %136, %138, %cst_94 {dimension_numbers = #tpu.dot_dimension_numbers<[1], [0], [0], [1], [0, 0, 1, 1], [], []>} : vector<16x32xbf16>, vector<32x8xbf16>, vector<16x8xf32> -> vector<16x8xf32>
    %140 = arith.addf %133, %139 : vector<16x8xf32>
    %c2_95 = arith.constant 2 : index
    %c2_96 = arith.constant 2 : index
    %c0_97 = arith.constant 0 : index
    %141 = vector.load %arg16[%c2_95, %c2_96, %c0_97] : memref<6x6x32xf32, #tpu.memory_space<vmem>>, vector<4x4x32xf32>
    %142 = vector.shape_cast %141 : vector<4x4x32xf32> to vector<16x32xf32>
    %143 = arith.truncf %142 : vector<16x32xf32> to vector<16x32xbf16>
    %144 = vector.extract_strided_slice %79 {offsets = [8, 0, 0], sizes = [1, 32, 8], strides = [1, 1, 1]} : vector<9x32x8xbf16> to vector<1x32x8xbf16>
    %145 = vector.shape_cast %144 : vector<1x32x8xbf16> to vector<32x8xbf16>
    %cst_98 = arith.constant dense<0.000000e+00> : vector<16x8xf32>
    %146 = tpu.matmul %143, %145, %cst_98 {dimension_numbers = #tpu.dot_dimension_numbers<[1], [0], [0], [1], [0, 0, 1, 1], [], []>} : vector<16x32xbf16>, vector<32x8xbf16>, vector<16x8xf32> -> vector<16x8xf32>
    %147 = arith.addf %140, %146 : vector<16x8xf32>
    %cst_99 = arith.constant 0.000000e+00 : f32
    %148 = vector.broadcast %cst_99 : f32 to vector<16x8xf32>
    %149 = arith.maximumf %147, %148 : vector<16x8xf32>
    %c0_100 = arith.constant 0 : index
    %c0_101 = arith.constant 0 : index
    %c0_102 = arith.constant 0 : index
    %150 = vector.load %arg5[%c0_100, %c0_101, %c0_102] : memref<2x8x32xf32, #tpu.memory_space<vmem>>, vector<1x8x32xf32>
    %151 = vector.shape_cast %150 : vector<1x8x32xf32> to vector<8x32xf32>
    %cst_103 = arith.constant dense<0.000000e+00> : vector<16x32xf32>
    %152 = tpu.matmul %149, %151, %cst_103 {dimension_numbers = #tpu.dot_dimension_numbers<[1], [0], [0], [1], [0, 0, 1, 1], [], []>} : vector<16x8xf32>, vector<8x32xf32>, vector<16x32xf32> -> vector<16x32xf32>
    %153 = arith.addf %77, %152 : vector<16x32xf32>
    %c1_104 = arith.constant 1 : index
    %c0_105 = arith.constant 0 : index
    %c0_106 = arith.constant 0 : index
    %c0_107 = arith.constant 0 : index
    %154 = vector.load %arg4[%c1_104, %c0_105, %c0_106, %c0_107] : memref<2x9x32x8xbf16, #tpu.memory_space<vmem>>, vector<1x9x32x8xbf16>
    %155 = vector.shape_cast %154 : vector<1x9x32x8xbf16> to vector<9x32x8xbf16>
    %cst_108 = arith.constant 0.000000e+00 : f32
    %156 = vector.broadcast %cst_108 : f32 to vector<16x32xf32>
    %157 = arith.maximumf %153, %156 : vector<16x32xf32>
    %158 = vector.shape_cast %157 : vector<16x32xf32> to vector<4x4x32xf32>
    %c1_109 = arith.constant 1 : index
    %c1_110 = arith.constant 1 : index
    %c0_111 = arith.constant 0 : index
    %159 = vector.load %arg16[%c1_109, %c1_110, %c0_111] : memref<6x6x32xf32, #tpu.memory_space<vmem>>, vector<4x4x32xf32>
    tpu.vector_store %arg16[%c1_109, %c1_110, %c0_111], %158 {strides = array<i32>} : memref<6x6x32xf32, #tpu.memory_space<vmem>>, vector<4x4x32xf32>,
    %cst_112 = arith.constant 0.000000e+00 : f32
    %160 = vector.broadcast %cst_112 : f32 to vector<16x8xf32>
    %c0_113 = arith.constant 0 : index
    %c0_114 = arith.constant 0 : index
    %c0_115 = arith.constant 0 : index
    %161 = vector.load %arg16[%c0_113, %c0_114, %c0_115] : memref<6x6x32xf32, #tpu.memory_space<vmem>>, vector<4x4x32xf32>
    %162 = vector.shape_cast %161 : vector<4x4x32xf32> to vector<16x32xf32>
    %163 = arith.truncf %162 : vector<16x32xf32> to vector<16x32xbf16>
    %164 = vector.extract_strided_slice %155 {offsets = [0, 0, 0], sizes = [1, 32, 8], strides = [1, 1, 1]} : vector<9x32x8xbf16> to vector<1x32x8xbf16>
    %165 = vector.shape_cast %164 : vector<1x32x8xbf16> to vector<32x8xbf16>
    %cst_116 = arith.constant dense<0.000000e+00> : vector<16x8xf32>
    %166 = tpu.matmul %163, %165, %cst_116 {dimension_numbers = #tpu.dot_dimension_numbers<[1], [0], [0], [1], [0, 0, 1, 1], [], []>} : vector<16x32xbf16>, vector<32x8xbf16>, vector<16x8xf32> -> vector<16x8xf32>
    %167 = arith.addf %160, %166 : vector<16x8xf32>
    %c0_117 = arith.constant 0 : index
    %c1_118 = arith.constant 1 : index
    %c0_119 = arith.constant 0 : index
    %168 = vector.load %arg16[%c0_117, %c1_118, %c0_119] : memref<6x6x32xf32, #tpu.memory_space<vmem>>, vector<4x4x32xf32>
    %169 = vector.shape_cast %168 : vector<4x4x32xf32> to vector<16x32xf32>
    %170 = arith.truncf %169 : vector<16x32xf32> to vector<16x32xbf16>
    %171 = vector.extract_strided_slice %155 {offsets = [1, 0, 0], sizes = [1, 32, 8], strides = [1, 1, 1]} : vector<9x32x8xbf16> to vector<1x32x8xbf16>
    %172 = vector.shape_cast %171 : vector<1x32x8xbf16> to vector<32x8xbf16>
    %cst_120 = arith.constant dense<0.000000e+00> : vector<16x8xf32>
    %173 = tpu.matmul %170, %172, %cst_120 {dimension_numbers = #tpu.dot_dimension_numbers<[1], [0], [0], [1], [0, 0, 1, 1], [], []>} : vector<16x32xbf16>, vector<32x8xbf16>, vector<16x8xf32> -> vector<16x8xf32>
    %174 = arith.addf %167, %173 : vector<16x8xf32>
    %c0_121 = arith.constant 0 : index
    %c2_122 = arith.constant 2 : index
    %c0_123 = arith.constant 0 : index
    %175 = vector.load %arg16[%c0_121, %c2_122, %c0_123] : memref<6x6x32xf32, #tpu.memory_space<vmem>>, vector<4x4x32xf32>
    %176 = vector.shape_cast %175 : vector<4x4x32xf32> to vector<16x32xf32>
    %177 = arith.truncf %176 : vector<16x32xf32> to vector<16x32xbf16>
    %178 = vector.extract_strided_slice %155 {offsets = [2, 0, 0], sizes = [1, 32, 8], strides = [1, 1, 1]} : vector<9x32x8xbf16> to vector<1x32x8xbf16>
    %179 = vector.shape_cast %178 : vector<1x32x8xbf16> to vector<32x8xbf16>
    %cst_124 = arith.constant dense<0.000000e+00> : vector<16x8xf32>
    %180 = tpu.matmul %177, %179, %cst_124 {dimension_numbers = #tpu.dot_dimension_numbers<[1], [0], [0], [1], [0, 0, 1, 1], [], []>} : vector<16x32xbf16>, vector<32x8xbf16>, vector<16x8xf32> -> vector<16x8xf32>
    %181 = arith.addf %174, %180 : vector<16x8xf32>
    %c1_125 = arith.constant 1 : index
    %c0_126 = arith.constant 0 : index
    %c0_127 = arith.constant 0 : index
    %182 = vector.load %arg16[%c1_125, %c0_126, %c0_127] : memref<6x6x32xf32, #tpu.memory_space<vmem>>, vector<4x4x32xf32>
    %183 = vector.shape_cast %182 : vector<4x4x32xf32> to vector<16x32xf32>
    %184 = arith.truncf %183 : vector<16x32xf32> to vector<16x32xbf16>
    %185 = vector.extract_strided_slice %155 {offsets = [3, 0, 0], sizes = [1, 32, 8], strides = [1, 1, 1]} : vector<9x32x8xbf16> to vector<1x32x8xbf16>
    %186 = vector.shape_cast %185 : vector<1x32x8xbf16> to vector<32x8xbf16>
    %cst_128 = arith.constant dense<0.000000e+00> : vector<16x8xf32>
    %187 = tpu.matmul %184, %186, %cst_128 {dimension_numbers = #tpu.dot_dimension_numbers<[1], [0], [0], [1], [0, 0, 1, 1], [], []>} : vector<16x32xbf16>, vector<32x8xbf16>, vector<16x8xf32> -> vector<16x8xf32>
    %188 = arith.addf %181, %187 : vector<16x8xf32>
    %c1_129 = arith.constant 1 : index
    %c1_130 = arith.constant 1 : index
    %c0_131 = arith.constant 0 : index
    %189 = vector.load %arg16[%c1_129, %c1_130, %c0_131] : memref<6x6x32xf32, #tpu.memory_space<vmem>>, vector<4x4x32xf32>
    %190 = vector.shape_cast %189 : vector<4x4x32xf32> to vector<16x32xf32>
    %191 = arith.truncf %190 : vector<16x32xf32> to vector<16x32xbf16>
    %192 = vector.extract_strided_slice %155 {offsets = [4, 0, 0], sizes = [1, 32, 8], strides = [1, 1, 1]} : vector<9x32x8xbf16> to vector<1x32x8xbf16>
    %193 = vector.shape_cast %192 : vector<1x32x8xbf16> to vector<32x8xbf16>
    %cst_132 = arith.constant dense<0.000000e+00> : vector<16x8xf32>
    %194 = tpu.matmul %191, %193, %cst_132 {dimension_numbers = #tpu.dot_dimension_numbers<[1], [0], [0], [1], [0, 0, 1, 1], [], []>} : vector<16x32xbf16>, vector<32x8xbf16>, vector<16x8xf32> -> vector<16x8xf32>
    %195 = arith.addf %188, %194 : vector<16x8xf32>
    %c1_133 = arith.constant 1 : index
    %c2_134 = arith.constant 2 : index
    %c0_135 = arith.constant 0 : index
    %196 = vector.load %arg16[%c1_133, %c2_134, %c0_135] : memref<6x6x32xf32, #tpu.memory_space<vmem>>, vector<4x4x32xf32>
    %197 = vector.shape_cast %196 : vector<4x4x32xf32> to vector<16x32xf32>
    %198 = arith.truncf %197 : vector<16x32xf32> to vector<16x32xbf16>
    %199 = vector.extract_strided_slice %155 {offsets = [5, 0, 0], sizes = [1, 32, 8], strides = [1, 1, 1]} : vector<9x32x8xbf16> to vector<1x32x8xbf16>
    %200 = vector.shape_cast %199 : vector<1x32x8xbf16> to vector<32x8xbf16>
    %cst_136 = arith.constant dense<0.000000e+00> : vector<16x8xf32>
    %201 = tpu.matmul %198, %200, %cst_136 {dimension_numbers = #tpu.dot_dimension_numbers<[1], [0], [0], [1], [0, 0, 1, 1], [], []>} : vector<16x32xbf16>, vector<32x8xbf16>, vector<16x8xf32> -> vector<16x8xf32>
    %202 = arith.addf %195, %201 : vector<16x8xf32>
    %c2_137 = arith.constant 2 : index
    %c0_138 = arith.constant 0 : index
    %c0_139 = arith.constant 0 : index
    %203 = vector.load %arg16[%c2_137, %c0_138, %c0_139] : memref<6x6x32xf32, #tpu.memory_space<vmem>>, vector<4x4x32xf32>
    %204 = vector.shape_cast %203 : vector<4x4x32xf32> to vector<16x32xf32>
    %205 = arith.truncf %204 : vector<16x32xf32> to vector<16x32xbf16>
    %206 = vector.extract_strided_slice %155 {offsets = [6, 0, 0], sizes = [1, 32, 8], strides = [1, 1, 1]} : vector<9x32x8xbf16> to vector<1x32x8xbf16>
    %207 = vector.shape_cast %206 : vector<1x32x8xbf16> to vector<32x8xbf16>
    %cst_140 = arith.constant dense<0.000000e+00> : vector<16x8xf32>
    %208 = tpu.matmul %205, %207, %cst_140 {dimension_numbers = #tpu.dot_dimension_numbers<[1], [0], [0], [1], [0, 0, 1, 1], [], []>} : vector<16x32xbf16>, vector<32x8xbf16>, vector<16x8xf32> -> vector<16x8xf32>
    %209 = arith.addf %202, %208 : vector<16x8xf32>
    %c2_141 = arith.constant 2 : index
    %c1_142 = arith.constant 1 : index
    %c0_143 = arith.constant 0 : index
    %210 = vector.load %arg16[%c2_141, %c1_142, %c0_143] : memref<6x6x32xf32, #tpu.memory_space<vmem>>, vector<4x4x32xf32>
    %211 = vector.shape_cast %210 : vector<4x4x32xf32> to vector<16x32xf32>
    %212 = arith.truncf %211 : vector<16x32xf32> to vector<16x32xbf16>
    %213 = vector.extract_strided_slice %155 {offsets = [7, 0, 0], sizes = [1, 32, 8], strides = [1, 1, 1]} : vector<9x32x8xbf16> to vector<1x32x8xbf16>
    %214 = vector.shape_cast %213 : vector<1x32x8xbf16> to vector<32x8xbf16>
    %cst_144 = arith.constant dense<0.000000e+00> : vector<16x8xf32>
    %215 = tpu.matmul %212, %214, %cst_144 {dimension_numbers = #tpu.dot_dimension_numbers<[1], [0], [0], [1], [0, 0, 1, 1], [], []>} : vector<16x32xbf16>, vector<32x8xbf16>, vector<16x8xf32> -> vector<16x8xf32>
    %216 = arith.addf %209, %215 : vector<16x8xf32>
    %c2_145 = arith.constant 2 : index
    %c2_146 = arith.constant 2 : index
    %c0_147 = arith.constant 0 : index
    %217 = vector.load %arg16[%c2_145, %c2_146, %c0_147] : memref<6x6x32xf32, #tpu.memory_space<vmem>>, vector<4x4x32xf32>
    %218 = vector.shape_cast %217 : vector<4x4x32xf32> to vector<16x32xf32>
    %219 = arith.truncf %218 : vector<16x32xf32> to vector<16x32xbf16>
    %220 = vector.extract_strided_slice %155 {offsets = [8, 0, 0], sizes = [1, 32, 8], strides = [1, 1, 1]} : vector<9x32x8xbf16> to vector<1x32x8xbf16>
    %221 = vector.shape_cast %220 : vector<1x32x8xbf16> to vector<32x8xbf16>
    %cst_148 = arith.constant dense<0.000000e+00> : vector<16x8xf32>
    %222 = tpu.matmul %219, %221, %cst_148 {dimension_numbers = #tpu.dot_dimension_numbers<[1], [0], [0], [1], [0, 0, 1, 1], [], []>} : vector<16x32xbf16>, vector<32x8xbf16>, vector<16x8xf32> -> vector<16x8xf32>
    %223 = arith.addf %216, %222 : vector<16x8xf32>
    %cst_149 = arith.constant 0.000000e+00 : f32
    %224 = vector.broadcast %cst_149 : f32 to vector<16x8xf32>
    %225 = arith.maximumf %223, %224 : vector<16x8xf32>
    %c1_150 = arith.constant 1 : index
    %c0_151 = arith.constant 0 : index
    %c0_152 = arith.constant 0 : index
    %226 = vector.load %arg5[%c1_150, %c0_151, %c0_152] : memref<2x8x32xf32, #tpu.memory_space<vmem>>, vector<1x8x32xf32>
    %227 = vector.shape_cast %226 : vector<1x8x32xf32> to vector<8x32xf32>
    %cst_153 = arith.constant dense<0.000000e+00> : vector<16x32xf32>
    %228 = tpu.matmul %225, %227, %cst_153 {dimension_numbers = #tpu.dot_dimension_numbers<[1], [0], [0], [1], [0, 0, 1, 1], [], []>} : vector<16x8xf32>, vector<8x32xf32>, vector<16x32xf32> -> vector<16x32xf32>
    %229 = arith.addf %153, %228 : vector<16x32xf32>
    %cst_154 = arith.constant 0.000000e+00 : f32
    %230 = vector.broadcast %cst_154 : f32 to vector<16x32xf32>
    %231 = arith.maximumf %229, %230 : vector<16x32xf32>
    %c0_155 = arith.constant 0 : index
    %c0_156 = arith.constant 0 : index
    %232 = vector.load %arg6[%c0_155, %c0_156] : memref<32x8xf32, #tpu.memory_space<vmem>>, vector<32x8xf32>
    %cst_157 = arith.constant dense<0.000000e+00> : vector<16x8xf32>
    %233 = tpu.matmul %231, %232, %cst_157 {dimension_numbers = #tpu.dot_dimension_numbers<[1], [0], [0], [1], [0, 0, 1, 1], [], []>} : vector<16x32xf32>, vector<32x8xf32>, vector<16x8xf32> -> vector<16x8xf32>
    %c0_158 = arith.constant 0 : index
    %c0_159 = arith.constant 0 : index
    %234 = vector.load %arg7[%c0_158, %c0_159] : memref<1x8xf32, #tpu.memory_space<vmem>>, vector<1x8xf32>
    %235 = vector.broadcast %234 : vector<1x8xf32> to vector<16x8xf32>
    %236 = arith.addf %233, %235 : vector<16x8xf32>
    %c0_160 = arith.constant 0 : index
    %c0_161 = arith.constant 0 : index
    %237 = vector.load %arg8[%c0_160, %c0_161] : memref<16x8xf32, #tpu.memory_space<vmem>>, vector<16x8xf32>
    %238 = arith.mulf %236, %236 : vector<16x8xf32>
    %cst_162 = arith.constant dense<0.000000e+00> : vector<16xf32>
    %239 = vector.multi_reduction <add>, %238, %cst_162 [1] : vector<16x8xf32> to vector<16xf32>
    %240 = vector.shape_cast %239 : vector<16xf32> to vector<16x1xf32>
    %cst_163 = arith.constant dense<0.000000e+00> : vector<16x16xf32>
    %241 = tpu.matmul %236, %237, %cst_163 {dimension_numbers = #tpu.dot_dimension_numbers<[1], [1], [0], [0], [0, 0, 1, 0], [], []>} : vector<16x8xf32>, vector<16x8xf32>, vector<16x16xf32> -> vector<16x16xf32>
    %cst_164 = arith.constant 2.000000e+00 : f32
    %242 = vector.broadcast %cst_164 : f32 to vector<16x16xf32>
    %243 = arith.mulf %242, %241 : vector<16x16xf32>
    %244 = vector.broadcast %240 : vector<16x1xf32> to vector<16x16xf32>
    %245 = arith.subf %244, %243 : vector<16x16xf32>
    %c0_165 = arith.constant 0 : index
    %c0_166 = arith.constant 0 : index
    %246 = vector.load %arg9[%c0_165, %c0_166] : memref<1x16xf32, #tpu.memory_space<vmem>>, vector<1x16xf32>
    %247 = vector.broadcast %246 : vector<1x16xf32> to vector<16x16xf32>
    %248 = arith.addf %245, %247 : vector<16x16xf32>
    %249 = tpu.iota {dimensions = array<i32: 1>} : vector<16x16xi32>
    %cst_167 = arith.constant dense<0x7F800000> : vector<16xf32>
    %250 = vector.multi_reduction <minimumf>, %248, %cst_167 [1] : vector<16x16xf32> to vector<16xf32>
    %251 = vector.shape_cast %250 : vector<16xf32> to vector<16x1xf32>
    %252 = vector.broadcast %251 : vector<16x1xf32> to vector<16x16xf32>
    %253 = arith.cmpf ole, %248, %252 : vector<16x16xf32>
    %c16_i32 = arith.constant 16 : i32
    %254 = vector.broadcast %c16_i32 : i32 to vector<16x16xi32>
    %255 = arith.select %253, %249, %254 : vector<16x16xi1>, vector<16x16xi32>
    %cst_168 = arith.constant dense<2147483647> : vector<16xi32>
    %256 = vector.multi_reduction <minsi>, %255, %cst_168 [1] : vector<16x16xi32> to vector<16xi32>
    %257 = vector.shape_cast %256 : vector<16xi32> to vector<16x1xi32>
    %258 = vector.broadcast %257 : vector<16x1xi32> to vector<16x16xi32>
    %259 = arith.cmpi eq, %249, %258 : vector<16x16xi32>
    %260 = arith.extui %259 : vector<16x16xi1> to vector<16x16xi32>
    %261 = arith.sitofp %260 : vector<16x16xi32> to vector<16x16xf32>
    %cst_169 = arith.constant dense<0.000000e+00> : vector<16x8xf32>
    %262 = tpu.matmul %261, %237, %cst_169 {dimension_numbers = #tpu.dot_dimension_numbers<[1], [0], [0], [1], [0, 0, 1, 1], [], []>} : vector<16x16xf32>, vector<16x8xf32>, vector<16x8xf32> -> vector<16x8xf32>
    %263 = arith.subf %262, %236 : vector<16x8xf32>
    %c0_170 = arith.constant 0 : index
    %c0_171 = arith.constant 0 : index
    %264 = vector.load %arg15[%c0_170, %c0_171] : memref<1x1xf32, #tpu.memory_space<vmem>>, vector<1x1xf32>
    %265 = arith.mulf %263, %263 : vector<16x8xf32>
    %cst_172 = arith.constant dense<0.000000e+00> : vector<16xf32>
    %266 = vector.multi_reduction <add>, %265, %cst_172 [1] : vector<16x8xf32> to vector<16xf32>
    %267 = vector.shape_cast %266 : vector<16xf32> to vector<16x1xf32>
    %cst_173 = arith.constant dense<0.000000e+00> : vector<1xf32>
    %268 = vector.multi_reduction <add>, %267, %cst_173 [0] : vector<16x1xf32> to vector<1xf32>
    %269 = vector.shape_cast %268 : vector<1xf32> to vector<1x1xf32>
    %270 = arith.addf %264, %269 : vector<1x1xf32>
    %c0_174 = arith.constant 0 : index
    %c0_175 = arith.constant 0 : index
    %271 = vector.load %arg15[%c0_174, %c0_175] : memref<1x1xf32, #tpu.memory_space<vmem>>, vector<1x1xf32>
    tpu.vector_store %arg15[%c0_174, %c0_175], %270 {strides = array<i32>} : memref<1x1xf32, #tpu.memory_space<vmem>>, vector<1x1xf32>,
    %272 = vector.shape_cast %262 : vector<16x8xf32> to vector<4x4x8xf32>
    %c0_176 = arith.constant 0 : index
    %c0_177 = arith.constant 0 : index
    %c0_178 = arith.constant 0 : index
    %273 = vector.load %arg10[%c0_176, %c0_177, %c0_178] : memref<9x8x32xbf16, #tpu.memory_space<vmem>>, vector<9x8x32xbf16>
    %c1_179 = arith.constant 1 : index
    %c1_180 = arith.constant 1 : index
    %c0_181 = arith.constant 0 : index
    %274 = vector.load %arg17[%c1_179, %c1_180, %c0_181] : memref<6x6x8xf32, #tpu.memory_space<vmem>>, vector<4x4x8xf32>
    tpu.vector_store %arg17[%c1_179, %c1_180, %c0_181], %272 {strides = array<i32>} : memref<6x6x8xf32, #tpu.memory_space<vmem>>, vector<4x4x8xf32>,
    %cst_182 = arith.constant 0.000000e+00 : f32
    %275 = vector.broadcast %cst_182 : f32 to vector<16x32xf32>
    %c0_183 = arith.constant 0 : index
    %c0_184 = arith.constant 0 : index
    %c0_185 = arith.constant 0 : index
    %276 = vector.load %arg17[%c0_183, %c0_184, %c0_185] : memref<6x6x8xf32, #tpu.memory_space<vmem>>, vector<4x4x8xf32>
    %277 = vector.shape_cast %276 : vector<4x4x8xf32> to vector<16x8xf32>
    %278 = arith.truncf %277 : vector<16x8xf32> to vector<16x8xbf16>
    %279 = vector.extract_strided_slice %273 {offsets = [0, 0, 0], sizes = [1, 8, 32], strides = [1, 1, 1]} : vector<9x8x32xbf16> to vector<1x8x32xbf16>
    %280 = vector.shape_cast %279 : vector<1x8x32xbf16> to vector<8x32xbf16>
    %cst_186 = arith.constant dense<0.000000e+00> : vector<16x32xf32>
    %281 = tpu.matmul %278, %280, %cst_186 {dimension_numbers = #tpu.dot_dimension_numbers<[1], [0], [0], [1], [0, 0, 1, 1], [], []>} : vector<16x8xbf16>, vector<8x32xbf16>, vector<16x32xf32> -> vector<16x32xf32>
    %282 = arith.addf %275, %281 : vector<16x32xf32>
    %c0_187 = arith.constant 0 : index
    %c1_188 = arith.constant 1 : index
    %c0_189 = arith.constant 0 : index
    %283 = vector.load %arg17[%c0_187, %c1_188, %c0_189] : memref<6x6x8xf32, #tpu.memory_space<vmem>>, vector<4x4x8xf32>
    %284 = vector.shape_cast %283 : vector<4x4x8xf32> to vector<16x8xf32>
    %285 = arith.truncf %284 : vector<16x8xf32> to vector<16x8xbf16>
    %286 = vector.extract_strided_slice %273 {offsets = [1, 0, 0], sizes = [1, 8, 32], strides = [1, 1, 1]} : vector<9x8x32xbf16> to vector<1x8x32xbf16>
    %287 = vector.shape_cast %286 : vector<1x8x32xbf16> to vector<8x32xbf16>
    %cst_190 = arith.constant dense<0.000000e+00> : vector<16x32xf32>
    %288 = tpu.matmul %285, %287, %cst_190 {dimension_numbers = #tpu.dot_dimension_numbers<[1], [0], [0], [1], [0, 0, 1, 1], [], []>} : vector<16x8xbf16>, vector<8x32xbf16>, vector<16x32xf32> -> vector<16x32xf32>
    %289 = arith.addf %282, %288 : vector<16x32xf32>
    %c0_191 = arith.constant 0 : index
    %c2_192 = arith.constant 2 : index
    %c0_193 = arith.constant 0 : index
    %290 = vector.load %arg17[%c0_191, %c2_192, %c0_193] : memref<6x6x8xf32, #tpu.memory_space<vmem>>, vector<4x4x8xf32>
    %291 = vector.shape_cast %290 : vector<4x4x8xf32> to vector<16x8xf32>
    %292 = arith.truncf %291 : vector<16x8xf32> to vector<16x8xbf16>
    %293 = vector.extract_strided_slice %273 {offsets = [2, 0, 0], sizes = [1, 8, 32], strides = [1, 1, 1]} : vector<9x8x32xbf16> to vector<1x8x32xbf16>
    %294 = vector.shape_cast %293 : vector<1x8x32xbf16> to vector<8x32xbf16>
    %cst_194 = arith.constant dense<0.000000e+00> : vector<16x32xf32>
    %295 = tpu.matmul %292, %294, %cst_194 {dimension_numbers = #tpu.dot_dimension_numbers<[1], [0], [0], [1], [0, 0, 1, 1], [], []>} : vector<16x8xbf16>, vector<8x32xbf16>, vector<16x32xf32> -> vector<16x32xf32>
    %296 = arith.addf %289, %295 : vector<16x32xf32>
    %c1_195 = arith.constant 1 : index
    %c0_196 = arith.constant 0 : index
    %c0_197 = arith.constant 0 : index
    %297 = vector.load %arg17[%c1_195, %c0_196, %c0_197] : memref<6x6x8xf32, #tpu.memory_space<vmem>>, vector<4x4x8xf32>
    %298 = vector.shape_cast %297 : vector<4x4x8xf32> to vector<16x8xf32>
    %299 = arith.truncf %298 : vector<16x8xf32> to vector<16x8xbf16>
    %300 = vector.extract_strided_slice %273 {offsets = [3, 0, 0], sizes = [1, 8, 32], strides = [1, 1, 1]} : vector<9x8x32xbf16> to vector<1x8x32xbf16>
    %301 = vector.shape_cast %300 : vector<1x8x32xbf16> to vector<8x32xbf16>
    %cst_198 = arith.constant dense<0.000000e+00> : vector<16x32xf32>
    %302 = tpu.matmul %299, %301, %cst_198 {dimension_numbers = #tpu.dot_dimension_numbers<[1], [0], [0], [1], [0, 0, 1, 1], [], []>} : vector<16x8xbf16>, vector<8x32xbf16>, vector<16x32xf32> -> vector<16x32xf32>
    %303 = arith.addf %296, %302 : vector<16x32xf32>
    %c1_199 = arith.constant 1 : index
    %c1_200 = arith.constant 1 : index
    %c0_201 = arith.constant 0 : index
    %304 = vector.load %arg17[%c1_199, %c1_200, %c0_201] : memref<6x6x8xf32, #tpu.memory_space<vmem>>, vector<4x4x8xf32>
    %305 = vector.shape_cast %304 : vector<4x4x8xf32> to vector<16x8xf32>
    %306 = arith.truncf %305 : vector<16x8xf32> to vector<16x8xbf16>
    %307 = vector.extract_strided_slice %273 {offsets = [4, 0, 0], sizes = [1, 8, 32], strides = [1, 1, 1]} : vector<9x8x32xbf16> to vector<1x8x32xbf16>
    %308 = vector.shape_cast %307 : vector<1x8x32xbf16> to vector<8x32xbf16>
    %cst_202 = arith.constant dense<0.000000e+00> : vector<16x32xf32>
    %309 = tpu.matmul %306, %308, %cst_202 {dimension_numbers = #tpu.dot_dimension_numbers<[1], [0], [0], [1], [0, 0, 1, 1], [], []>} : vector<16x8xbf16>, vector<8x32xbf16>, vector<16x32xf32> -> vector<16x32xf32>
    %310 = arith.addf %303, %309 : vector<16x32xf32>
    %c1_203 = arith.constant 1 : index
    %c2_204 = arith.constant 2 : index
    %c0_205 = arith.constant 0 : index
    %311 = vector.load %arg17[%c1_203, %c2_204, %c0_205] : memref<6x6x8xf32, #tpu.memory_space<vmem>>, vector<4x4x8xf32>
    %312 = vector.shape_cast %311 : vector<4x4x8xf32> to vector<16x8xf32>
    %313 = arith.truncf %312 : vector<16x8xf32> to vector<16x8xbf16>
    %314 = vector.extract_strided_slice %273 {offsets = [5, 0, 0], sizes = [1, 8, 32], strides = [1, 1, 1]} : vector<9x8x32xbf16> to vector<1x8x32xbf16>
    %315 = vector.shape_cast %314 : vector<1x8x32xbf16> to vector<8x32xbf16>
    %cst_206 = arith.constant dense<0.000000e+00> : vector<16x32xf32>
    %316 = tpu.matmul %313, %315, %cst_206 {dimension_numbers = #tpu.dot_dimension_numbers<[1], [0], [0], [1], [0, 0, 1, 1], [], []>} : vector<16x8xbf16>, vector<8x32xbf16>, vector<16x32xf32> -> vector<16x32xf32>
    %317 = arith.addf %310, %316 : vector<16x32xf32>
    %c2_207 = arith.constant 2 : index
    %c0_208 = arith.constant 0 : index
    %c0_209 = arith.constant 0 : index
    %318 = vector.load %arg17[%c2_207, %c0_208, %c0_209] : memref<6x6x8xf32, #tpu.memory_space<vmem>>, vector<4x4x8xf32>
    %319 = vector.shape_cast %318 : vector<4x4x8xf32> to vector<16x8xf32>
    %320 = arith.truncf %319 : vector<16x8xf32> to vector<16x8xbf16>
    %321 = vector.extract_strided_slice %273 {offsets = [6, 0, 0], sizes = [1, 8, 32], strides = [1, 1, 1]} : vector<9x8x32xbf16> to vector<1x8x32xbf16>
    %322 = vector.shape_cast %321 : vector<1x8x32xbf16> to vector<8x32xbf16>
    %cst_210 = arith.constant dense<0.000000e+00> : vector<16x32xf32>
    %323 = tpu.matmul %320, %322, %cst_210 {dimension_numbers = #tpu.dot_dimension_numbers<[1], [0], [0], [1], [0, 0, 1, 1], [], []>} : vector<16x8xbf16>, vector<8x32xbf16>, vector<16x32xf32> -> vector<16x32xf32>
    %324 = arith.addf %317, %323 : vector<16x32xf32>
    %c2_211 = arith.constant 2 : index
    %c1_212 = arith.constant 1 : index
    %c0_213 = arith.constant 0 : index
    %325 = vector.load %arg17[%c2_211, %c1_212, %c0_213] : memref<6x6x8xf32, #tpu.memory_space<vmem>>, vector<4x4x8xf32>
    %326 = vector.shape_cast %325 : vector<4x4x8xf32> to vector<16x8xf32>
    %327 = arith.truncf %326 : vector<16x8xf32> to vector<16x8xbf16>
    %328 = vector.extract_strided_slice %273 {offsets = [7, 0, 0], sizes = [1, 8, 32], strides = [1, 1, 1]} : vector<9x8x32xbf16> to vector<1x8x32xbf16>
    %329 = vector.shape_cast %328 : vector<1x8x32xbf16> to vector<8x32xbf16>
    %cst_214 = arith.constant dense<0.000000e+00> : vector<16x32xf32>
    %330 = tpu.matmul %327, %329, %cst_214 {dimension_numbers = #tpu.dot_dimension_numbers<[1], [0], [0], [1], [0, 0, 1, 1], [], []>} : vector<16x8xbf16>, vector<8x32xbf16>, vector<16x32xf32> -> vector<16x32xf32>
    %331 = arith.addf %324, %330 : vector<16x32xf32>
    %c2_215 = arith.constant 2 : index
    %c2_216 = arith.constant 2 : index
    %c0_217 = arith.constant 0 : index
    %332 = vector.load %arg17[%c2_215, %c2_216, %c0_217] : memref<6x6x8xf32, #tpu.memory_space<vmem>>, vector<4x4x8xf32>
    %333 = vector.shape_cast %332 : vector<4x4x8xf32> to vector<16x8xf32>
    %334 = arith.truncf %333 : vector<16x8xf32> to vector<16x8xbf16>
    %335 = vector.extract_strided_slice %273 {offsets = [8, 0, 0], sizes = [1, 8, 32], strides = [1, 1, 1]} : vector<9x8x32xbf16> to vector<1x8x32xbf16>
    %336 = vector.shape_cast %335 : vector<1x8x32xbf16> to vector<8x32xbf16>
    %cst_218 = arith.constant dense<0.000000e+00> : vector<16x32xf32>
    %337 = tpu.matmul %334, %336, %cst_218 {dimension_numbers = #tpu.dot_dimension_numbers<[1], [0], [0], [1], [0, 0, 1, 1], [], []>} : vector<16x8xbf16>, vector<8x32xbf16>, vector<16x32xf32> -> vector<16x32xf32>
    %338 = arith.addf %331, %337 : vector<16x32xf32>
    %c0_219 = arith.constant 0 : index
    %c0_220 = arith.constant 0 : index
    %339 = vector.load %arg11[%c0_219, %c0_220] : memref<1x32xf32, #tpu.memory_space<vmem>>, vector<1x32xf32>
    %340 = vector.broadcast %339 : vector<1x32xf32> to vector<16x32xf32>
    %341 = arith.addf %338, %340 : vector<16x32xf32>
    %c0_221 = arith.constant 0 : index
    %c0_222 = arith.constant 0 : index
    %c0_223 = arith.constant 0 : index
    %c0_224 = arith.constant 0 : index
    %342 = vector.load %arg12[%c0_221, %c0_222, %c0_223, %c0_224] : memref<2x9x32x8xbf16, #tpu.memory_space<vmem>>, vector<1x9x32x8xbf16>
    %343 = vector.shape_cast %342 : vector<1x9x32x8xbf16> to vector<9x32x8xbf16>
    %cst_225 = arith.constant 0.000000e+00 : f32
    %344 = vector.broadcast %cst_225 : f32 to vector<16x32xf32>
    %345 = arith.maximumf %341, %344 : vector<16x32xf32>
    %346 = vector.shape_cast %345 : vector<16x32xf32> to vector<4x4x32xf32>
    %c1_226 = arith.constant 1 : index
    %c1_227 = arith.constant 1 : index
    %c0_228 = arith.constant 0 : index
    %347 = vector.load %arg16[%c1_226, %c1_227, %c0_228] : memref<6x6x32xf32, #tpu.memory_space<vmem>>, vector<4x4x32xf32>
    tpu.vector_store %arg16[%c1_226, %c1_227, %c0_228], %346 {strides = array<i32>} : memref<6x6x32xf32, #tpu.memory_space<vmem>>, vector<4x4x32xf32>,
    %cst_229 = arith.constant 0.000000e+00 : f32
    %348 = vector.broadcast %cst_229 : f32 to vector<16x8xf32>
    %c0_230 = arith.constant 0 : index
    %c0_231 = arith.constant 0 : index
    %c0_232 = arith.constant 0 : index
    %349 = vector.load %arg16[%c0_230, %c0_231, %c0_232] : memref<6x6x32xf32, #tpu.memory_space<vmem>>, vector<4x4x32xf32>
    %350 = vector.shape_cast %349 : vector<4x4x32xf32> to vector<16x32xf32>
    %351 = arith.truncf %350 : vector<16x32xf32> to vector<16x32xbf16>
    %352 = vector.extract_strided_slice %343 {offsets = [0, 0, 0], sizes = [1, 32, 8], strides = [1, 1, 1]} : vector<9x32x8xbf16> to vector<1x32x8xbf16>
    %353 = vector.shape_cast %352 : vector<1x32x8xbf16> to vector<32x8xbf16>
    %cst_233 = arith.constant dense<0.000000e+00> : vector<16x8xf32>
    %354 = tpu.matmul %351, %353, %cst_233 {dimension_numbers = #tpu.dot_dimension_numbers<[1], [0], [0], [1], [0, 0, 1, 1], [], []>} : vector<16x32xbf16>, vector<32x8xbf16>, vector<16x8xf32> -> vector<16x8xf32>
    %355 = arith.addf %348, %354 : vector<16x8xf32>
    %c0_234 = arith.constant 0 : index
    %c1_235 = arith.constant 1 : index
    %c0_236 = arith.constant 0 : index
    %356 = vector.load %arg16[%c0_234, %c1_235, %c0_236] : memref<6x6x32xf32, #tpu.memory_space<vmem>>, vector<4x4x32xf32>
    %357 = vector.shape_cast %356 : vector<4x4x32xf32> to vector<16x32xf32>
    %358 = arith.truncf %357 : vector<16x32xf32> to vector<16x32xbf16>
    %359 = vector.extract_strided_slice %343 {offsets = [1, 0, 0], sizes = [1, 32, 8], strides = [1, 1, 1]} : vector<9x32x8xbf16> to vector<1x32x8xbf16>
    %360 = vector.shape_cast %359 : vector<1x32x8xbf16> to vector<32x8xbf16>
    %cst_237 = arith.constant dense<0.000000e+00> : vector<16x8xf32>
    %361 = tpu.matmul %358, %360, %cst_237 {dimension_numbers = #tpu.dot_dimension_numbers<[1], [0], [0], [1], [0, 0, 1, 1], [], []>} : vector<16x32xbf16>, vector<32x8xbf16>, vector<16x8xf32> -> vector<16x8xf32>
    %362 = arith.addf %355, %361 : vector<16x8xf32>
    %c0_238 = arith.constant 0 : index
    %c2_239 = arith.constant 2 : index
    %c0_240 = arith.constant 0 : index
    %363 = vector.load %arg16[%c0_238, %c2_239, %c0_240] : memref<6x6x32xf32, #tpu.memory_space<vmem>>, vector<4x4x32xf32>
    %364 = vector.shape_cast %363 : vector<4x4x32xf32> to vector<16x32xf32>
    %365 = arith.truncf %364 : vector<16x32xf32> to vector<16x32xbf16>
    %366 = vector.extract_strided_slice %343 {offsets = [2, 0, 0], sizes = [1, 32, 8], strides = [1, 1, 1]} : vector<9x32x8xbf16> to vector<1x32x8xbf16>
    %367 = vector.shape_cast %366 : vector<1x32x8xbf16> to vector<32x8xbf16>
    %cst_241 = arith.constant dense<0.000000e+00> : vector<16x8xf32>
    %368 = tpu.matmul %365, %367, %cst_241 {dimension_numbers = #tpu.dot_dimension_numbers<[1], [0], [0], [1], [0, 0, 1, 1], [], []>} : vector<16x32xbf16>, vector<32x8xbf16>, vector<16x8xf32> -> vector<16x8xf32>
    %369 = arith.addf %362, %368 : vector<16x8xf32>
    %c1_242 = arith.constant 1 : index
    %c0_243 = arith.constant 0 : index
    %c0_244 = arith.constant 0 : index
    %370 = vector.load %arg16[%c1_242, %c0_243, %c0_244] : memref<6x6x32xf32, #tpu.memory_space<vmem>>, vector<4x4x32xf32>
    %371 = vector.shape_cast %370 : vector<4x4x32xf32> to vector<16x32xf32>
    %372 = arith.truncf %371 : vector<16x32xf32> to vector<16x32xbf16>
    %373 = vector.extract_strided_slice %343 {offsets = [3, 0, 0], sizes = [1, 32, 8], strides = [1, 1, 1]} : vector<9x32x8xbf16> to vector<1x32x8xbf16>
    %374 = vector.shape_cast %373 : vector<1x32x8xbf16> to vector<32x8xbf16>
    %cst_245 = arith.constant dense<0.000000e+00> : vector<16x8xf32>
    %375 = tpu.matmul %372, %374, %cst_245 {dimension_numbers = #tpu.dot_dimension_numbers<[1], [0], [0], [1], [0, 0, 1, 1], [], []>} : vector<16x32xbf16>, vector<32x8xbf16>, vector<16x8xf32> -> vector<16x8xf32>
    %376 = arith.addf %369, %375 : vector<16x8xf32>
    %c1_246 = arith.constant 1 : index
    %c1_247 = arith.constant 1 : index
    %c0_248 = arith.constant 0 : index
    %377 = vector.load %arg16[%c1_246, %c1_247, %c0_248] : memref<6x6x32xf32, #tpu.memory_space<vmem>>, vector<4x4x32xf32>
    %378 = vector.shape_cast %377 : vector<4x4x32xf32> to vector<16x32xf32>
    %379 = arith.truncf %378 : vector<16x32xf32> to vector<16x32xbf16>
    %380 = vector.extract_strided_slice %343 {offsets = [4, 0, 0], sizes = [1, 32, 8], strides = [1, 1, 1]} : vector<9x32x8xbf16> to vector<1x32x8xbf16>
    %381 = vector.shape_cast %380 : vector<1x32x8xbf16> to vector<32x8xbf16>
    %cst_249 = arith.constant dense<0.000000e+00> : vector<16x8xf32>
    %382 = tpu.matmul %379, %381, %cst_249 {dimension_numbers = #tpu.dot_dimension_numbers<[1], [0], [0], [1], [0, 0, 1, 1], [], []>} : vector<16x32xbf16>, vector<32x8xbf16>, vector<16x8xf32> -> vector<16x8xf32>
    %383 = arith.addf %376, %382 : vector<16x8xf32>
    %c1_250 = arith.constant 1 : index
    %c2_251 = arith.constant 2 : index
    %c0_252 = arith.constant 0 : index
    %384 = vector.load %arg16[%c1_250, %c2_251, %c0_252] : memref<6x6x32xf32, #tpu.memory_space<vmem>>, vector<4x4x32xf32>
    %385 = vector.shape_cast %384 : vector<4x4x32xf32> to vector<16x32xf32>
    %386 = arith.truncf %385 : vector<16x32xf32> to vector<16x32xbf16>
    %387 = vector.extract_strided_slice %343 {offsets = [5, 0, 0], sizes = [1, 32, 8], strides = [1, 1, 1]} : vector<9x32x8xbf16> to vector<1x32x8xbf16>
    %388 = vector.shape_cast %387 : vector<1x32x8xbf16> to vector<32x8xbf16>
    %cst_253 = arith.constant dense<0.000000e+00> : vector<16x8xf32>
    %389 = tpu.matmul %386, %388, %cst_253 {dimension_numbers = #tpu.dot_dimension_numbers<[1], [0], [0], [1], [0, 0, 1, 1], [], []>} : vector<16x32xbf16>, vector<32x8xbf16>, vector<16x8xf32> -> vector<16x8xf32>
    %390 = arith.addf %383, %389 : vector<16x8xf32>
    %c2_254 = arith.constant 2 : index
    %c0_255 = arith.constant 0 : index
    %c0_256 = arith.constant 0 : index
    %391 = vector.load %arg16[%c2_254, %c0_255, %c0_256] : memref<6x6x32xf32, #tpu.memory_space<vmem>>, vector<4x4x32xf32>
    %392 = vector.shape_cast %391 : vector<4x4x32xf32> to vector<16x32xf32>
    %393 = arith.truncf %392 : vector<16x32xf32> to vector<16x32xbf16>
    %394 = vector.extract_strided_slice %343 {offsets = [6, 0, 0], sizes = [1, 32, 8], strides = [1, 1, 1]} : vector<9x32x8xbf16> to vector<1x32x8xbf16>
    %395 = vector.shape_cast %394 : vector<1x32x8xbf16> to vector<32x8xbf16>
    %cst_257 = arith.constant dense<0.000000e+00> : vector<16x8xf32>
    %396 = tpu.matmul %393, %395, %cst_257 {dimension_numbers = #tpu.dot_dimension_numbers<[1], [0], [0], [1], [0, 0, 1, 1], [], []>} : vector<16x32xbf16>, vector<32x8xbf16>, vector<16x8xf32> -> vector<16x8xf32>
    %397 = arith.addf %390, %396 : vector<16x8xf32>
    %c2_258 = arith.constant 2 : index
    %c1_259 = arith.constant 1 : index
    %c0_260 = arith.constant 0 : index
    %398 = vector.load %arg16[%c2_258, %c1_259, %c0_260] : memref<6x6x32xf32, #tpu.memory_space<vmem>>, vector<4x4x32xf32>
    %399 = vector.shape_cast %398 : vector<4x4x32xf32> to vector<16x32xf32>
    %400 = arith.truncf %399 : vector<16x32xf32> to vector<16x32xbf16>
    %401 = vector.extract_strided_slice %343 {offsets = [7, 0, 0], sizes = [1, 32, 8], strides = [1, 1, 1]} : vector<9x32x8xbf16> to vector<1x32x8xbf16>
    %402 = vector.shape_cast %401 : vector<1x32x8xbf16> to vector<32x8xbf16>
    %cst_261 = arith.constant dense<0.000000e+00> : vector<16x8xf32>
    %403 = tpu.matmul %400, %402, %cst_261 {dimension_numbers = #tpu.dot_dimension_numbers<[1], [0], [0], [1], [0, 0, 1, 1], [], []>} : vector<16x32xbf16>, vector<32x8xbf16>, vector<16x8xf32> -> vector<16x8xf32>
    %404 = arith.addf %397, %403 : vector<16x8xf32>
    %c2_262 = arith.constant 2 : index
    %c2_263 = arith.constant 2 : index
    %c0_264 = arith.constant 0 : index
    %405 = vector.load %arg16[%c2_262, %c2_263, %c0_264] : memref<6x6x32xf32, #tpu.memory_space<vmem>>, vector<4x4x32xf32>
    %406 = vector.shape_cast %405 : vector<4x4x32xf32> to vector<16x32xf32>
    %407 = arith.truncf %406 : vector<16x32xf32> to vector<16x32xbf16>
    %408 = vector.extract_strided_slice %343 {offsets = [8, 0, 0], sizes = [1, 32, 8], strides = [1, 1, 1]} : vector<9x32x8xbf16> to vector<1x32x8xbf16>
    %409 = vector.shape_cast %408 : vector<1x32x8xbf16> to vector<32x8xbf16>
    %cst_265 = arith.constant dense<0.000000e+00> : vector<16x8xf32>
    %410 = tpu.matmul %407, %409, %cst_265 {dimension_numbers = #tpu.dot_dimension_numbers<[1], [0], [0], [1], [0, 0, 1, 1], [], []>} : vector<16x32xbf16>, vector<32x8xbf16>, vector<16x8xf32> -> vector<16x8xf32>
    %411 = arith.addf %404, %410 : vector<16x8xf32>
    %cst_266 = arith.constant 0.000000e+00 : f32
    %412 = vector.broadcast %cst_266 : f32 to vector<16x8xf32>
    %413 = arith.maximumf %411, %412 : vector<16x8xf32>
    %c0_267 = arith.constant 0 : index
    %c0_268 = arith.constant 0 : index
    %c0_269 = arith.constant 0 : index
    %414 = vector.load %arg13[%c0_267, %c0_268, %c0_269] : memref<2x8x32xf32, #tpu.memory_space<vmem>>, vector<1x8x32xf32>
    %415 = vector.shape_cast %414 : vector<1x8x32xf32> to vector<8x32xf32>
    %cst_270 = arith.constant dense<0.000000e+00> : vector<16x32xf32>
    %416 = tpu.matmul %413, %415, %cst_270 {dimension_numbers = #tpu.dot_dimension_numbers<[1], [0], [0], [1], [0, 0, 1, 1], [], []>} : vector<16x8xf32>, vector<8x32xf32>, vector<16x32xf32> -> vector<16x32xf32>
    %417 = arith.addf %341, %416 : vector<16x32xf32>
    %c1_271 = arith.constant 1 : index
    %c0_272 = arith.constant 0 : index
    %c0_273 = arith.constant 0 : index
    %c0_274 = arith.constant 0 : index
    %418 = vector.load %arg12[%c1_271, %c0_272, %c0_273, %c0_274] : memref<2x9x32x8xbf16, #tpu.memory_space<vmem>>, vector<1x9x32x8xbf16>
    %419 = vector.shape_cast %418 : vector<1x9x32x8xbf16> to vector<9x32x8xbf16>
    %cst_275 = arith.constant 0.000000e+00 : f32
    %420 = vector.broadcast %cst_275 : f32 to vector<16x32xf32>
    %421 = arith.maximumf %417, %420 : vector<16x32xf32>
    %422 = vector.shape_cast %421 : vector<16x32xf32> to vector<4x4x32xf32>
    %c1_276 = arith.constant 1 : index
    %c1_277 = arith.constant 1 : index
    %c0_278 = arith.constant 0 : index
    %423 = vector.load %arg16[%c1_276, %c1_277, %c0_278] : memref<6x6x32xf32, #tpu.memory_space<vmem>>, vector<4x4x32xf32>
    tpu.vector_store %arg16[%c1_276, %c1_277, %c0_278], %422 {strides = array<i32>} : memref<6x6x32xf32, #tpu.memory_space<vmem>>, vector<4x4x32xf32>,
    %cst_279 = arith.constant 0.000000e+00 : f32
    %424 = vector.broadcast %cst_279 : f32 to vector<16x8xf32>
    %c0_280 = arith.constant 0 : index
    %c0_281 = arith.constant 0 : index
    %c0_282 = arith.constant 0 : index
    %425 = vector.load %arg16[%c0_280, %c0_281, %c0_282] : memref<6x6x32xf32, #tpu.memory_space<vmem>>, vector<4x4x32xf32>
    %426 = vector.shape_cast %425 : vector<4x4x32xf32> to vector<16x32xf32>
    %427 = arith.truncf %426 : vector<16x32xf32> to vector<16x32xbf16>
    %428 = vector.extract_strided_slice %419 {offsets = [0, 0, 0], sizes = [1, 32, 8], strides = [1, 1, 1]} : vector<9x32x8xbf16> to vector<1x32x8xbf16>
    %429 = vector.shape_cast %428 : vector<1x32x8xbf16> to vector<32x8xbf16>
    %cst_283 = arith.constant dense<0.000000e+00> : vector<16x8xf32>
    %430 = tpu.matmul %427, %429, %cst_283 {dimension_numbers = #tpu.dot_dimension_numbers<[1], [0], [0], [1], [0, 0, 1, 1], [], []>} : vector<16x32xbf16>, vector<32x8xbf16>, vector<16x8xf32> -> vector<16x8xf32>
    %431 = arith.addf %424, %430 : vector<16x8xf32>
    %c0_284 = arith.constant 0 : index
    %c1_285 = arith.constant 1 : index
    %c0_286 = arith.constant 0 : index
    %432 = vector.load %arg16[%c0_284, %c1_285, %c0_286] : memref<6x6x32xf32, #tpu.memory_space<vmem>>, vector<4x4x32xf32>
    %433 = vector.shape_cast %432 : vector<4x4x32xf32> to vector<16x32xf32>
    %434 = arith.truncf %433 : vector<16x32xf32> to vector<16x32xbf16>
    %435 = vector.extract_strided_slice %419 {offsets = [1, 0, 0], sizes = [1, 32, 8], strides = [1, 1, 1]} : vector<9x32x8xbf16> to vector<1x32x8xbf16>
    %436 = vector.shape_cast %435 : vector<1x32x8xbf16> to vector<32x8xbf16>
    %cst_287 = arith.constant dense<0.000000e+00> : vector<16x8xf32>
    %437 = tpu.matmul %434, %436, %cst_287 {dimension_numbers = #tpu.dot_dimension_numbers<[1], [0], [0], [1], [0, 0, 1, 1], [], []>} : vector<16x32xbf16>, vector<32x8xbf16>, vector<16x8xf32> -> vector<16x8xf32>
    %438 = arith.addf %431, %437 : vector<16x8xf32>
    %c0_288 = arith.constant 0 : index
    %c2_289 = arith.constant 2 : index
    %c0_290 = arith.constant 0 : index
    %439 = vector.load %arg16[%c0_288, %c2_289, %c0_290] : memref<6x6x32xf32, #tpu.memory_space<vmem>>, vector<4x4x32xf32>
    %440 = vector.shape_cast %439 : vector<4x4x32xf32> to vector<16x32xf32>
    %441 = arith.truncf %440 : vector<16x32xf32> to vector<16x32xbf16>
    %442 = vector.extract_strided_slice %419 {offsets = [2, 0, 0], sizes = [1, 32, 8], strides = [1, 1, 1]} : vector<9x32x8xbf16> to vector<1x32x8xbf16>
    %443 = vector.shape_cast %442 : vector<1x32x8xbf16> to vector<32x8xbf16>
    %cst_291 = arith.constant dense<0.000000e+00> : vector<16x8xf32>
    %444 = tpu.matmul %441, %443, %cst_291 {dimension_numbers = #tpu.dot_dimension_numbers<[1], [0], [0], [1], [0, 0, 1, 1], [], []>} : vector<16x32xbf16>, vector<32x8xbf16>, vector<16x8xf32> -> vector<16x8xf32>
    %445 = arith.addf %438, %444 : vector<16x8xf32>
    %c1_292 = arith.constant 1 : index
    %c0_293 = arith.constant 0 : index
    %c0_294 = arith.constant 0 : index
    %446 = vector.load %arg16[%c1_292, %c0_293, %c0_294] : memref<6x6x32xf32, #tpu.memory_space<vmem>>, vector<4x4x32xf32>
    %447 = vector.shape_cast %446 : vector<4x4x32xf32> to vector<16x32xf32>
    %448 = arith.truncf %447 : vector<16x32xf32> to vector<16x32xbf16>
    %449 = vector.extract_strided_slice %419 {offsets = [3, 0, 0], sizes = [1, 32, 8], strides = [1, 1, 1]} : vector<9x32x8xbf16> to vector<1x32x8xbf16>
    %450 = vector.shape_cast %449 : vector<1x32x8xbf16> to vector<32x8xbf16>
    %cst_295 = arith.constant dense<0.000000e+00> : vector<16x8xf32>
    %451 = tpu.matmul %448, %450, %cst_295 {dimension_numbers = #tpu.dot_dimension_numbers<[1], [0], [0], [1], [0, 0, 1, 1], [], []>} : vector<16x32xbf16>, vector<32x8xbf16>, vector<16x8xf32> -> vector<16x8xf32>
    %452 = arith.addf %445, %451 : vector<16x8xf32>
    %c1_296 = arith.constant 1 : index
    %c1_297 = arith.constant 1 : index
    %c0_298 = arith.constant 0 : index
    %453 = vector.load %arg16[%c1_296, %c1_297, %c0_298] : memref<6x6x32xf32, #tpu.memory_space<vmem>>, vector<4x4x32xf32>
    %454 = vector.shape_cast %453 : vector<4x4x32xf32> to vector<16x32xf32>
    %455 = arith.truncf %454 : vector<16x32xf32> to vector<16x32xbf16>
    %456 = vector.extract_strided_slice %419 {offsets = [4, 0, 0], sizes = [1, 32, 8], strides = [1, 1, 1]} : vector<9x32x8xbf16> to vector<1x32x8xbf16>
    %457 = vector.shape_cast %456 : vector<1x32x8xbf16> to vector<32x8xbf16>
    %cst_299 = arith.constant dense<0.000000e+00> : vector<16x8xf32>
    %458 = tpu.matmul %455, %457, %cst_299 {dimension_numbers = #tpu.dot_dimension_numbers<[1], [0], [0], [1], [0, 0, 1, 1], [], []>} : vector<16x32xbf16>, vector<32x8xbf16>, vector<16x8xf32> -> vector<16x8xf32>
    %459 = arith.addf %452, %458 : vector<16x8xf32>
    %c1_300 = arith.constant 1 : index
    %c2_301 = arith.constant 2 : index
    %c0_302 = arith.constant 0 : index
    %460 = vector.load %arg16[%c1_300, %c2_301, %c0_302] : memref<6x6x32xf32, #tpu.memory_space<vmem>>, vector<4x4x32xf32>
    %461 = vector.shape_cast %460 : vector<4x4x32xf32> to vector<16x32xf32>
    %462 = arith.truncf %461 : vector<16x32xf32> to vector<16x32xbf16>
    %463 = vector.extract_strided_slice %419 {offsets = [5, 0, 0], sizes = [1, 32, 8], strides = [1, 1, 1]} : vector<9x32x8xbf16> to vector<1x32x8xbf16>
    %464 = vector.shape_cast %463 : vector<1x32x8xbf16> to vector<32x8xbf16>
    %cst_303 = arith.constant dense<0.000000e+00> : vector<16x8xf32>
    %465 = tpu.matmul %462, %464, %cst_303 {dimension_numbers = #tpu.dot_dimension_numbers<[1], [0], [0], [1], [0, 0, 1, 1], [], []>} : vector<16x32xbf16>, vector<32x8xbf16>, vector<16x8xf32> -> vector<16x8xf32>
    %466 = arith.addf %459, %465 : vector<16x8xf32>
    %c2_304 = arith.constant 2 : index
    %c0_305 = arith.constant 0 : index
    %c0_306 = arith.constant 0 : index
    %467 = vector.load %arg16[%c2_304, %c0_305, %c0_306] : memref<6x6x32xf32, #tpu.memory_space<vmem>>, vector<4x4x32xf32>
    %468 = vector.shape_cast %467 : vector<4x4x32xf32> to vector<16x32xf32>
    %469 = arith.truncf %468 : vector<16x32xf32> to vector<16x32xbf16>
    %470 = vector.extract_strided_slice %419 {offsets = [6, 0, 0], sizes = [1, 32, 8], strides = [1, 1, 1]} : vector<9x32x8xbf16> to vector<1x32x8xbf16>
    %471 = vector.shape_cast %470 : vector<1x32x8xbf16> to vector<32x8xbf16>
    %cst_307 = arith.constant dense<0.000000e+00> : vector<16x8xf32>
    %472 = tpu.matmul %469, %471, %cst_307 {dimension_numbers = #tpu.dot_dimension_numbers<[1], [0], [0], [1], [0, 0, 1, 1], [], []>} : vector<16x32xbf16>, vector<32x8xbf16>, vector<16x8xf32> -> vector<16x8xf32>
    %473 = arith.addf %466, %472 : vector<16x8xf32>
    %c2_308 = arith.constant 2 : index
    %c1_309 = arith.constant 1 : index
    %c0_310 = arith.constant 0 : index
    %474 = vector.load %arg16[%c2_308, %c1_309, %c0_310] : memref<6x6x32xf32, #tpu.memory_space<vmem>>, vector<4x4x32xf32>
    %475 = vector.shape_cast %474 : vector<4x4x32xf32> to vector<16x32xf32>
    %476 = arith.truncf %475 : vector<16x32xf32> to vector<16x32xbf16>
    %477 = vector.extract_strided_slice %419 {offsets = [7, 0, 0], sizes = [1, 32, 8], strides = [1, 1, 1]} : vector<9x32x8xbf16> to vector<1x32x8xbf16>
    %478 = vector.shape_cast %477 : vector<1x32x8xbf16> to vector<32x8xbf16>
    %cst_311 = arith.constant dense<0.000000e+00> : vector<16x8xf32>
    %479 = tpu.matmul %476, %478, %cst_311 {dimension_numbers = #tpu.dot_dimension_numbers<[1], [0], [0], [1], [0, 0, 1, 1], [], []>} : vector<16x32xbf16>, vector<32x8xbf16>, vector<16x8xf32> -> vector<16x8xf32>
    %480 = arith.addf %473, %479 : vector<16x8xf32>
    %c2_312 = arith.constant 2 : index
    %c2_313 = arith.constant 2 : index
    %c0_314 = arith.constant 0 : index
    %481 = vector.load %arg16[%c2_312, %c2_313, %c0_314] : memref<6x6x32xf32, #tpu.memory_space<vmem>>, vector<4x4x32xf32>
    %482 = vector.shape_cast %481 : vector<4x4x32xf32> to vector<16x32xf32>
    %483 = arith.truncf %482 : vector<16x32xf32> to vector<16x32xbf16>
    %484 = vector.extract_strided_slice %419 {offsets = [8, 0, 0], sizes = [1, 32, 8], strides = [1, 1, 1]} : vector<9x32x8xbf16> to vector<1x32x8xbf16>
    %485 = vector.shape_cast %484 : vector<1x32x8xbf16> to vector<32x8xbf16>
    %cst_315 = arith.constant dense<0.000000e+00> : vector<16x8xf32>
    %486 = tpu.matmul %483, %485, %cst_315 {dimension_numbers = #tpu.dot_dimension_numbers<[1], [0], [0], [1], [0, 0, 1, 1], [], []>} : vector<16x32xbf16>, vector<32x8xbf16>, vector<16x8xf32> -> vector<16x8xf32>
    %487 = arith.addf %480, %486 : vector<16x8xf32>
    %cst_316 = arith.constant 0.000000e+00 : f32
    %488 = vector.broadcast %cst_316 : f32 to vector<16x8xf32>
    %489 = arith.maximumf %487, %488 : vector<16x8xf32>
    %c1_317 = arith.constant 1 : index
    %c0_318 = arith.constant 0 : index
    %c0_319 = arith.constant 0 : index
    %490 = vector.load %arg13[%c1_317, %c0_318, %c0_319] : memref<2x8x32xf32, #tpu.memory_space<vmem>>, vector<1x8x32xf32>
    %491 = vector.shape_cast %490 : vector<1x8x32xf32> to vector<8x32xf32>
    %cst_320 = arith.constant dense<0.000000e+00> : vector<16x32xf32>
    %492 = tpu.matmul %489, %491, %cst_320 {dimension_numbers = #tpu.dot_dimension_numbers<[1], [0], [0], [1], [0, 0, 1, 1], [], []>} : vector<16x8xf32>, vector<8x32xf32>, vector<16x32xf32> -> vector<16x32xf32>
    %493 = arith.addf %417, %492 : vector<16x32xf32>
    %494 = vector.shape_cast %493 : vector<16x32xf32> to vector<4x4x32xf32>
    %c0_321 = arith.constant 0 : index
    %c0_322 = arith.constant 0 : index
    %c0_323 = arith.constant 0 : index
    %c0_324 = arith.constant 0 : index
    %495 = vector.load %arg14[%c0_321, %c0_322, %c0_323, %c0_324] : memref<1x4x4x32xf32, #tpu.memory_space<vmem>>, vector<1x4x4x32xf32>
    %496 = vector.shape_cast %495 : vector<1x4x4x32xf32> to vector<4x4x32xf32>
    %497 = vector.shape_cast %494 : vector<4x4x32xf32> to vector<1x4x4x32xf32>
    tpu.vector_store %arg14[%c0_321, %c0_322, %c0_323, %c0_324], %497 {strides = array<i32>} : memref<1x4x4x32xf32, #tpu.memory_space<vmem>>, vector<1x4x4x32xf32>,
    return
  }
  func.func @transform_0(%arg0: i32) -> (i32, i32, i32, i32) {
    %c0_i32 = arith.constant 0 : i32
    %c0_i32_0 = arith.constant 0 : i32
    %c0_i32_1 = arith.constant 0 : i32
    %c0_i32_2 = arith.constant 0 : i32
    return %arg0, %c0_i32, %c0_i32_0, %c0_i32_1 : i32, i32, i32, i32
  }
  func.func @transform_1(%arg0: i32) -> (i32, i32, i32) {
    %c0_i32 = arith.constant 0 : i32
    %c0_i32_0 = arith.constant 0 : i32
    %c0_i32_1 = arith.constant 0 : i32
    %c0_i32_2 = arith.constant 0 : i32
    return %c0_i32, %c0_i32_0, %c0_i32_1 : i32, i32, i32
  }
  func.func @transform_2(%arg0: i32) -> (i32, i32) {
    %c0_i32 = arith.constant 0 : i32
    %c0_i32_0 = arith.constant 0 : i32
    %c0_i32_1 = arith.constant 0 : i32
    return %c0_i32, %c0_i32_0 : i32, i32
  }
  func.func @transform_3(%arg0: i32) -> (i32, i32, i32, i32) {
    %c0_i32 = arith.constant 0 : i32
    %c0_i32_0 = arith.constant 0 : i32
    %c0_i32_1 = arith.constant 0 : i32
    %c0_i32_2 = arith.constant 0 : i32
    %c0_i32_3 = arith.constant 0 : i32
    return %c0_i32, %c0_i32_0, %c0_i32_1, %c0_i32_2 : i32, i32, i32, i32
  }
  func.func @transform_4(%arg0: i32) -> (i32, i32, i32) {
    %c0_i32 = arith.constant 0 : i32
    %c0_i32_0 = arith.constant 0 : i32
    %c0_i32_1 = arith.constant 0 : i32
    %c0_i32_2 = arith.constant 0 : i32
    return %c0_i32, %c0_i32_0, %c0_i32_1 : i32, i32, i32
  }
  func.func @transform_5(%arg0: i32) -> (i32, i32) {
    %c0_i32 = arith.constant 0 : i32
    %c0_i32_0 = arith.constant 0 : i32
    %c0_i32_1 = arith.constant 0 : i32
    return %c0_i32, %c0_i32_0 : i32, i32
  }
  func.func @transform_6(%arg0: i32) -> (i32, i32) {
    %c0_i32 = arith.constant 0 : i32
    %c0_i32_0 = arith.constant 0 : i32
    %c0_i32_1 = arith.constant 0 : i32
    return %c0_i32, %c0_i32_0 : i32, i32
  }
  func.func @transform_7(%arg0: i32) -> (i32, i32) {
    %c0_i32 = arith.constant 0 : i32
    %c0_i32_0 = arith.constant 0 : i32
    %c0_i32_1 = arith.constant 0 : i32
    return %c0_i32, %c0_i32_0 : i32, i32
  }
  func.func @transform_8(%arg0: i32) -> (i32, i32) {
    %c0_i32 = arith.constant 0 : i32
    %c0_i32_0 = arith.constant 0 : i32
    %c0_i32_1 = arith.constant 0 : i32
    return %c0_i32, %c0_i32_0 : i32, i32
  }
  func.func @transform_9(%arg0: i32) -> (i32, i32, i32) {
    %c0_i32 = arith.constant 0 : i32
    %c0_i32_0 = arith.constant 0 : i32
    %c0_i32_1 = arith.constant 0 : i32
    %c0_i32_2 = arith.constant 0 : i32
    return %c0_i32, %c0_i32_0, %c0_i32_1 : i32, i32, i32
  }
  func.func @transform_10(%arg0: i32) -> (i32, i32) {
    %c0_i32 = arith.constant 0 : i32
    %c0_i32_0 = arith.constant 0 : i32
    %c0_i32_1 = arith.constant 0 : i32
    return %c0_i32, %c0_i32_0 : i32, i32
  }
  func.func @transform_11(%arg0: i32) -> (i32, i32, i32, i32) {
    %c0_i32 = arith.constant 0 : i32
    %c0_i32_0 = arith.constant 0 : i32
    %c0_i32_1 = arith.constant 0 : i32
    %c0_i32_2 = arith.constant 0 : i32
    %c0_i32_3 = arith.constant 0 : i32
    return %c0_i32, %c0_i32_0, %c0_i32_1, %c0_i32_2 : i32, i32, i32, i32
  }
  func.func @transform_12(%arg0: i32) -> (i32, i32, i32) {
    %c0_i32 = arith.constant 0 : i32
    %c0_i32_0 = arith.constant 0 : i32
    %c0_i32_1 = arith.constant 0 : i32
    %c0_i32_2 = arith.constant 0 : i32
    return %c0_i32, %c0_i32_0, %c0_i32_1 : i32, i32, i32
  }
  func.func @transform_13(%arg0: i32) -> (i32, i32, i32, i32) {
    %c0_i32 = arith.constant 0 : i32
    %c0_i32_0 = arith.constant 0 : i32
    %c0_i32_1 = arith.constant 0 : i32
    %c0_i32_2 = arith.constant 0 : i32
    return %arg0, %c0_i32, %c0_i32_0, %c0_i32_1 : i32, i32, i32, i32
  }
  func.func @transform_14(%arg0: i32) -> (i32, i32) {
    %c0_i32 = arith.constant 0 : i32
    %c0_i32_0 = arith.constant 0 : i32
    %c0_i32_1 = arith.constant 0 : i32
    return %c0_i32, %c0_i32_0 : i32, i32
  }
}

module attributes {stable_mosaic.version = 11 : i64} {
  func.func @_gemm_bias_act_kernel(%arg0: i32, %arg1: i32, %arg2: memref<1x32x128xf32, #tpu.memory_space<vmem>>, %arg3: memref<1x128x16xbf16, #tpu.memory_space<vmem>>, %arg4: memref<1x16xf32, #tpu.memory_space<vmem>>, %arg5: memref<1x32x16xf32, #tpu.memory_space<vmem>>) attributes {dimension_semantics = [#tpu.dimension_semantics<parallel>, #tpu.dimension_semantics<parallel>], iteration_bounds = array<i64: 4, 1>, scalar_prefetch = 0 : i64, scratch_operands = 0 : i64, tpu.core_type = #tpu.core_type<tc>, window_params = [{transform_indices = @transform_0, window_bounds = array<i64: 1, 32, 128>}, {transform_indices = @transform_1, window_bounds = array<i64: 1, 128, 16>}, {pipeline_mode = #tpu.pipeline_mode<synchronous>, transform_indices = @transform_2, window_bounds = array<i64: 1, 16>}, {transform_indices = @transform_3, window_bounds = array<i64: 1, 32, 16>}]} {
    %c0 = arith.constant 0 : index
    %c0_0 = arith.constant 0 : index
    %c0_1 = arith.constant 0 : index
    %0 = vector.load %arg2[%c0, %c0_0, %c0_1] : memref<1x32x128xf32, #tpu.memory_space<vmem>>, vector<1x32x128xf32>
    %1 = vector.shape_cast %0 : vector<1x32x128xf32> to vector<32x128xf32>
    %cst = arith.constant 0.000000e+00 : f32
    %2 = vector.broadcast %cst : f32 to vector<32x128xf32>
    %3 = arith.maximumf %1, %2 : vector<32x128xf32>
    %4 = arith.truncf %3 : vector<32x128xf32> to vector<32x128xbf16>
    %c0_2 = arith.constant 0 : index
    %c0_3 = arith.constant 0 : index
    %c0_4 = arith.constant 0 : index
    %5 = vector.load %arg3[%c0_2, %c0_3, %c0_4] : memref<1x128x16xbf16, #tpu.memory_space<vmem>>, vector<1x128x16xbf16>
    %6 = vector.shape_cast %5 : vector<1x128x16xbf16> to vector<128x16xbf16>
    %cst_5 = arith.constant dense<0.000000e+00> : vector<32x16xf32>
    %7 = tpu.matmul %4, %6, %cst_5 {dimension_numbers = #tpu.dot_dimension_numbers<[1], [0], [0], [1], [0, 0, 1, 1], [], []>} : vector<32x128xbf16>, vector<128x16xbf16>, vector<32x16xf32> -> vector<32x16xf32>
    %c0_6 = arith.constant 0 : index
    %c0_7 = arith.constant 0 : index
    %8 = vector.load %arg4[%c0_6, %c0_7] : memref<1x16xf32, #tpu.memory_space<vmem>>, vector<1x16xf32>
    %9 = vector.broadcast %8 : vector<1x16xf32> to vector<32x16xf32>
    %10 = arith.addf %7, %9 : vector<32x16xf32>
    %cst_8 = arith.constant 0.000000e+00 : f32
    %11 = vector.broadcast %cst_8 : f32 to vector<32x16xf32>
    %12 = arith.maximumf %10, %11 : vector<32x16xf32>
    %c0_9 = arith.constant 0 : index
    %c0_10 = arith.constant 0 : index
    %c0_11 = arith.constant 0 : index
    %13 = vector.load %arg5[%c0_9, %c0_10, %c0_11] : memref<1x32x16xf32, #tpu.memory_space<vmem>>, vector<1x32x16xf32>
    %14 = vector.shape_cast %13 : vector<1x32x16xf32> to vector<32x16xf32>
    %15 = vector.shape_cast %12 : vector<32x16xf32> to vector<1x32x16xf32>
    tpu.vector_store %arg5[%c0_9, %c0_10, %c0_11], %15 {strides = array<i32>} : memref<1x32x16xf32, #tpu.memory_space<vmem>>, vector<1x32x16xf32>,
    return
  }
  func.func @transform_0(%arg0: i32, %arg1: i32) -> (i32, i32, i32) {
    %c0_i32 = arith.constant 0 : i32
    %c0_i32_0 = arith.constant 0 : i32
    return %arg0, %arg1, %c0_i32 : i32, i32, i32
  }
  func.func @transform_1(%arg0: i32, %arg1: i32) -> (i32, i32, i32) {
    %c0_i32 = arith.constant 0 : i32
    %c0_i32_0 = arith.constant 0 : i32
    %c0_i32_1 = arith.constant 0 : i32
    return %arg0, %c0_i32, %c0_i32_0 : i32, i32, i32
  }
  func.func @transform_2(%arg0: i32, %arg1: i32) -> (i32, i32) {
    %c0_i32 = arith.constant 0 : i32
    %c0_i32_0 = arith.constant 0 : i32
    %c0_i32_1 = arith.constant 0 : i32
    return %c0_i32, %c0_i32_0 : i32, i32
  }
  func.func @transform_3(%arg0: i32, %arg1: i32) -> (i32, i32, i32) {
    %c0_i32 = arith.constant 0 : i32
    %c0_i32_0 = arith.constant 0 : i32
    return %arg0, %arg1, %c0_i32 : i32, i32, i32
  }
}

module attributes {stable_mosaic.version = 11 : i64} {
  func.func @_gemm_bias_act_kernel(%arg0: i32, %arg1: i32, %arg2: memref<1x128x64xf32, #tpu.memory_space<vmem>>, %arg3: memref<1x64x3xbf16, #tpu.memory_space<vmem>>, %arg4: memref<1x3xf32, #tpu.memory_space<vmem>>, %arg5: memref<1x128x3xf32, #tpu.memory_space<vmem>>) attributes {dimension_semantics = [#tpu.dimension_semantics<parallel>, #tpu.dimension_semantics<parallel>], iteration_bounds = array<i64: 4, 1>, scalar_prefetch = 0 : i64, scratch_operands = 0 : i64, tpu.core_type = #tpu.core_type<tc>, window_params = [{transform_indices = @transform_0, window_bounds = array<i64: 1, 128, 64>}, {transform_indices = @transform_1, window_bounds = array<i64: 1, 64, 3>}, {pipeline_mode = #tpu.pipeline_mode<synchronous>, transform_indices = @transform_2, window_bounds = array<i64: 1, 3>}, {transform_indices = @transform_3, window_bounds = array<i64: 1, 128, 3>}]} {
    %c0 = arith.constant 0 : index
    %c0_0 = arith.constant 0 : index
    %c0_1 = arith.constant 0 : index
    %0 = vector.load %arg2[%c0, %c0_0, %c0_1] : memref<1x128x64xf32, #tpu.memory_space<vmem>>, vector<1x128x64xf32>
    %1 = vector.shape_cast %0 : vector<1x128x64xf32> to vector<128x64xf32>
    %2 = arith.truncf %1 : vector<128x64xf32> to vector<128x64xbf16>
    %c0_2 = arith.constant 0 : index
    %c0_3 = arith.constant 0 : index
    %c0_4 = arith.constant 0 : index
    %3 = vector.load %arg3[%c0_2, %c0_3, %c0_4] : memref<1x64x3xbf16, #tpu.memory_space<vmem>>, vector<1x64x3xbf16>
    %4 = vector.shape_cast %3 : vector<1x64x3xbf16> to vector<64x3xbf16>
    %cst = arith.constant dense<0.000000e+00> : vector<128x3xf32>
    %5 = tpu.matmul %2, %4, %cst {dimension_numbers = #tpu.dot_dimension_numbers<[1], [0], [0], [1], [0, 0, 1, 1], [], []>} : vector<128x64xbf16>, vector<64x3xbf16>, vector<128x3xf32> -> vector<128x3xf32>
    %c0_5 = arith.constant 0 : index
    %c0_6 = arith.constant 0 : index
    %6 = vector.load %arg4[%c0_5, %c0_6] : memref<1x3xf32, #tpu.memory_space<vmem>>, vector<1x3xf32>
    %7 = vector.broadcast %6 : vector<1x3xf32> to vector<128x3xf32>
    %8 = arith.addf %5, %7 : vector<128x3xf32>
    %c0_7 = arith.constant 0 : index
    %c0_8 = arith.constant 0 : index
    %c0_9 = arith.constant 0 : index
    %9 = vector.load %arg5[%c0_7, %c0_8, %c0_9] : memref<1x128x3xf32, #tpu.memory_space<vmem>>, vector<1x128x3xf32>
    %10 = vector.shape_cast %9 : vector<1x128x3xf32> to vector<128x3xf32>
    %11 = vector.shape_cast %8 : vector<128x3xf32> to vector<1x128x3xf32>
    tpu.vector_store %arg5[%c0_7, %c0_8, %c0_9], %11 {strides = array<i32>} : memref<1x128x3xf32, #tpu.memory_space<vmem>>, vector<1x128x3xf32>,
    return
  }
  func.func @transform_0(%arg0: i32, %arg1: i32) -> (i32, i32, i32) {
    %c0_i32 = arith.constant 0 : i32
    %c0_i32_0 = arith.constant 0 : i32
    return %arg0, %arg1, %c0_i32 : i32, i32, i32
  }
  func.func @transform_1(%arg0: i32, %arg1: i32) -> (i32, i32, i32) {
    %c0_i32 = arith.constant 0 : i32
    %c0_i32_0 = arith.constant 0 : i32
    %c0_i32_1 = arith.constant 0 : i32
    return %arg0, %c0_i32, %c0_i32_0 : i32, i32, i32
  }
  func.func @transform_2(%arg0: i32, %arg1: i32) -> (i32, i32) {
    %c0_i32 = arith.constant 0 : i32
    %c0_i32_0 = arith.constant 0 : i32
    %c0_i32_1 = arith.constant 0 : i32
    return %c0_i32, %c0_i32_0 : i32, i32
  }
  func.func @transform_3(%arg0: i32, %arg1: i32) -> (i32, i32, i32) {
    %c0_i32 = arith.constant 0 : i32
    %c0_i32_0 = arith.constant 0 : i32
    return %arg0, %arg1, %c0_i32 : i32, i32, i32
  }
}

</mosaic_0001>

<bundles_post_ra>
// kernel: vqvae_forward.5
= control target key start
LH: loop header
LB: loop body
LE: loop exit
PB: predicated region body
PF: predicated region fallthrough
CT: control target
= control target key end

     0   :  { %vm70_vm0 = vcmask 392192   ;;  %vm208_vm1 = vcmask 130048   ;;  %s435_s1 = inlined_call_operand.vmem [shape: bf16[1,48,16], index: 1, kind: input, shape index: {}]   ;;  %s436_s0 = inlined_call_operand.vmem [shape: f32[1,128,48], index: 0, kind: input, shape index: {}]   ;;  %s437_s2 = inlined_call_operand.vmem [shape: f32[1,16], index: 2, kind: input, shape index: {}]   ;;  %s438_s3 = inlined_call_operand.vmem [shape: f32[1,128,16], index: 3, kind: output, shape index: {}]  }
   0x1   :  { %v280_v0 = vld [vmem:[%s435_s1] sm:$0xff]   ;;  %v281_v1 = vld [vmem:[%s435_s1 + $0x8] sm:$0xff]   ;;  %v282_v5 = vld [vmem:[%s435_s1 + $0x10] sm:$0xff]  }
   0x2   :  { %252 = vmatprep.subr.bf16.mxu0 %v280_v0  ;;  %274 = vmatprep.subr.bf16.mxu1 %v280_v0  ;;  %v15_v2 = vld [vmem:[%s436_s0] sm:$0xff]  ;;  %v16_v3 = vld [vmem:[%s436_s0 + $0x8] sm:$0xff]  ;;  %v17_v9 = vld [vmem:[%s436_s0 + $0x10] sm:$0xff] }
   0x3   :  { %253 = vmatpush3.bf16.msra.mxu0 %v280_v0  ;;  %277 = vmatpush3.bf16.msra.mxu1 %v280_v0  ;;  %v23_v4 = vld [vmem:[%s436_s0 + $0x40] sm:$0xff]  ;;  %v31_v6 = vpack.c.bf16 %v16_v3, %v15_v2  ;;  %v24_v7 = vld [vmem:[%s436_s0 + $0x48] sm:$0xff]  ;;  %v18_v10 = vld [vmem:[%s436_s0 + $0x18] sm:$0xff] }
   0x4   :  { %254 = vmatprep.subr.bf16.mxu0 %v281_v1  ;;  %275 = vmatprep.subr.bf16.mxu1 %v281_v1  ;;  %v35_v8 = vpack.c.bf16 %v24_v7, %v23_v4  ;;  %v25_v11 = vld [vmem:[%s436_s0 + $0x50] sm:$0xff]  ;;  %v26_v12 = vld [vmem:[%s436_s0 + $0x58] sm:$0xff]  ;;  %v19_v13 = vld [vmem:[%s436_s0 + $0x20] sm:$0xff]  ;;  %v32_v17 = vpack.c.bf16 %v18_v10, %v17_v9 }
   0x5   :  { %258 = vmatprep.mubr.msk.bf16.mxu0 %vm70_vm0, %v31_v6  ;;  %v20_v14 = vld [vmem:[%s436_s0 + $0x28] sm:$0xff]  ;;  %v27_v15 = vld [vmem:[%s436_s0 + $0x60] sm:$0xff]  ;;  %v36_v18 = vpack.c.bf16 %v26_v12, %v25_v11  ;;  %v21_v21 = vld [vmem:[%s436_s0 + $0x30] sm:$0xff] }
   0x6   :  { %v28_v16 = vld [vmem:[%s436_s0 + $0x68] sm:$0xff]  ;;  %266 = vmatprep.mubr.msk.bf16.mxu1 %vm70_vm0, %v35_v8  ;;  %v33_v19 = vpack.c.bf16 %v20_v14, %v19_v13  ;;  %v22_v22 = vld [vmem:[%s436_s0 + $0x38] sm:$0xff]  ;;  %v29_v23 = vld [vmem:[%s436_s0 + $0x70] sm:$0xff] }
   0x7   :  { %255 = vmatpush3.bf16.msra.mxu0 %v281_v1  ;;  %278 = vmatpush3.bf16.msra.mxu1 %v281_v1  ;;  %v37_v20 = vpack.c.bf16 %v28_v16, %v27_v15  ;;  %v30_v24 = vld [vmem:[%s436_s0 + $0x78] sm:$0xff]  ;;  %v34_v25 = vpack.c.bf16 %v22_v22, %v21_v21  ;;  %v229_v27 = vld [vmem:[%s437_s2] ss:$0 sm:$0xff] }
   0x8   :  { %256 = vmatprep.subr.bf16.mxu0 %v282_v5  ;;  %276 = vmatprep.subr.bf16.mxu1 %v282_v5  ;;  %v38_v26 = vpack.c.bf16 %v30_v24, %v29_v23 }
   0xb   :  { %257 = vmatpush3.bf16.msra.mxu0 %v282_v5  ;;  %279 = vmatpush3.bf16.msra.mxu1 %v282_v5 }
   0xe   :  { %259 = vmatmul.mubr.msk.bf16.vlgmr.msra.gmra.mrb[0].mxu0 %vm70_vm0, %v32_v17  ;;  %267 = vmatmul.mubr.msk.bf16.vlgmr.msra.gmra.mrb[0].mxu1 %vm70_vm0, %v36_v18 }
   0xf   :  { %262 = vmatprep.mubr.msk.bf16.mxu0 %vm70_vm0, %v33_v19  ;;  %270 = vmatprep.mubr.msk.bf16.mxu1 %vm70_vm0, %v37_v20 }
  0x16   :  { %263 = vmatmul.mubr.msk.bf16.gmra.mrb[4].mxu0 %vm70_vm0, %v34_v25  ;;  %271 = vmatmul.mubr.msk.bf16.gmra.mrb[4].mxu1 %vm70_vm0, %v38_v26 }
  0xe1   :  { %v260_v28 = vpop.f32.mrb[0].mxu0  ;;  %v268_v29 = vpop.f32.mrb[0].mxu1 }
  0xe2   :  { %v138_v30 = vadd.f32 %v260_v28, %v229_v27  ;;  %v170_v31 = vadd.f32 %v268_v29, %v229_v27  ;;  %v129_v32 = vpop.f32.mrb[1].mxu0  ;;  %v161_v33 = vpop.f32.mrb[1].mxu1 }
  0xe3   :  { %v130_v34 = vadd.f32 %v229_v27, %v129_v32  ;;  %v162_v35 = vadd.f32 %v229_v27, %v161_v33  ;;  %v261_v36 = vpop.f32.mrb[2].mxu0  ;;  %v269_v37 = vpop.f32.mrb[2].mxu1 }
  0xe4   :  { %v194_v38 = vmax.f32 %v138_v30, 0.0  ;;  %v202_v39 = vmax.f32 %v170_v31, 0.0  ;;  %v141_v40 = vadd.f32 %v261_v36, %v229_v27  ;;  %v173_v41 = vadd.f32 %v269_v37, %v229_v27  ;;  %v132_v42 = vpop.f32.mrb[3].mxu0  ;;  %v164_v43 = vpop.f32.mrb[3].mxu1 }
  0xe5   :  { %v192_v44 = vmax.f32 %v130_v34, 0.0  ;;  %v200_v45 = vmax.f32 %v162_v35, 0.0  ;;  %v133_v46 = vadd.f32 %v229_v27, %v132_v42  ;;  %v165_v47 = vadd.f32 %v229_v27, %v164_v43 }
  0xe6   :  { %211 = vst.msk [vmem:[%s438_s3 + $0x10] sm:$0xff] %vm208_vm1, %v194_v38  ;;  %219 = vst.msk [vmem:[%s438_s3 + $0x50] sm:$0xff] %vm208_vm1, %v202_v39  ;;  %v195_v48 = vmax.f32 %v141_v40, 0.0  ;;  %v203_v49 = vmax.f32 %v173_v41, 0.0 }
  0xe7   :  { %209 = vst.msk [vmem:[%s438_s3] sm:$0xff] %vm208_vm1, %v192_v44  ;;  %217 = vst.msk [vmem:[%s438_s3 + $0x40] sm:$0xff] %vm208_vm1, %v200_v45  ;;  %v193_v50 = vmax.f32 %v133_v46, 0.0  ;;  %v201_v51 = vmax.f32 %v165_v47, 0.0 }
  0xe8   :  { %212 = vst.msk [vmem:[%s438_s3 + $0x18] sm:$0xff] %vm208_vm1, %v195_v48  ;;  %220 = vst.msk [vmem:[%s438_s3 + $0x58] sm:$0xff] %vm208_vm1, %v203_v49 }
  0xe9   :  { %210 = vst.msk [vmem:[%s438_s3 + $0x8] sm:$0xff] %vm208_vm1, %v193_v50  ;;  %218 = vst.msk [vmem:[%s438_s3 + $0x48] sm:$0xff] %vm208_vm1, %v201_v51  ;;  %v264_v52 = vpop.f32.mrb[4].mxu0  ;;  %v272_v53 = vpop.f32.mrb[4].mxu1 }
  0xea   :  { %v154_v54 = vadd.f32 %v264_v52, %v229_v27  ;;  %v186_v55 = vadd.f32 %v272_v53, %v229_v27  ;;  %v145_v56 = vpop.f32.mrb[5].mxu0  ;;  %v177_v57 = vpop.f32.mrb[5].mxu1 }
  0xeb   :  { %v146_v58 = vadd.f32 %v229_v27, %v145_v56  ;;  %v178_v59 = vadd.f32 %v229_v27, %v177_v57  ;;  %v265_v60 = vpop.f32.mrb[6].mxu0  ;;  %v273_v61 = vpop.f32.mrb[6].mxu1 }
  0xec   :  { %v198_v62 = vmax.f32 %v154_v54, 0.0  ;;  %v206_v63 = vmax.f32 %v186_v55, 0.0  ;;  %v157_v0 = vadd.f32 %v265_v60, %v229_v27  ;;  %v189_v1 = vadd.f32 %v273_v61, %v229_v27  ;;  %v148_v2 = vpop.f32.mrb[7].mxu0  ;;  %v180_v3 = vpop.f32.mrb[7].mxu1 }
  0xed   :  { %v196_v4 = vmax.f32 %v146_v58, 0.0  ;;  %v204_v5 = vmax.f32 %v178_v59, 0.0  ;;  %v149_v6 = vadd.f32 %v229_v27, %v148_v2  ;;  %v181_v7 = vadd.f32 %v229_v27, %v180_v3 }
  0xee   :  { %215 = vst.msk [vmem:[%s438_s3 + $0x30] sm:$0xff] %vm208_vm1, %v198_v62  ;;  %223 = vst.msk [vmem:[%s438_s3 + $0x70] sm:$0xff] %vm208_vm1, %v206_v63  ;;  %v199_v8 = vmax.f32 %v157_v0, 0.0  ;;  %v207_v9 = vmax.f32 %v189_v1, 0.0 }
  0xef   :  { %213 = vst.msk [vmem:[%s438_s3 + $0x20] sm:$0xff] %vm208_vm1, %v196_v4  ;;  %221 = vst.msk [vmem:[%s438_s3 + $0x60] sm:$0xff] %vm208_vm1, %v204_v5  ;;  %v197_v10 = vmax.f32 %v149_v6, 0.0  ;;  %v205_v11 = vmax.f32 %v181_v7, 0.0 }
  0xf0   :  { %216 = vst.msk [vmem:[%s438_s3 + $0x38] sm:$0xff] %vm208_vm1, %v199_v8  ;;  %224 = vst.msk [vmem:[%s438_s3 + $0x78] sm:$0xff] %vm208_vm1, %v207_v9 }
  0xf1   :  { %214 = vst.msk [vmem:[%s438_s3 + $0x28] sm:$0xff] %vm208_vm1, %v197_v10  ;;  %222 = vst.msk [vmem:[%s438_s3 + $0x68] sm:$0xff] %vm208_vm1, %v205_v11 }

// kernel: vqvae_forward.6
= control target key start
LH: loop header
LB: loop body
LE: loop exit
PB: predicated region body
PF: predicated region fallthrough
CT: control target
= control target key end

     0   :  { %vm215_vm0 = vcmask 261120   ;;  %s408_s1 = inlined_call_operand.vmem [shape: bf16[1,256,32], index: 1, kind: input, shape index: {}]   ;;  %s409_s0 = inlined_call_operand.vmem [shape: f32[1,32,256], index: 0, kind: input, shape index: {}]   ;;  %s410_s2 = inlined_call_operand.vmem [shape: f32[1,32], index: 2, kind: input, shape index: {}]   ;;  %s411_s3 = inlined_call_operand.vmem [shape: f32[1,32,32], index: 3, kind: output, shape index: {}]  }
   0x1   :  { %v285_v0 = vld [vmem:[%s408_s1 + $0x40] sm:$0xff]   ;;  %v287_v2 = vld [vmem:[%s408_s1 + $0x48] sm:$0xff]   ;;  %v289_v4 = vld [vmem:[%s408_s1 + $0x50] sm:$0xff]  }
   0x2   :  { %v286_v1 = vld [vmem:[%s408_s1] sm:$0xff]   ;;  %241 = vmatprep.subr.bf16.mxu0 %v285_v0  ;;  %269 = vmatprep.subr.bf16.mxu1 %v285_v0  ;;  %v288_v3 = vld [vmem:[%s408_s1 + $0x8] sm:$0xff]   ;;  %v290_v5 = vld [vmem:[%s408_s1 + $0x10] sm:$0xff]  }
   0x3   :  { %242 = vmatpush3.bf16.msra.mxu0 %v286_v1  ;;  %277 = vmatpush3.bf16.msra.mxu1 %v286_v1  ;;  %v291_v6 = vld [vmem:[%s408_s1 + $0x58] sm:$0xff]   ;;  %v293_v8 = vld [vmem:[%s408_s1 + $0x60] sm:$0xff]   ;;  %v295_v10 = vld [vmem:[%s408_s1 + $0x68] sm:$0xff]  }
   0x4   :  { %243 = vmatprep.subr.bf16.mxu0 %v287_v2  ;;  %270 = vmatprep.subr.bf16.mxu1 %v287_v2  ;;  %v292_v7 = vld [vmem:[%s408_s1 + $0x18] sm:$0xff]   ;;  %v294_v9 = vld [vmem:[%s408_s1 + $0x20] sm:$0xff]   ;;  %v16_v11 = vld [vmem:[%s409_s0 + $0x8] sm:$0xff] }
   0x5   :  { %v18_v12 = vld [vmem:[%s409_s0 + $0x18] sm:$0xff]  ;;  %v20_v13 = vld [vmem:[%s409_s0 + $0x28] sm:$0xff]  ;;  %v297_v18 = vld [vmem:[%s408_s1 + $0x70] sm:$0xff]  }
   0x6   :  { %v24_v14 = vpack.c.bf16 %v18_v12, %v16_v11  ;;  %v22_v15 = vld [vmem:[%s409_s0 + $0x38] sm:$0xff]  ;;  %v296_v17 = vld [vmem:[%s408_s1 + $0x28] sm:$0xff]   ;;  %v298_v19 = vld [vmem:[%s408_s1 + $0x30] sm:$0xff]  }
   0x7   :  { %244 = vmatpush3.bf16.msra.mxu0 %v288_v3  ;;  %278 = vmatpush3.bf16.msra.mxu1 %v288_v3  ;;  %v26_v16 = vpack.c.bf16 %v22_v15, %v20_v13  ;;  %v299_v20 = vld [vmem:[%s408_s1 + $0x78] sm:$0xff]   ;;  %v15_v22 = vld [vmem:[%s409_s0] sm:$0xff]  ;;  %v17_v23 = vld [vmem:[%s409_s0 + $0x10] sm:$0xff] }
   0x8   :  { %245 = vmatprep.subr.bf16.mxu0 %v289_v4  ;;  %271 = vmatprep.subr.bf16.mxu1 %v289_v4  ;;  %v300_v21 = vld [vmem:[%s408_s1 + $0x38] sm:$0xff]   ;;  %v19_v24 = vld [vmem:[%s409_s0 + $0x20] sm:$0xff]  ;;  %v21_v25 = vld [vmem:[%s409_s0 + $0x30] sm:$0xff]  ;;  %v23_v26 = vpack.c.bf16 %v17_v23, %v15_v22 }
   0x9   :  { %194 = vmatprep.mubr.bf16.mxu0 %v24_v14  ;;  %202 = vmatprep.mubr.bf16.mxu1 %v26_v16  ;;  %v25_v27 = vpack.c.bf16 %v21_v25, %v19_v24  ;;  %v224_v30 = vld [vmem:[%s410_s2] ss:$0 sm:$0xff] }
   0xb   :  { %246 = vmatpush3.bf16.msra.mxu0 %v290_v5  ;;  %279 = vmatpush3.bf16.msra.mxu1 %v290_v5 }
   0xc   :  { %247 = vmatprep.subr.bf16.mxu0 %v291_v6  ;;  %272 = vmatprep.subr.bf16.mxu1 %v291_v6 }
   0xf   :  { %248 = vmatpush3.bf16.msra.mxu0 %v292_v7  ;;  %280 = vmatpush3.bf16.msra.mxu1 %v292_v7 }
  0x10   :  { %249 = vmatprep.subr.bf16.mxu0 %v293_v8  ;;  %273 = vmatprep.subr.bf16.mxu1 %v293_v8 }
  0x13   :  { %250 = vmatpush3.bf16.msra.mxu0 %v294_v9  ;;  %281 = vmatpush3.bf16.msra.mxu1 %v294_v9 }
  0x14   :  { %251 = vmatprep.subr.bf16.mxu0 %v295_v10  ;;  %274 = vmatprep.subr.bf16.mxu1 %v295_v10 }
  0x17   :  { %252 = vmatpush3.bf16.msra.mxu0 %v296_v17  ;;  %282 = vmatpush3.bf16.msra.mxu1 %v296_v17 }
  0x18   :  { %253 = vmatprep.subr.bf16.mxu0 %v297_v18  ;;  %275 = vmatprep.subr.bf16.mxu1 %v297_v18 }
  0x1b   :  { %254 = vmatpush3.bf16.msra.mxu0 %v298_v19  ;;  %283 = vmatpush3.bf16.msra.mxu1 %v298_v19 }
  0x1c   :  { %255 = vmatprep.subr.bf16.mxu0 %v299_v20  ;;  %276 = vmatprep.subr.bf16.mxu1 %v299_v20 }
  0x1f   :  { %256 = vmatpush3.bf16.msra.mxu0 %v300_v21  ;;  %284 = vmatpush3.bf16.msra.mxu1 %v300_v21 }
  0x22   :  { %195 = vmatmul.mubr.bf16.vlgmr.msra.gmra.mrb[0].mxu0 %v23_v26  ;;  %203 = vmatmul.mubr.bf16.vlgmr.msra.gmra.mrb[0].mxu1 %v25_v27 }
  0xf5   :  { %v257_v28 = vpop.f32.mrb[0].mxu0  ;;  %v263_v29 = vpop.f32.mrb[0].mxu1 }
  0xf6   :  { %v258_v31 = vpop.f32.mrb[1].mxu0  ;;  %v264_v32 = vpop.f32.mrb[1].mxu1 }
  0xf7   :  { %v259_v33 = vadd.f32 %v258_v31, %v257_v28  ;;  %v265_v34 = vadd.f32 %v264_v32, %v263_v29  ;;  %v260_v35 = vpop.f32.mrb[2].mxu0  ;;  %v266_v36 = vpop.f32.mrb[2].mxu1 }
  0xf8   :  { %v261_v37 = vpop.f32.mrb[3].mxu0  ;;  %v267_v38 = vpop.f32.mrb[3].mxu1 }
  0xf9   :  { %v197_v39 = vadd.f32 %v259_v33, %v224_v30  ;;  %v205_v40 = vadd.f32 %v265_v34, %v224_v30  ;;  %v262_v41 = vadd.f32 %v261_v37, %v260_v35  ;;  %v268_v42 = vadd.f32 %v267_v38, %v266_v36 }
  0xfb   :  { %v211_v43 = vmax.f32 %v197_v39, 0.0  ;;  %v213_v44 = vmax.f32 %v205_v40, 0.0  ;;  %v200_v45 = vadd.f32 %v262_v41, %v224_v30  ;;  %v208_v46 = vadd.f32 %v268_v42, %v224_v30 }
  0xfd   :  { %216 = vst.msk [vmem:[%s411_s3] sm:$0xff] %vm215_vm0, %v211_v43  ;;  %218 = vst.msk [vmem:[%s411_s3 + $0x10] sm:$0xff] %vm215_vm0, %v213_v44  ;;  %v212_v47 = vmax.f32 %v200_v45, 0.0  ;;  %v214_v48 = vmax.f32 %v208_v46, 0.0 }
  0xff   :  { %217 = vst.msk [vmem:[%s411_s3 + $0x8] sm:$0xff] %vm215_vm0, %v212_v47  ;;  %219 = vst.msk [vmem:[%s411_s3 + $0x18] sm:$0xff] %vm215_vm0, %v214_v48 }

// kernel: vqvae_forward.8
= control target key start
LH: loop header
LB: loop body
LE: loop exit
PB: predicated region body
PF: predicated region fallthrough
CT: control target
= control target key end

     0   :  { %s600_s12 = smov 0   ;;  %s602_s13 = smov 0   ;;  %s657_s0 = inlined_call_operand.vmem [shape: f32[4,32,128], index: 0, kind: input, shape index: {}]   ;;  %s658_s1 = inlined_call_operand.vmem [shape: bf16[4,128,16], index: 1, kind: input, shape index: {}]   ;;  %s659_s2 = inlined_call_operand.vmem [shape: f32[1,16], index: 2, kind: input, shape index: {}]   ;;  %s660_s3 = inlined_call_operand.vmem [shape: f32[4,32,16], index: 3, kind: output, shape index: {}]  }
   0x1   :  { %s604_s14 = smov 0  }
   0x2 LB: > { %s25_s15 = sadd.s32 1, %s574_s13  ;;  %p473_p0 = scmp.ge.s32.totalorder %s578_s14, 1  ;;  %s578_s14 = sphi %s604_s14, %s13_s14   ;;  %s574_s13 = sphi %s602_s13, %s662_s13   ;;  %s570_s12 = sphi %s600_s12, %s661_s12  }
   0x3   : > { %p27_p1 = scmp.ge.s32.totalorder %s25_s15, 4  ;;  %p168_p2 = scmp.lt.s32.totalorder %s578_s14, 5 }
   0x5   : > { %s664_s15 = smov (%p27_p1, %s25_s15), 0  ;;  %p169_p3 = pnand %p473_p0, %p168_p2 }
   0x6   : > { %p206_p4 = scmp.lt.s32.totalorder (!%p169_p3), %s570_s12, 3  ;;  %v480_v18 = vld [vmem:[%s659_s2] ss:$0 sm:$0xff] (!%p169_p3)  ;;  %vm365_vm0 = vcmask (!%p169_p3), 130048  }
   0x7   : > { %172 = sbr.rel (%p169_p3) target bundleno = 270 (0x10e), region = 32 }
   0xe   : > { %s666_s12 = smov (!%p206_p4, %s570_s12), 3 }
   0xf   : > { %s492_s16 = sshll.u32 %s666_s12, 6  ;;  %s491_s20 = sshll.u32 %s666_s12, 5 }
  0x10   : > { %s624_s19 = scalar_lea.vmem %s658_s1, %s492_s16  ;;  %s213_s23 = scalar_lea.vmem %s657_s0, %s491_s20 }
  0x11   : > { %v548_v0 = vld [vmem:[%s624_s19] sm:$0xff]   ;;  %v549_v1 = vld [vmem:[%s624_s19 + $0x8] sm:$0xff]   ;;  %v550_v2 = vld [vmem:[%s624_s19 + $0x10] sm:$0xff]   ;;  %s228_s28 = scalar_lea.vmem %s660_s3, %s491_s20 }
  0x12   : > { %504 = vmatprep.subr.bf16.mxu0 %v548_v0  ;;  %v551_v3 = vld [vmem:[%s624_s19 + $0x18] sm:$0xff]   ;;  %v231_v4 = vld [vmem:[%s213_s23] sm:$0xff]  ;;  %v232_v5 = vld [vmem:[%s213_s23 + $0x8] sm:$0xff] }
  0x13   : > { %505 = vmatpush3.bf16.msra.mxu0 %v548_v0  ;;  %v235_v6 = vmax.f32 %v231_v4, 0.0  ;;  %v236_v7 = vmax.f32 %v232_v5, 0.0  ;;  %v552_v9 = vld [vmem:[%s624_s19 + $0x20] sm:$0xff]   ;;  %v553_v10 = vld [vmem:[%s624_s19 + $0x28] sm:$0xff]   ;;  %v554_v11 = vld [vmem:[%s624_s19 + $0x30] sm:$0xff]  }
  0x14   : > { %506 = vmatprep.subr.bf16.mxu0 %v549_v1  ;;  %v233_v12 = vld [vmem:[%s213_s23 + $0x10] sm:$0xff]  ;;  %v234_v13 = vld [vmem:[%s213_s23 + $0x18] sm:$0xff] }
  0x15   : > { %v239_v8 = vpack.c.bf16 %v236_v7, %v235_v6  ;;  %v555_v14 = vld [vmem:[%s624_s19 + $0x38] sm:$0xff]   ;;  %v237_v15 = vmax.f32 %v233_v12, 0.0  ;;  %v238_v16 = vmax.f32 %v234_v13, 0.0 }
  0x17   : > { %507 = vmatpush3.bf16.msra.mxu0 %v549_v1  ;;  %520 = vmatprep.mubr.bf16.mxu0 %v239_v8  ;;  %v240_v17 = vpack.c.bf16 %v238_v16, %v237_v15 }
  0x18   : > { %508 = vmatprep.subr.bf16.mxu0 %v550_v2 }
  0x1b   : > { %509 = vmatpush3.bf16.msra.mxu0 %v550_v2 }
  0x1c   : > { %510 = vmatprep.subr.bf16.mxu0 %v551_v3 }
  0x1f   : > { %511 = vmatpush3.bf16.msra.mxu0 %v551_v3 }
  0x20   : > { %512 = vmatprep.subr.bf16.mxu0 %v552_v9 }
  0x23   : > { %513 = vmatpush3.bf16.msra.mxu0 %v552_v9 }
  0x24   : > { %514 = vmatprep.subr.bf16.mxu0 %v553_v10 }
  0x27   : > { %515 = vmatpush3.bf16.msra.mxu0 %v553_v10 }
  0x28   : > { %516 = vmatprep.subr.bf16.mxu0 %v554_v11 }
  0x2b   : > { %517 = vmatpush3.bf16.msra.mxu0 %v554_v11 }
  0x2c   : > { %518 = vmatprep.subr.bf16.mxu0 %v555_v14 }
  0x2f   : > { %519 = vmatpush3.bf16.msra.mxu0 %v555_v14 }
  0x32   : > { %521 = vmatmul.mubr.bf16.vlgmr.msra.gmra.mrb[0].mxu0 %v240_v17 }
 0x105   : > { %v522_v19 = vpop.f32.mrb[0].mxu0 }
 0x106   : > { %v355_v20 = vadd.f32 %v522_v19, %v480_v18  ;;  %v346_v21 = vpop.f32.mrb[1].mxu0 }
 0x107   : > { %v347_v22 = vadd.f32 %v480_v18, %v346_v21  ;;  %v523_v23 = vpop.f32.mrb[2].mxu0 }
 0x108   : > { %v363_v24 = vmax.f32 %v355_v20, 0.0  ;;  %v358_v25 = vadd.f32 %v523_v23, %v480_v18  ;;  %v349_v26 = vpop.f32.mrb[3].mxu0 }
 0x109   : > { %v361_v27 = vmax.f32 %v347_v22, 0.0  ;;  %v350_v28 = vadd.f32 %v480_v18, %v349_v26 }
 0x10a   : > { %368 = vst.msk [vmem:[%s228_s28 + $0x10] sm:$0xff] %vm365_vm0, %v363_v24  ;;  %v364_v29 = vmax.f32 %v358_v25, 0.0 }
 0x10b   : > { %366 = vst.msk [vmem:[%s228_s28] sm:$0xff] %vm365_vm0, %v361_v27  ;;  %v362_v30 = vmax.f32 %v350_v28, 0.0 }
 0x10c   : > { %369 = vst.msk [vmem:[%s228_s28 + $0x18] sm:$0xff] %vm365_vm0, %v364_v29 }
 0x10d   : > { %367 = vst.msk [vmem:[%s228_s28 + $0x8] sm:$0xff] %vm365_vm0, %v362_v30 }
 0x10e PF: > { %s13_s14 = sadd.s32 1, %s578_s14   ;;  %s661_s12 = smov %s574_s13 }
 0x10f   : > { %p10_p5 = scmp.ge.s32.totalorder %s13_s14, 6   ;;  %s662_s13 = smov %s664_s15 }
 0x111   :  { %12 = sbr.rel (!%p10_p5) target bundleno = 2 (0x2), region = 65 }

// kernel: vqvae_forward.9
= control target key start
LH: loop header
LB: loop body
LE: loop exit
PB: predicated region body
PF: predicated region fallthrough
CT: control target
= control target key end

     0   :  { %s677_s12 = smov 0   ;;  %s679_s13 = smov 0   ;;  %s784_s0 = inlined_call_operand.vmem [shape: f32[4,128,64], index: 0, kind: input, shape index: {}]   ;;  %s785_s1 = inlined_call_operand.vmem [shape: bf16[4,64,3], index: 1, kind: input, shape index: {}]   ;;  %s786_s2 = inlined_call_operand.vmem [shape: f32[1,3], index: 2, kind: input, shape index: {}]   ;;  %s787_s3 = inlined_call_operand.vmem [shape: f32[4,128,3], index: 3, kind: output, shape index: {}]  }
   0x1   :  { %s681_s14 = smov 0  }
   0x2 LB: > { %s25_s15 = sadd.s32 1, %s651_s13  ;;  %p536_p0 = scmp.ge.s32.totalorder %s655_s14, 1  ;;  %s655_s14 = sphi %s681_s14, %s13_s14   ;;  %s651_s13 = sphi %s679_s13, %s789_s13   ;;  %s647_s12 = sphi %s677_s12, %s788_s12  }
   0x3   : > { %p27_p1 = scmp.ge.s32.totalorder %s25_s15, 4  ;;  %p168_p2 = scmp.lt.s32.totalorder %s655_s14, 5 }
   0x5   : > { %s791_s15 = smov (%p27_p1, %s25_s15), 0  ;;  %p169_p3 = pnand %p536_p0, %p168_p2 }
   0x6   : > { %p206_p4 = scmp.lt.s32.totalorder (!%p169_p3), %s647_s12, 3  ;;  %vm294_vm0 = vcmask (!%p169_p3), 523264   ;;  %v543_v28 = vld [vmem:[%s786_s2] ss:$0 sm:$0xff] (!%p169_p3)  ;;  %vm416_vm1 = vcmask (!%p169_p3), 23552  }
   0x7   : > { %172 = sbr.rel (%p169_p3) target bundleno = 260 (0x104), region = 32 }
   0xe   : > { %s793_s12 = smov (!%p206_p4, %s647_s12), 3 }
   0xf   : > { %s558_s16 = sshll.u32 %s793_s12, 7  ;;  %s559_s17 = sshll.u32 %s793_s12, 5 }
  0x10   : > { %s219_s20 = scalar_lea.vmem %s785_s1, %s559_s17  ;;  %s707_s23 = scalar_lea.vmem %s784_s0, %s558_s16 }
  0x11   : > { %v629_v0 = vld [vmem:[%s219_s20] sm:$0xff]   ;;  %v630_v1 = vld [vmem:[%s219_s20 + $0x8] sm:$0xff]   ;;  %v631_v2 = vld [vmem:[%s219_s20 + $0x10] sm:$0xff]   ;;  %s741_s28 = scalar_lea.vmem %s787_s3, %s558_s16 }
  0x12   : > { %573 = vmatprep.subr.bf16.mxu0 %v629_v0  ;;  %597 = vmatprep.subr.bf16.mxu1 %v629_v0  ;;  %v231_v3 = vld [vmem:[%s707_s23] sm:$0xff]  ;;  %v232_v4 = vld [vmem:[%s707_s23 + $0x8] sm:$0xff]  ;;  %v632_v9 = vld [vmem:[%s219_s20 + $0x18] sm:$0xff]  }
  0x13   : > { %574 = vmatpush3.bf16.msra.mxu0 %v629_v0  ;;  %601 = vmatpush3.bf16.msra.mxu1 %v629_v0  ;;  %v239_v5 = vld [vmem:[%s707_s23 + $0x40] sm:$0xff]  ;;  %v247_v6 = vpack.c.bf16 %v232_v4, %v231_v3  ;;  %v240_v7 = vld [vmem:[%s707_s23 + $0x48] sm:$0xff]  ;;  %v233_v10 = vld [vmem:[%s707_s23 + $0x10] sm:$0xff] }
  0x14   : > { %575 = vmatprep.subr.bf16.mxu0 %v630_v1  ;;  %598 = vmatprep.subr.bf16.mxu1 %v630_v1  ;;  %v251_v8 = vpack.c.bf16 %v240_v7, %v239_v5  ;;  %v234_v11 = vld [vmem:[%s707_s23 + $0x18] sm:$0xff]  ;;  %v241_v12 = vld [vmem:[%s707_s23 + $0x50] sm:$0xff]  ;;  %v235_v14 = vld [vmem:[%s707_s23 + $0x20] sm:$0xff] }
  0x15   : > { %581 = vmatprep.mubr.msk.bf16.mxu0 %vm294_vm0, %v247_v6  ;;  %v242_v13 = vld [vmem:[%s707_s23 + $0x58] sm:$0xff]  ;;  %v236_v15 = vld [vmem:[%s707_s23 + $0x28] sm:$0xff]  ;;  %v243_v16 = vld [vmem:[%s707_s23 + $0x60] sm:$0xff]  ;;  %v248_v18 = vpack.c.bf16 %v234_v11, %v233_v10 }
  0x16   : > { %589 = vmatprep.mubr.msk.bf16.mxu1 %vm294_vm0, %v251_v8  ;;  %v244_v17 = vld [vmem:[%s707_s23 + $0x68] sm:$0xff]  ;;  %v252_v19 = vpack.c.bf16 %v242_v13, %v241_v12  ;;  %v249_v20 = vpack.c.bf16 %v236_v15, %v235_v14  ;;  %v237_v22 = vld [vmem:[%s707_s23 + $0x30] sm:$0xff]  ;;  %v238_v23 = vld [vmem:[%s707_s23 + $0x38] sm:$0xff] }
  0x17   : > { %576 = vmatpush3.bf16.msra.mxu0 %v630_v1  ;;  %602 = vmatpush3.bf16.msra.mxu1 %v630_v1  ;;  %v253_v21 = vpack.c.bf16 %v244_v17, %v243_v16  ;;  %v245_v24 = vld [vmem:[%s707_s23 + $0x70] sm:$0xff]  ;;  %v246_v25 = vld [vmem:[%s707_s23 + $0x78] sm:$0xff]  ;;  %v250_v26 = vpack.c.bf16 %v238_v23, %v237_v22 }
  0x18   : > { %577 = vmatprep.subr.bf16.mxu0 %v631_v2  ;;  %599 = vmatprep.subr.bf16.mxu1 %v631_v2  ;;  %v254_v27 = vpack.c.bf16 %v246_v25, %v245_v24 }
  0x1b   : > { %578 = vmatpush3.bf16.msra.mxu0 %v631_v2  ;;  %603 = vmatpush3.bf16.msra.mxu1 %v631_v2 }
  0x1c   : > { %579 = vmatprep.subr.bf16.mxu0 %v632_v9  ;;  %600 = vmatprep.subr.bf16.mxu1 %v632_v9 }
  0x1f   : > { %580 = vmatpush3.bf16.msra.mxu0 %v632_v9  ;;  %604 = vmatpush3.bf16.msra.mxu1 %v632_v9 }
  0x22   : > { %582 = vmatmul.mubr.msk.bf16.vlgmr.msra.gmra.mrb[0].mxu0 %vm294_vm0, %v248_v18  ;;  %590 = vmatmul.mubr.msk.bf16.vlgmr.msra.gmra.mrb[0].mxu1 %vm294_vm0, %v252_v19 }
  0x23   : > { %585 = vmatprep.mubr.msk.bf16.mxu0 %vm294_vm0, %v249_v20  ;;  %593 = vmatprep.mubr.msk.bf16.mxu1 %vm294_vm0, %v253_v21 }
  0x2a   : > { %586 = vmatmul.mubr.msk.bf16.gmra.mrb[4].mxu0 %vm294_vm0, %v250_v26  ;;  %594 = vmatmul.mubr.msk.bf16.gmra.mrb[4].mxu1 %vm294_vm0, %v254_v27 }
  0xf5   : > { %v583_v29 = vpop.f32.mrb[0].mxu0  ;;  %v591_v30 = vpop.f32.mrb[0].mxu1 }
  0xf6   : > { %v362_v31 = vadd.f32 %v583_v29, %v543_v28  ;;  %v394_v32 = vadd.f32 %v591_v30, %v543_v28  ;;  %v353_v33 = vpop.f32.mrb[1].mxu0  ;;  %v385_v34 = vpop.f32.mrb[1].mxu1 }
  0xf7   : > { %v354_v35 = vadd.f32 %v543_v28, %v353_v33  ;;  %v386_v36 = vadd.f32 %v543_v28, %v385_v34  ;;  %v584_v37 = vpop.f32.mrb[2].mxu0  ;;  %v592_v38 = vpop.f32.mrb[2].mxu1 }
  0xf8   : > { %419 = vst.msk [vmem:[%s741_s28 + $0x10] sm:$0xff] %vm416_vm1, %v362_v31  ;;  %427 = vst.msk [vmem:[%s741_s28 + $0x50] sm:$0xff] %vm416_vm1, %v394_v32  ;;  %v365_v39 = vadd.f32 %v584_v37, %v543_v28  ;;  %v397_v40 = vadd.f32 %v592_v38, %v543_v28  ;;  %v356_v41 = vpop.f32.mrb[3].mxu0  ;;  %v388_v42 = vpop.f32.mrb[3].mxu1 }
  0xf9   : > { %417 = vst.msk [vmem:[%s741_s28] sm:$0xff] %vm416_vm1, %v354_v35  ;;  %425 = vst.msk [vmem:[%s741_s28 + $0x40] sm:$0xff] %vm416_vm1, %v386_v36  ;;  %v357_v43 = vadd.f32 %v543_v28, %v356_v41  ;;  %v389_v44 = vadd.f32 %v543_v28, %v388_v42 }
  0xfa   : > { %420 = vst.msk [vmem:[%s741_s28 + $0x18] sm:$0xff] %vm416_vm1, %v365_v39  ;;  %428 = vst.msk [vmem:[%s741_s28 + $0x58] sm:$0xff] %vm416_vm1, %v397_v40 }
  0xfb   : > { %418 = vst.msk [vmem:[%s741_s28 + $0x8] sm:$0xff] %vm416_vm1, %v357_v43  ;;  %426 = vst.msk [vmem:[%s741_s28 + $0x48] sm:$0xff] %vm416_vm1, %v389_v44 }
  0xfd   : > { %v587_v45 = vpop.f32.mrb[4].mxu0  ;;  %v595_v46 = vpop.f32.mrb[4].mxu1 }
  0xfe   : > { %v378_v47 = vadd.f32 %v587_v45, %v543_v28  ;;  %v410_v48 = vadd.f32 %v595_v46, %v543_v28  ;;  %v369_v49 = vpop.f32.mrb[5].mxu0  ;;  %v401_v50 = vpop.f32.mrb[5].mxu1 }
  0xff   : > { %v370_v51 = vadd.f32 %v543_v28, %v369_v49  ;;  %v402_v52 = vadd.f32 %v543_v28, %v401_v50  ;;  %v588_v53 = vpop.f32.mrb[6].mxu0  ;;  %v596_v54 = vpop.f32.mrb[6].mxu1 }
 0x100   : > { %423 = vst.msk [vmem:[%s741_s28 + $0x30] sm:$0xff] %vm416_vm1, %v378_v47  ;;  %431 = vst.msk [vmem:[%s741_s28 + $0x70] sm:$0xff] %vm416_vm1, %v410_v48  ;;  %v381_v55 = vadd.f32 %v588_v53, %v543_v28  ;;  %v413_v56 = vadd.f32 %v596_v54, %v543_v28  ;;  %v372_v57 = vpop.f32.mrb[7].mxu0  ;;  %v404_v58 = vpop.f32.mrb[7].mxu1 }
 0x101   : > { %421 = vst.msk [vmem:[%s741_s28 + $0x20] sm:$0xff] %vm416_vm1, %v370_v51  ;;  %429 = vst.msk [vmem:[%s741_s28 + $0x60] sm:$0xff] %vm416_vm1, %v402_v52  ;;  %v373_v59 = vadd.f32 %v543_v28, %v372_v57  ;;  %v405_v60 = vadd.f32 %v543_v28, %v404_v58 }
 0x102   : > { %424 = vst.msk [vmem:[%s741_s28 + $0x38] sm:$0xff] %vm416_vm1, %v381_v55  ;;  %432 = vst.msk [vmem:[%s741_s28 + $0x78] sm:$0xff] %vm416_vm1, %v413_v56 }
 0x103   : > { %422 = vst.msk [vmem:[%s741_s28 + $0x28] sm:$0xff] %vm416_vm1, %v373_v59  ;;  %430 = vst.msk [vmem:[%s741_s28 + $0x68] sm:$0xff] %vm416_vm1, %v405_v60 }
 0x104 PF: > { %s13_s14 = sadd.s32 1, %s655_s14   ;;  %s788_s12 = smov %s651_s13 }
 0x105   : > { %p10_p5 = scmp.ge.s32.totalorder %s13_s14, 6   ;;  %s789_s13 = smov %s791_s15 }
 0x107   :  { %12 = sbr.rel (!%p10_p5) target bundleno = 2 (0x2), region = 65 }

// kernel: vqvae_forward.7
= control target key start
LH: loop header
LB: loop body
LE: loop exit
PB: predicated region body
PF: predicated region fallthrough
CT: control target
= control target key end

     0   :  { %20 = vsyncpa [#allocation5], 0  ;;  %s6664_s29 = smov 0   ;;  %s7436_s0 = inlined_call_operand.vmem [shape: f32[2,4,4,32], index: 0, kind: input, shape index: {}]   ;;  %s7437_s1 = inlined_call_operand.vmem [shape: bf16[9,32,32], index: 1, kind: input, shape index: {}]   ;;  %s7438_s2 = inlined_call_operand.vmem [shape: f32[1,32], index: 2, kind: input, shape index: {}]   ;;  %s7439_s3 = inlined_call_operand.vmem [shape: bf16[2,9,32,8], index: 3, kind: input, shape index: {}]   ;;  %s7440_s4 = inlined_call_operand.vmem [shape: f32[2,8,32], index: 4, kind: input, shape index: {}]   ;;  %s7441_s5 = inlined_call_operand.vmem [shape: f32[32,8], index: 5, kind: input, shape index: {}]   ;;  %s7442_s6 = inlined_call_operand.vmem [shape: f32[1,8], index: 6, kind: input, shape index: {}]   ;;  %s7443_s7 = inlined_call_operand.vmem [shape: f32[16,8], index: 7, kind: input, shape index: {}]   ;;  %s7444_s8 = inlined_call_operand.vmem [shape: f32[1,16], index: 8, kind: input, shape index: {}]   ;;  %s7445_s9 = inlined_call_operand.vmem [shape: bf16[9,8,32], index: 9, kind: input, shape index: {}]   ;;  %s7446_s10 = inlined_call_operand.vmem [shape: f32[1,32], index: 10, kind: input, shape index: {}]   ;;  %s7447_s11 = inlined_call_operand.vmem [shape: bf16[2,9,32,8], index: 11, kind: input, shape index: {}]   ;;  %s7448_s12 = inlined_call_operand.vmem [shape: f32[2,8,32], index: 12, kind: input, shape index: {}]   ;;  %s7449_s13 = inlined_call_operand.vmem [shape: f32[2,4,4,32], index: 13, kind: output, shape index: {0}]   ;;  %s7450_s14 = inlined_call_operand.hbm [shape: f32[1,1], index: 14, kind: output, shape index: {1}]  }
   0x1 LB: > { %s6670_s30 = sadd.s32 4294967295, %s6583_s29   ;;  %p5295_p0 = scmp.ge.s32.totalorder %s6583_s29, 1  ;;  %s6583_s29 = sphi %s6664_s29, %s26_s29  }
   0x2   : > { %p411_p1 = scmp.lt.s32.totalorder %s6583_s29, 3 }
   0x4   : > { %p412_p2 = pnand %p5295_p0, %p411_p1 }
   0x5   : > { %p457_p3 = scmp.lt.s32.totalorder (!%p412_p2), %s6670_s30, 1  ;;  %p5300_p4 = scmp.ne.s32.totalorder (!%p412_p2), %s6670_s30, 0 }
   0x6   : > { %415 = sbr.rel (%p412_p2) target bundleno = 3810 (0xee2), region = 72 }
   0xd   : > { %s458_s15 = scalar_select %p457_p3, %s6670_s30, 1 }
   0xe   : > { %471 = sbr.rel (%p5300_p4) target bundleno = 21 (0x15), region = 76  ;;  %vm472_vm0 = vcmask (!%p5300_p4), 0   ;;  %v6585_v0 = vmov (!%p5300_p4), 0.0  }
   0xf   : > { %s5545_s16 = sshll.u32 %s458_s15, 4  ;;  %473 = vst.msk [vmem:[#allocation4] sm:$0x1] (!%p5300_p4), %vm472_vm0, %v6585_v0 }
  0x10   : > { %s6679_s19 = scalar_lea.vmem %s7436_s0, %s5545_s16  ;;  %s6684_s22 = scalar_lea.vmem %s7449_s13, %s5545_s16 }
  0x15 PF: > { %v6349_v1 = vld [vmem:[%s7437_s1 + $0x10] sm:$0xff]   ;;  %v6586_v2 = vmov 0.0   ;;  %v6350_v3 = vld [vmem:[%s7437_s1] sm:$0xff]   ;;  %v6351_v4 = vld [vmem:[%s7437_s1 + $0x18] sm:$0xff]   ;;  %vm6587_vm1 = vmmov 0   ;;  %vm474_vm2 = vcmask 259072  }
  0x16   : > { %5726 = vmatprep.subr.bf16.mxu0 %v6586_v2  ;;  %5734 = vmatprep.subr.bf16.mxu1 %v6586_v2  ;;  %v6352_v5 = vld [vmem:[%s7437_s1 + $0x8] sm:$0xff]   ;;  %475 = vst.msk [vmem:[#allocation2] sm:$0x3f] %vm474_vm2, %v6586_v2  ;;  %476 = vst.msk [vmem:[#allocation2 + $0x8] sm:$0x3f] %vm474_vm2, %v6586_v2  ;;  %vm529_vm3 = vcmask 257024  }
  0x17   : > { %5727 = vmatpush3.bf16.msra.mxu0 %v6349_v1  ;;  %5730 = vmatprep.mubr.msk.bf16.mxu0 %vm6587_vm1, %v6586_v2  ;;  %477 = vst.msk [vmem:[#allocation2 + $0x10] sm:$0x3f] %vm474_vm2, %v6586_v2  ;;  %478 = vst.msk [vmem:[#allocation2 + $0x18] sm:$0x3f] %vm474_vm2, %v6586_v2  ;;  %v488_v6 = vld [vmem:[%s6679_s19] sm:$0xf] }
  0x18   : > { %5735 = vmatpush3.bf16.msra.mxu1 %v6350_v3  ;;  %5728 = vmatprep.subr.bf16.mxu0 %v6586_v2  ;;  %479 = vst.msk [vmem:[#allocation2 + $0x20] sm:$0x3f] %vm474_vm2, %v6586_v2  ;;  %480 = vst.msk [vmem:[#allocation2 + $0x28] sm:$0x3f] %vm474_vm2, %v6586_v2  ;;  %v489_v7 = vld [vmem:[%s6679_s19 + $0x4] sm:$0xf] }
  0x19   : > { %5736 = vmatprep.subr.bf16.mxu1 %v6586_v2  ;;  %5738 = vmatprep.mubr.msk.bf16.mxu1 %vm6587_vm1, %v6586_v2  ;;  %v490_v8 = vld [vmem:[%s6679_s19 + $0x8] sm:$0xf]  ;;  %530 = vst.msk [vmem:[#allocation2 + $0x9] sm:$0xf] %vm529_vm3, %v488_v6  ;;  %531 = vst.msk [vmem:[#allocation2 + $0x11] sm:$0xf] %vm529_vm3, %v489_v7 }
  0x1a   : > { %532 = vst.msk [vmem:[#allocation2 + $0x19] sm:$0xf] %vm529_vm3, %v490_v8  ;;  %vm572_vm4 = vcmask 261120   ;;  %v491_v9 = vld [vmem:[%s6679_s19 + $0xc] sm:$0xf]  ;;  %v6357_v10 = vld [vmem:[%s7437_s1 + $0x20] sm:$0xff]  }
  0x1b   : > { %5729 = vmatpush3.bf16.msra.mxu0 %v6351_v4  ;;  %533 = vst.msk [vmem:[#allocation2 + $0x21] sm:$0xf] %vm529_vm3, %v491_v9  ;;  %v6358_v14 = vld [vmem:[%s7437_s1 + $0x30] sm:$0xff]   ;;  %v6359_v20 = vld [vmem:[%s7437_s1 + $0x28] sm:$0xff]   ;;  %v6360_v23 = vld [vmem:[%s7437_s1 + $0x38] sm:$0xff]   ;;  %vm1866_vm5 = vcmask 64512  }
  0x1c   : > { %5737 = vmatpush3.bf16.msra.mxu1 %v6352_v5  ;;  %5742 = vmatprep.subr.bf16.mxu0 %v6586_v2  ;;  %v6363_v25 = vld [vmem:[%s7437_s1 + $0x40] sm:$0xff]   ;;  %v6366_v27 = vld [vmem:[%s7437_s1 + $0x50] sm:$0xff]   ;;  %v6367_v28 = vld [vmem:[%s7437_s1 + $0x48] sm:$0xff]   ;;  %vm2927_vm7 = vcmask 130048   ;;  %vm481_vm12 = vcmask 62464   ;;  %vm3126_vm15 = vcmask 1043456  }
  0x1d   : > { %5750 = vmatprep.subr.bf16.mxu1 %v6586_v2  ;;  %v6368_v33 = vld [vmem:[%s7437_s1 + $0x58] sm:$0xff]   ;;  %v6371_v35 = vld [vmem:[%s7437_s1 + $0x60] sm:$0xff]   ;;  %v6374_v37 = vld [vmem:[%s7437_s1 + $0x70] sm:$0xff]   ;;  %482 = vst.msk [vmem:[#allocation3] sm:$0x3f] %vm481_vm12, %v6586_v2  ;;  %vm3092_vm0 = vcmask 60416  }
  0x1e   : > { %v6375_v38 = vld [vmem:[%s7437_s1 + $0x68] sm:$0xff]   ;;  %v6376_v43 = vld [vmem:[%s7437_s1 + $0x78] sm:$0xff]   ;;  %v6379_v45 = vld [vmem:[%s7437_s1 + $0x80] sm:$0xff]   ;;  %485 = vst.msk [vmem:[#allocation3 + $0x18] sm:$0x3f] %vm481_vm12, %v6586_v2  ;;  %vm3074_vm2 = vcmask 0  }
  0x1f   : > { %v6382_v49 = vld [vmem:[%s7437_s1 + $0x88] sm:$0xff]   ;;  %v6385_v51 = vld [vmem:[%s7439_s3 + $0x10] sm:$0xff]   ;;  %v6386_v52 = vld [vmem:[%s7439_s3 + $0x18] sm:$0xff]   ;;  %486 = vst.msk [vmem:[#allocation3 + $0x20] sm:$0x3f] %vm481_vm12, %v6586_v2  ;;  %p6335_p5 = scmp.eq.s32.totalorder %s6670_s30, 1 }
  0x20   : > { %v6353_v11 = vld [vmem:[#allocation2 + $0x1] ss:$8 sps:$4 sm:$0xff]   ;;  %vm6194_vm6 = vmpackc.low %vm1866_vm5, %vm1866_vm5  ;;  %487 = vst.msk [vmem:[#allocation3 + $0x28] sm:$0x3f] %vm481_vm12, %v6586_v2  ;;  %s6588_s28 = smov [#allocation4]  }
  0x21   : > { %v6354_v12 = vld [vmem:[#allocation2 + $0x11] ss:$8 sps:$4 sm:$0xff]   ;;  %v6355_v13 = vld [vmem:[#allocation2] ss:$8 sps:$4 sm:$0xff]   ;;  %483 = vst.msk [vmem:[#allocation3 + $0x8] sm:$0x3f] %vm481_vm12, %v6586_v2 }
  0x22   : > { %v559_v15 = vpack.c.bf16 %v6354_v12, %v6353_v11  ;;  %v6356_v16 = vld [vmem:[#allocation2 + $0x10] ss:$8 sps:$4 sm:$0xff]   ;;  %v6361_v17 = vld [vmem:[#allocation2 + $0x2] ss:$8 sps:$4 sm:$0xff]   ;;  %484 = vst.msk [vmem:[#allocation3 + $0x10] sm:$0x3f] %vm481_vm12, %v6586_v2 }
  0x23   : > { %v6362_v18 = vld [vmem:[#allocation2 + $0x12] ss:$8 sps:$4 sm:$0xff]   ;;  %v546_v19 = vpack.c.bf16 %v6356_v16, %v6355_v13  ;;  %v6378_v40 = vld [vmem:[#allocation2 + $0x20] ss:$8 sps:$4 sm:$0xff]   ;;  %s5227_s15 = sshll.u32 %s6588_s28, 4  ;;  %s5228_s15 = int_to_ptr.vmem [resolvable:$true] %s5227_s15 }
  0x24   : > { %5731 = vmatmul.mubr.msk.bf16.vlgmr.msra.gmra.mrb[0].mxu0 %vm572_vm4, %v559_v15  ;;  %v6364_v21 = vld [vmem:[#allocation2 + $0x8] ss:$8 sps:$4 sm:$0xff]   ;;  %v6365_v22 = vld [vmem:[#allocation2 + $0x18] ss:$8 sps:$4 sm:$0xff]   ;;  %v685_v24 = vpack.c.bf16 %v6362_v18, %v6361_v17  ;;  %s6547_s16 = scalar_lea.vmem %s5228_s15, 16  ;;  %s6553_s17 = scalar_lea.vmem %s5228_s15, 32 }
  0x25   : > { %5743 = vmatpush3.bf16.msra.mxu0 %v6357_v10  ;;  %5746 = vmatprep.mubr.msk.bf16.mxu0 %vm6587_vm1, %v6586_v2  ;;  %v756_v26 = vpack.c.bf16 %v6365_v22, %v6364_v21  ;;  %v6369_v29 = vld [vmem:[#allocation2 + $0x9] ss:$8 sps:$4 sm:$0xff]   ;;  %v6370_v30 = vld [vmem:[#allocation2 + $0x19] ss:$8 sps:$4 sm:$0xff]   ;;  %p6548_p6 = scmp.ne.s32.totalorder %s5228_s15, %s6547_s16  ;;  %p6554_p9 = scmp.lt.s32.totalorder %s5228_s15, %s5228_s15 }
  0x26   : > { %5739 = vmatmul.mubr.msk.bf16.vlgmr.msra.gmra.mrb[0].mxu1 %vm572_vm4, %v546_v19  ;;  %5744 = vmatprep.subr.bf16.mxu0 %v6586_v2  ;;  %v6372_v31 = vld [vmem:[#allocation2 + $0xa] ss:$8 sps:$4 sm:$0xff]   ;;  %v6373_v32 = vld [vmem:[#allocation2 + $0x1a] ss:$8 sps:$4 sm:$0xff]   ;;  %v827_v34 = vpack.c.bf16 %v6370_v30, %v6369_v29  ;;  %p6555_p10 = scmp.lt.s32.totalorder %s6553_s17, %s6547_s16 }
  0x27   : > { %5751 = vmatpush3.bf16.msra.mxu1 %v6358_v14  ;;  %5754 = vmatprep.mubr.msk.bf16.mxu1 %vm6587_vm1, %v6586_v2  ;;  %v898_v36 = vpack.c.bf16 %v6373_v32, %v6372_v31  ;;  %v6377_v39 = vld [vmem:[#allocation2 + $0x10] ss:$8 sps:$4 sm:$0xff]   ;;  %v6381_v42 = vld [vmem:[#allocation2 + $0x21] ss:$8 sps:$4 sm:$0xff]   ;;  %p6549_p7 = pnand %p6548_p6, %p6335_p5 }
  0x28   : > { %5752 = vmatprep.subr.bf16.mxu1 %v6586_v2  ;;  %v6380_v41 = vld [vmem:[#allocation2 + $0x11] ss:$8 sps:$4 sm:$0xff]   ;;  %v970_v44 = vpack.c.bf16 %v6378_v40, %v6377_v39  ;;  %v6384_v48 = vld [vmem:[#allocation2 + $0x22] ss:$8 sps:$4 sm:$0xff]   ;;  %p6556_p11 = por %p6555_p10, %p6554_p9 }
  0x29   : > { %5745 = vmatpush3.bf16.msra.mxu0 %v6359_v20  ;;  %v1041_v46 = vpack.c.bf16 %v6381_v42, %v6380_v41  ;;  %v6383_v47 = vld [vmem:[#allocation2 + $0x12] ss:$8 sps:$4 sm:$0xff]   ;;  %v1865_v22 = vld [vmem:[%s7440_s4] sm:$0xff]  ;;  %p6550_p8 = pneg %p6549_p7 }
  0x2a   : > { %5758 = vmatprep.subr.bf16.mxu0 %v6586_v2  ;;  %v1112_v50 = vpack.c.bf16 %v6384_v48, %v6383_v47 }
  0x2b   : > { %5753 = vmatpush3.bf16.msra.mxu1 %v6360_v23  ;;  %p6557_p12 = pnand %p6556_p11, %p6550_p8 }
  0x2c   : > { %5747 = vmatmul.mubr.msk.bf16.vlgmr.msra.gmra.mrb[4].mxu0 %vm572_vm4, %v685_v24  ;;  %5766 = vmatprep.subr.bf16.mxu1 %v6586_v2 }
  0x2d   : > { %5759 = vmatpush3.bf16.msra.mxu0 %v6363_v25  ;;  %5762 = vmatprep.mubr.msk.bf16.mxu0 %vm6587_vm1, %v6586_v2 }
  0x2e   : > { %5755 = vmatmul.mubr.msk.bf16.vlgmr.msra.gmra.mrb[4].mxu1 %vm572_vm4, %v756_v26  ;;  %5760 = vmatprep.subr.bf16.mxu0 %v6586_v2 }
  0x2f   : > { %5767 = vmatpush3.bf16.msra.mxu1 %v6366_v27  ;;  %5770 = vmatprep.mubr.msk.bf16.mxu1 %vm6587_vm1, %v6586_v2 }
  0x30   : > { %5768 = vmatprep.subr.bf16.mxu1 %v6586_v2 }
  0x31   : > { %5761 = vmatpush3.bf16.msra.mxu0 %v6367_v28 }
  0x32   : > { %5774 = vmatprep.subr.bf16.mxu0 %v6586_v2 }
  0x33   : > { %5769 = vmatpush3.bf16.msra.mxu1 %v6368_v33 }
  0x34   : > { %5763 = vmatmul.mubr.msk.bf16.vlgmr.msra.gmra.mrb[8].mxu0 %vm572_vm4, %v827_v34  ;;  %5782 = vmatprep.subr.bf16.mxu1 %v6586_v2 }
  0x35   : > { %5775 = vmatpush3.bf16.msra.mxu0 %v6371_v35  ;;  %5778 = vmatprep.mubr.msk.bf16.mxu0 %vm6587_vm1, %v6586_v2 }
  0x36   : > { %5771 = vmatmul.mubr.msk.bf16.vlgmr.msra.gmra.mrb[8].mxu1 %vm572_vm4, %v898_v36  ;;  %5776 = vmatprep.subr.bf16.mxu0 %v6586_v2 }
  0x37   : > { %5783 = vmatpush3.bf16.msra.mxu1 %v6374_v37  ;;  %5786 = vmatprep.mubr.msk.bf16.mxu1 %vm6587_vm1, %v6586_v2 }
  0x38   : > { %5784 = vmatprep.subr.bf16.mxu1 %v6586_v2 }
  0x39   : > { %5777 = vmatpush3.bf16.msra.mxu0 %v6375_v38  ;;  %v5328_v38 = vld [vmem:[%s7438_s2] ss:$0 sm:$0xff] }
  0x3a   : > { %5790 = vmatprep.subr.bf16.mxu0 %v6586_v2 }
  0x3b   : > { %5785 = vmatpush3.bf16.msra.mxu1 %v6376_v43 }
  0x3c   : > { %5779 = vmatmul.mubr.msk.bf16.vlgmr.msra.gmra.mrb[12].mxu0 %vm572_vm4, %v970_v44  ;;  %5798 = vmatprep.subr.bf16.mxu1 %v6586_v2 }
  0x3d   : > { %5791 = vmatpush3.bf16.msra.mxu0 %v6379_v45  ;;  %5794 = vmatprep.mubr.msk.bf16.mxu0 %vm6587_vm1, %v6586_v2 }
  0x3e   : > { %5787 = vmatmul.mubr.msk.bf16.vlgmr.msra.gmra.mrb[12].mxu1 %vm572_vm4, %v1041_v46  ;;  %5792 = vmatprep.subr.bf16.mxu0 %v6586_v2 }
  0x3f   : > { %5802 = vmatprep.mubr.msk.bf16.mxu1 %vm6587_vm1, %v6586_v2  ;;  %5799 = vmatpush3.bf16.msra.mxu1 %v6385_v51 }
  0x40   : > { %5800 = vmatprep.subr.bf16.mxu1 %v6586_v2 }
  0x41   : > { %5793 = vmatpush3.bf16.msra.mxu0 %v6382_v49 }
  0x42   : > { %5870 = vmatprep.subr.mxu0 %v1865_v22 }
  0x43   : > { %5801 = vmatpush3.bf16.msra.mxu1 %v6386_v52  ;;  %v6389_v52 = vld [vmem:[%s7439_s3] sm:$0xff]  }
  0x44   : > { %5795 = vmatmul.mubr.msk.bf16.vlgmr.msra.gmra.mrb[16].mxu0 %vm572_vm4, %v1112_v50  ;;  %5806 = vmatprep.subr.bf16.mxu1 %v6586_v2 }
  0x45   : > { %5871 = vmatpush3.msra.mxu0 %v1865_v22 }
  0x46   : > { %5875 = vmatprep.subr.bf16.mxu0 %v6586_v2 }
  0xf7   : > { %v610_v53 = vpop.f32.mrb[0].mxu0 }
  0xf8   : > { %v5732_v54 = vpop.f32.mrb[1].mxu0 }
  0xf9   : > { %v666_v55 = vpop.f32.mrb[0].mxu1  ;;  %v613_v56 = vpop.f32.mrb[2].mxu0  ;;  %v6390_v54 = vld [vmem:[%s7439_s3 + $0x8] sm:$0xff]  }
  0xfa   : > { %v667_v57 = vadd.f32 %v666_v55, %v610_v53  ;;  %v5740_v58 = vpop.f32.mrb[1].mxu1  ;;  %v5733_v59 = vpop.f32.mrb[3].mxu0 }
  0xfb   : > { %v669_v60 = vpop.f32.mrb[2].mxu1  ;;  %v6394_v59 = vld [vmem:[%s7439_s3 + $0x28] sm:$0xff]  }
  0xfc   : > { %v670_v61 = vadd.f32 %v669_v60, %v613_v56  ;;  %v5741_v62 = vpop.f32.mrb[3].mxu1 }
  0xfd   : > { %v6397_v62 = vld [vmem:[%s7439_s3 + $0x30] sm:$0xff]  }
  0xff   : > { %v735_v63 = vpop.f32.mrb[4].mxu0 }
 0x100   : > { %v742_v0 = vadd.f32 %v735_v63, %v667_v57  ;;  %v5748_v1 = vpop.f32.mrb[5].mxu0  ;;  %v6393_v57 = vld [vmem:[%s7439_s3 + $0x20] sm:$0xff]  }
 0x101   : > { %v738_v3 = vpop.f32.mrb[6].mxu0  ;;  %v806_v4 = vpop.f32.mrb[4].mxu1 }
 0x102   : > { %v743_v5 = vadd.f32 %v738_v3, %v670_v61  ;;  %v813_v6 = vadd.f32 %v806_v4, %v742_v0  ;;  %v5749_v7 = vpop.f32.mrb[7].mxu0  ;;  %v5756_v8 = vpop.f32.mrb[5].mxu1  ;;  %v6398_v0 = vld [vmem:[%s7439_s3 + $0x38] sm:$0xff]   ;;  %v6401_v4 = vld [vmem:[%s7439_s3 + $0x40] sm:$0xff]  }
 0x103   : > { %v809_v9 = vpop.f32.mrb[6].mxu1 }
 0x104   : > { %v814_v10 = vadd.f32 %v809_v9, %v743_v5  ;;  %v5757_v11 = vpop.f32.mrb[7].mxu1  ;;  %v6405_v9 = vld [vmem:[%s7439_s3 + $0x50] sm:$0xff]  }
 0x105   : > { %v6406_v11 = vld [vmem:[%s7439_s3 + $0x58] sm:$0xff]  }
 0x107   : > { %v877_v12 = vpop.f32.mrb[8].mxu0 }
 0x108   : > { %v884_v13 = vadd.f32 %v877_v12, %v813_v6  ;;  %v5764_v14 = vpop.f32.mrb[9].mxu0  ;;  %v6402_v6 = vld [vmem:[%s7439_s3 + $0x48] sm:$0xff]  }
 0x109   : > { %v880_v15 = vpop.f32.mrb[10].mxu0  ;;  %v948_v16 = vpop.f32.mrb[8].mxu1  ;;  %v6409_v14 = vld [vmem:[%s7439_s3 + $0x60] sm:$0xff]  }
 0x10a   : > { %v885_v17 = vadd.f32 %v880_v15, %v814_v10  ;;  %v955_v18 = vadd.f32 %v948_v16, %v884_v13  ;;  %v5765_v19 = vpop.f32.mrb[11].mxu0  ;;  %v5772_v20 = vpop.f32.mrb[9].mxu1  ;;  %v6410_v16 = vld [vmem:[%s7439_s3 + $0x68] sm:$0xff]  }
 0x10b   : > { %v951_v21 = vpop.f32.mrb[10].mxu1  ;;  %v6413_v19 = vld [vmem:[%s7439_s3 + $0x70] sm:$0xff]  }
 0x10c   : > { %v956_v23 = vadd.f32 %v951_v21, %v885_v17  ;;  %v5773_v24 = vpop.f32.mrb[11].mxu1  ;;  %v6414_v21 = vld [vmem:[%s7439_s3 + $0x78] sm:$0xff]  }
 0x10d   : > { %v6417_v24 = vld [vmem:[%s7439_s3 + $0x80] sm:$0xff]  }
 0x10f   : > { %v1020_v25 = vpop.f32.mrb[12].mxu0 }
 0x110   : > { %v1027_v26 = vadd.f32 %v1020_v25, %v955_v18  ;;  %v5780_v27 = vpop.f32.mrb[13].mxu0 }
 0x111   : > { %v1023_v28 = vpop.f32.mrb[14].mxu0  ;;  %v1091_v29 = vpop.f32.mrb[12].mxu1 }
 0x112   : > { %v1028_v30 = vadd.f32 %v1023_v28, %v956_v23  ;;  %v1098_v31 = vadd.f32 %v1091_v29, %v1027_v26  ;;  %v5781_v32 = vpop.f32.mrb[15].mxu0  ;;  %v5788_v33 = vpop.f32.mrb[13].mxu1  ;;  %v6418_v26 = vld [vmem:[%s7439_s3 + $0x88] sm:$0xff]  }
 0x113   : > { %v1094_v34 = vpop.f32.mrb[14].mxu1 }
 0x114   : > { %v1099_v35 = vadd.f32 %v1094_v34, %v1028_v30  ;;  %v5789_v36 = vpop.f32.mrb[15].mxu1 }
 0x115   : > { %v6421_v36 = vld [vmem:[%s7439_s3 + $0xa0] sm:$0xff]  }
 0x117   : > { %v1162_v37 = vpop.f32.mrb[16].mxu0 }
 0x118   : > { %v1169_v39 = vadd.f32 %v1162_v37, %v1098_v31  ;;  %v5796_v40 = vpop.f32.mrb[17].mxu0  ;;  %v6422_v37 = vld [vmem:[%s7439_s3 + $0xa8] sm:$0xff]  }
 0x119   : > { %v1165_v41 = vpop.f32.mrb[18].mxu0 }
 0x11a   : > { %v6818_v42 = vadd.f32 %v5328_v38, %v1169_v39  ;;  %v1170_v43 = vadd.f32 %v1165_v41, %v1099_v35  ;;  %v5797_v44 = vpop.f32.mrb[19].mxu0 }
 0x11c   : > { %v1216_v45 = vmax.f32 %v6818_v42, 0.0  ;;  %v6821_v46 = vadd.f32 %v5328_v38, %v1170_v43  ;;  %v5421_v38 = vld [vmem:[%s7440_s4 + $0x8] sm:$0xff] }
 0x11e   : > { %v1220_v47 = vcombine.high %v1216_v45, %v1216_v45  ;;  %1224 = vst.msk [vmem:[#allocation2 + $0x9] sm:$0xf] %vm529_vm3, %v1216_v45  ;;  %v1217_v48 = vmax.f32 %v6821_v46, 0.0 }
 0x120   : > { %1225 = vst.msk [vmem:[#allocation2 + $0x11] sm:$0xf] %vm529_vm3, %v1220_v47  ;;  %v1221_v49 = vcombine.high %v1217_v48, %v1217_v48  ;;  %1226 = vst.msk [vmem:[#allocation2 + $0x19] sm:$0xf] %vm529_vm3, %v1217_v48 }
 0x122   : > { %1227 = vst.msk [vmem:[#allocation2 + $0x21] sm:$0xf] %vm529_vm3, %v1221_v49 }
 0x125   : > { %v6387_v50 = vld [vmem:[#allocation2 + $0x1] ss:$8 sps:$4 sm:$0xff]  }
 0x126   : > { %v6391_v56 = vld [vmem:[#allocation2] ss:$8 sps:$4 sm:$0xff]  }
 0x127   : > { %v6388_v51 = vld [vmem:[#allocation2 + $0x11] ss:$8 sps:$4 sm:$0xff]   ;;  %v6395_v61 = vld [vmem:[#allocation2 + $0x2] ss:$8 sps:$4 sm:$0xff]  }
 0x128   : > { %v1253_v53 = vpack.c.bf16 %v6388_v51, %v6387_v50  ;;  %v6392_v55 = vld [vmem:[#allocation2 + $0x10] ss:$8 sps:$4 sm:$0xff]  }
 0x129   : > { %v1240_v58 = vpack.c.bf16 %v6392_v55, %v6391_v56  ;;  %v6396_v60 = vld [vmem:[#allocation2 + $0x12] ss:$8 sps:$4 sm:$0xff]   ;;  %v6412_v17 = vld [vmem:[#allocation2 + $0x20] ss:$8 sps:$4 sm:$0xff]  }
 0x12a   : > { %5803 = vmatmul.mubr.msk.bf16.vlgmr.msra.gmra.mrb[16].mxu1 %vm572_vm4, %v1253_v53  ;;  %v1378_v63 = vpack.c.bf16 %v6396_v60, %v6395_v61  ;;  %v6400_v1 = vld [vmem:[#allocation2 + $0x18] ss:$8 sps:$4 sm:$0xff]   ;;  %v6399_v3 = vld [vmem:[#allocation2 + $0x8] ss:$8 sps:$4 sm:$0xff]  }
 0x12b   : > { %5807 = vmatpush3.bf16.msra.mxu1 %v6389_v52  ;;  %5810 = vmatprep.mubr.msk.bf16.mxu1 %vm6587_vm1, %v6586_v2  ;;  %v1449_v5 = vpack.c.bf16 %v6400_v1, %v6399_v3  ;;  %v6404_v7 = vld [vmem:[#allocation2 + $0x19] ss:$8 sps:$4 sm:$0xff]   ;;  %v6403_v8 = vld [vmem:[#allocation2 + $0x9] ss:$8 sps:$4 sm:$0xff]  }
 0x12c   : > { %5808 = vmatprep.subr.bf16.mxu1 %v6586_v2  ;;  %v1520_v10 = vpack.c.bf16 %v6404_v7, %v6403_v8  ;;  %v6408_v12 = vld [vmem:[#allocation2 + $0x1a] ss:$8 sps:$4 sm:$0xff]   ;;  %v6407_v13 = vld [vmem:[#allocation2 + $0xa] ss:$8 sps:$4 sm:$0xff]  }
 0x12d   : > { %v1591_v15 = vpack.c.bf16 %v6408_v12, %v6407_v13  ;;  %v6411_v18 = vld [vmem:[#allocation2 + $0x10] ss:$8 sps:$4 sm:$0xff]   ;;  %v6416_v22 = vld [vmem:[#allocation2 + $0x21] ss:$8 sps:$4 sm:$0xff]  }
 0x12e   : > { %v1662_v20 = vpack.c.bf16 %v6412_v17, %v6411_v18  ;;  %v6415_v23 = vld [vmem:[#allocation2 + $0x11] ss:$8 sps:$4 sm:$0xff]   ;;  %v6420_v27 = vld [vmem:[#allocation2 + $0x22] ss:$8 sps:$4 sm:$0xff]  }
 0x12f   : > { %5809 = vmatpush3.bf16.msra.mxu1 %v6390_v54  ;;  %v1733_v25 = vpack.c.bf16 %v6416_v22, %v6415_v23  ;;  %v6419_v28 = vld [vmem:[#allocation2 + $0x12] ss:$8 sps:$4 sm:$0xff]   ;;  %v6434_v61 = vld [vmem:[%s7439_s3 + $0xc8] sm:$0xff]  }
 0x130   : > { %5814 = vmatprep.subr.bf16.mxu1 %v6586_v2  ;;  %v1804_v29 = vpack.c.bf16 %v6420_v27, %v6419_v28  ;;  %v6426_v51 = vld [vmem:[%s7439_s3 + $0x98] sm:$0xff]   ;;  %v6429_v54 = vld [vmem:[%s7439_s3 + $0xb0] sm:$0xff]   ;;  %v6442_v8 = vld [vmem:[%s7439_s3 + $0xe8] sm:$0xff]  }
 0x131   : > { %v6430_v56 = vld [vmem:[%s7439_s3 + $0xb8] sm:$0xff]   ;;  %v6450_v18 = vld [vmem:[%s7439_s3 + $0x108] sm:$0xff]   ;;  %v2723_v27 = vld [vmem:[%s7441_s5] sm:$0xff] }
 0x132   : > { %v6438_v3 = vld [vmem:[%s7439_s3 + $0xd8] sm:$0xff]   ;;  %v2724_v28 = vld [vmem:[%s7441_s5 + $0x8] sm:$0xff] }
 0x133   : > { %v6446_v13 = vld [vmem:[%s7439_s3 + $0xf8] sm:$0xff]  }
 0x134   : > { %v6454_v23 = vld [vmem:[%s7439_s3 + $0x118] sm:$0xff]  }
 0x136   : > { %5811 = vmatmul.mubr.msk.bf16.vlgmr.msra.gmra.mrb[16].mxu1 %vm572_vm4, %v1240_v58 }
 0x137   : > { %5815 = vmatpush3.bf16.msra.mxu1 %v6393_v57  ;;  %5818 = vmatprep.mubr.msk.bf16.mxu1 %vm6587_vm1, %v6586_v2 }
 0x138   : > { %5816 = vmatprep.subr.bf16.mxu1 %v6586_v2 }
 0x13b   : > { %5817 = vmatpush3.bf16.msra.mxu1 %v6394_v59  ;;  %v6433_v59 = vld [vmem:[%s7439_s3 + $0xc0] sm:$0xff]  }
 0x13c   : > { %5822 = vmatprep.subr.bf16.mxu1 %v6586_v2 }
 0x142   : > { %5819 = vmatmul.mubr.msk.bf16.vlgmr.msra.gmra.mrb[16].mxu1 %vm572_vm4, %v1378_v63 }
 0x143   : > { %5823 = vmatpush3.bf16.msra.mxu1 %v6397_v62  ;;  %5826 = vmatprep.mubr.msk.bf16.mxu1 %vm6587_vm1, %v6586_v2 }
 0x144   : > { %5824 = vmatprep.subr.bf16.mxu1 %v6586_v2 }
 0x147   : > { %5825 = vmatpush3.bf16.msra.mxu1 %v6398_v0  ;;  %v6437_v0 = vld [vmem:[%s7439_s3 + $0xd0] sm:$0xff]  }
 0x148   : > { %5830 = vmatprep.subr.bf16.mxu1 %v6586_v2 }
 0x14e   : > { %5827 = vmatmul.mubr.msk.bf16.vlgmr.msra.gmra.mrb[16].mxu1 %vm572_vm4, %v1449_v5 }
 0x14f   : > { %5831 = vmatpush3.bf16.msra.mxu1 %v6401_v4  ;;  %5834 = vmatprep.mubr.msk.bf16.mxu1 %vm6587_vm1, %v6586_v2 }
 0x150   : > { %5832 = vmatprep.subr.bf16.mxu1 %v6586_v2 }
 0x153   : > { %5833 = vmatpush3.bf16.msra.mxu1 %v6402_v6  ;;  %v6441_v6 = vld [vmem:[%s7439_s3 + $0xe0] sm:$0xff]  }
 0x154   : > { %5838 = vmatprep.subr.bf16.mxu1 %v6586_v2 }
 0x15a   : > { %5835 = vmatmul.mubr.msk.bf16.vlgmr.msra.gmra.mrb[16].mxu1 %vm572_vm4, %v1520_v10 }
 0x15b   : > { %5839 = vmatpush3.bf16.msra.mxu1 %v6405_v9  ;;  %5842 = vmatprep.mubr.msk.bf16.mxu1 %vm6587_vm1, %v6586_v2 }
 0x15c   : > { %5840 = vmatprep.subr.bf16.mxu1 %v6586_v2 }
 0x15f   : > { %5841 = vmatpush3.bf16.msra.mxu1 %v6406_v11  ;;  %v6445_v11 = vld [vmem:[%s7439_s3 + $0xf0] sm:$0xff]  }
 0x160   : > { %5846 = vmatprep.subr.bf16.mxu1 %v6586_v2 }
 0x166   : > { %5843 = vmatmul.mubr.msk.bf16.vlgmr.msra.gmra.mrb[16].mxu1 %vm572_vm4, %v1591_v15 }
 0x167   : > { %5847 = vmatpush3.bf16.msra.mxu1 %v6409_v14  ;;  %5850 = vmatprep.mubr.msk.bf16.mxu1 %vm6587_vm1, %v6586_v2 }
 0x168   : > { %5848 = vmatprep.subr.bf16.mxu1 %v6586_v2 }
 0x16b   : > { %5849 = vmatpush3.bf16.msra.mxu1 %v6410_v16  ;;  %v6449_v16 = vld [vmem:[%s7439_s3 + $0x100] sm:$0xff]  }
 0x16c   : > { %5854 = vmatprep.subr.bf16.mxu1 %v6586_v2 }
 0x172   : > { %5851 = vmatmul.mubr.msk.bf16.vlgmr.msra.gmra.mrb[16].mxu1 %vm572_vm4, %v1662_v20 }
 0x173   : > { %5855 = vmatpush3.bf16.msra.mxu1 %v6413_v19  ;;  %5858 = vmatprep.mubr.msk.bf16.mxu1 %vm6587_vm1, %v6586_v2 }
 0x174   : > { %5856 = vmatprep.subr.bf16.mxu1 %v6586_v2 }
 0x177   : > { %5857 = vmatpush3.bf16.msra.mxu1 %v6414_v21  ;;  %v6453_v21 = vld [vmem:[%s7439_s3 + $0x110] sm:$0xff]  }
 0x178   : > { %5862 = vmatprep.subr.bf16.mxu1 %v6586_v2 }
 0x17e   : > { %5859 = vmatmul.mubr.msk.bf16.vlgmr.msra.gmra.mrb[16].mxu1 %vm572_vm4, %v1733_v25 }
 0x17f   : > { %5863 = vmatpush3.bf16.msra.mxu1 %v6417_v24  ;;  %5866 = vmatprep.mubr.msk.bf16.mxu1 %vm6587_vm1, %v6586_v2 }
 0x180   : > { %5864 = vmatprep.subr.bf16.mxu1 %v6586_v2 }
 0x183   : > { %5865 = vmatpush3.bf16.msra.mxu1 %v6418_v26 }
 0x184   : > { %5947 = vmatprep.subr.mxu1 %v5421_v38 }
 0x18a   : > { %5867 = vmatmul.mubr.msk.bf16.vlgmr.msra.gmra.mrb[16].mxu1 %vm572_vm4, %v1804_v29  ;;  %v6185_v29 = vpack.c.bf16 %v2724_v28, %v2723_v27 }
 0x18b   : > { %5948 = vmatpush3.msra.mxu1 %v5421_v38 }
 0x18c   : > { %6186 = vmatprep.subr.bf16.mxu1 %v6185_v29 }
 0x25d   : > { %v1854_v30 = vpop.f32.mrb[16].mxu1 }
 0x25e   : > { %v1863_v31 = vmax.f32 %v1854_v30, 0.0  ;;  %v5868_v32 = vpop.f32.mrb[17].mxu1 }
 0x25f   : > { %v1857_v33 = vpop.f32.mrb[18].mxu1 }
 0x260   : > { %v1864_v34 = vmax.f32 %v1857_v33, 0.0  ;;  %v5869_v35 = vpop.f32.mrb[19].mxu1  ;;  %5872 = vmatprep.mubr.msk.f32.mxu0 %vm1866_vm5, %v1863_v31 }
 0x262   : > { %5873 = vmatmul.mubr.msk.f32.vlgmr.msra.gmra.mrb[20].mxu0 %vm1866_vm5, %v1864_v34 }
 0x263   : > { %5879 = vmatprep.mubr.msk.bf16.mxu0 %vm6587_vm1, %v6586_v2  ;;  %5876 = vmatpush3.bf16.msra.mxu0 %v6421_v36  ;;  %v2725_v36 = vld [vmem:[%s7441_s5 + $0x10] sm:$0xff] }
 0x264   : > { %5877 = vmatprep.subr.bf16.mxu0 %v6586_v2 }
 0x267   : > { %5878 = vmatpush3.bf16.msra.mxu0 %v6422_v37  ;;  %v2726_v37 = vld [vmem:[%s7441_s5 + $0x18] sm:$0xff] }
 0x268   : > { %5883 = vmatprep.subr.bf16.mxu0 %v6586_v2  ;;  %v6189_v38 = vpack.c.bf16 %v2726_v37, %v2725_v36 }
 0x335   : > { %v5874_v39 = vpop.f32.mrb[20].mxu0 }
 0x336   : > { %v6932_v40 = vadd.f32 %v5874_v39, %v6821_v46  ;;  %v1939_v41 = vpop.f32.mrb[21].mxu0  ;;  %v2815_v39 = vld [vmem:[%s7443_s7] sm:$0xff] }
 0x337   : > { %v6935_v43 = vadd.f32 %v1939_v41, %v6818_v42  ;;  %v6425_v42 = vld [vmem:[%s7439_s3 + $0x90] sm:$0xff]   ;;  %v2816_v41 = vld [vmem:[%s7443_s7 + $0x8] sm:$0xff] }
 0x338   : > { %v1988_v44 = vmax.f32 %v6932_v40, 0.0 }
 0x339   : > { %v1987_v45 = vmax.f32 %v6935_v43, 0.0 }
 0x33a   : > { %v1992_v47 = vcombine.high %v1988_v44, %v1988_v44  ;;  %1997 = vst.msk [vmem:[#allocation2 + $0x19] sm:$0xf] %vm529_vm3, %v1988_v44  ;;  %v6193_v44 = vpack.c.bf16 %v2816_v41, %v2815_v39  ;;  %v3083_v39 = vld [vmem:[%s7445_s9 + $0x4] sm:$0xf]  ;;  %v3082_v41 = vld [vmem:[%s7445_s9] sm:$0xf] }
 0x33b   : > { %v1991_v48 = vcombine.high %v1987_v45, %v1987_v45  ;;  %1995 = vst.msk [vmem:[#allocation2 + $0x9] sm:$0xf] %vm529_vm3, %v1987_v45 }
 0x33c   : > { %1998 = vst.msk [vmem:[#allocation2 + $0x21] sm:$0xf] %vm529_vm3, %v1992_v47 }
 0x33d   : > { %1996 = vst.msk [vmem:[#allocation2 + $0x11] sm:$0xf] %vm529_vm3, %v1991_v48 }
 0x342   : > { %v6423_v46 = vld [vmem:[#allocation2 + $0x1] ss:$8 sps:$4 sm:$0xff]  }
 0x343   : > { %v6427_v53 = vld [vmem:[#allocation2] ss:$8 sps:$4 sm:$0xff]  }
 0x344   : > { %v6424_v49 = vld [vmem:[#allocation2 + $0x11] ss:$8 sps:$4 sm:$0xff]   ;;  %v6431_v58 = vld [vmem:[#allocation2 + $0x2] ss:$8 sps:$4 sm:$0xff]  }
 0x345   : > { %v2024_v50 = vpack.c.bf16 %v6424_v49, %v6423_v46  ;;  %v6428_v52 = vld [vmem:[#allocation2 + $0x10] ss:$8 sps:$4 sm:$0xff]   ;;  %v6448_v15 = vld [vmem:[#allocation2 + $0x20] ss:$8 sps:$4 sm:$0xff]  }
 0x346   : > { %v2011_v55 = vpack.c.bf16 %v6428_v52, %v6427_v53  ;;  %v6432_v57 = vld [vmem:[#allocation2 + $0x12] ss:$8 sps:$4 sm:$0xff]   ;;  %v6452_v20 = vld [vmem:[#allocation2 + $0x21] ss:$8 sps:$4 sm:$0xff]  }
 0x347   : > { %5880 = vmatmul.mubr.msk.bf16.vlgmr.msra.gmra.mrb[24].mxu0 %vm572_vm4, %v2024_v50  ;;  %v2149_v60 = vpack.c.bf16 %v6432_v57, %v6431_v58  ;;  %v6435_v62 = vld [vmem:[#allocation2 + $0x8] ss:$8 sps:$4 sm:$0xff]   ;;  %v6436_v63 = vld [vmem:[#allocation2 + $0x18] ss:$8 sps:$4 sm:$0xff]  }
 0x348   : > { %5884 = vmatpush3.bf16.msra.mxu0 %v6425_v42  ;;  %5887 = vmatprep.mubr.msk.bf16.mxu0 %vm6587_vm1, %v6586_v2  ;;  %v2220_v1 = vpack.c.bf16 %v6436_v63, %v6435_v62  ;;  %v6439_v4 = vld [vmem:[#allocation2 + $0x9] ss:$8 sps:$4 sm:$0xff]   ;;  %v6440_v5 = vld [vmem:[#allocation2 + $0x19] ss:$8 sps:$4 sm:$0xff]   ;;  %v5424_v50 = vld [vmem:[%s7442_s6] ss:$0 sm:$0xff] }
 0x349   : > { %5885 = vmatprep.subr.bf16.mxu0 %v6586_v2  ;;  %v2291_v7 = vpack.c.bf16 %v6440_v5, %v6439_v4  ;;  %v6443_v9 = vld [vmem:[#allocation2 + $0xa] ss:$8 sps:$4 sm:$0xff]   ;;  %v6444_v10 = vld [vmem:[#allocation2 + $0x1a] ss:$8 sps:$4 sm:$0xff]   ;;  %v5431_v63 = vld [vmem:[%s7444_s8] ss:$0 sm:$0xff] }
 0x34a   : > { %v2362_v12 = vpack.c.bf16 %v6444_v10, %v6443_v9  ;;  %v6447_v14 = vld [vmem:[#allocation2 + $0x10] ss:$8 sps:$4 sm:$0xff]   ;;  %v6456_v25 = vld [vmem:[#allocation2 + $0x22] ss:$8 sps:$4 sm:$0xff]  }
 0x34b   : > { %v2433_v17 = vpack.c.bf16 %v6448_v15, %v6447_v14  ;;  %v6451_v19 = vld [vmem:[#allocation2 + $0x11] ss:$8 sps:$4 sm:$0xff]  }
 0x34c   : > { %5886 = vmatpush3.bf16.msra.mxu0 %v6426_v51  ;;  %v2504_v22 = vpack.c.bf16 %v6452_v20, %v6451_v19  ;;  %v6455_v24 = vld [vmem:[#allocation2 + $0x12] ss:$8 sps:$4 sm:$0xff]  }
 0x34d   : > { %5891 = vmatprep.subr.bf16.mxu0 %v6586_v2  ;;  %v2575_v26 = vpack.c.bf16 %v6456_v25, %v6455_v24 }
 0x353   : > { %5888 = vmatmul.mubr.msk.bf16.vlgmr.msra.gmra.mrb[24].mxu0 %vm572_vm4, %v2011_v55 }
 0x354   : > { %5892 = vmatpush3.bf16.msra.mxu0 %v6429_v54  ;;  %5895 = vmatprep.mubr.msk.bf16.mxu0 %vm6587_vm1, %v6586_v2 }
 0x355   : > { %5893 = vmatprep.subr.bf16.mxu0 %v6586_v2 }
 0x358   : > { %5894 = vmatpush3.bf16.msra.mxu0 %v6430_v56 }
 0x359   : > { %5899 = vmatprep.subr.bf16.mxu0 %v6586_v2 }
 0x35f   : > { %5896 = vmatmul.mubr.msk.bf16.vlgmr.msra.gmra.mrb[24].mxu0 %vm572_vm4, %v2149_v60 }
 0x360   : > { %5900 = vmatpush3.bf16.msra.mxu0 %v6433_v59  ;;  %5903 = vmatprep.mubr.msk.bf16.mxu0 %vm6587_vm1, %v6586_v2 }
 0x361   : > { %5901 = vmatprep.subr.bf16.mxu0 %v6586_v2 }
 0x364   : > { %5902 = vmatpush3.bf16.msra.mxu0 %v6434_v61 }
 0x365   : > { %5907 = vmatprep.subr.bf16.mxu0 %v6586_v2 }
 0x36b   : > { %5904 = vmatmul.mubr.msk.bf16.vlgmr.msra.gmra.mrb[24].mxu0 %vm572_vm4, %v2220_v1 }
 0x36c   : > { %5908 = vmatpush3.bf16.msra.mxu0 %v6437_v0  ;;  %5911 = vmatprep.mubr.msk.bf16.mxu0 %vm6587_vm1, %v6586_v2 }
 0x36d   : > { %5909 = vmatprep.subr.bf16.mxu0 %v6586_v2 }
 0x370   : > { %5910 = vmatpush3.bf16.msra.mxu0 %v6438_v3 }
 0x371   : > { %5915 = vmatprep.subr.bf16.mxu0 %v6586_v2 }
 0x377   : > { %5912 = vmatmul.mubr.msk.bf16.vlgmr.msra.gmra.mrb[24].mxu0 %vm572_vm4, %v2291_v7  ;;  %v2925_v7 = vlaneseq }
 0x378   : > { %5916 = vmatpush3.bf16.msra.mxu0 %v6441_v6  ;;  %5919 = vmatprep.mubr.msk.bf16.mxu0 %vm6587_vm1, %v6586_v2 }
 0x379   : > { %5917 = vmatprep.subr.bf16.mxu0 %v6586_v2 }
 0x37c   : > { %5918 = vmatpush3.bf16.msra.mxu0 %v6442_v8  ;;  %v2926_v8 = vand.u32 127, %v2925_v7 }
 0x37d   : > { %5923 = vmatprep.subr.bf16.mxu0 %v6586_v2 }
 0x383   : > { %5920 = vmatmul.mubr.msk.bf16.vlgmr.msra.gmra.mrb[24].mxu0 %vm572_vm4, %v2362_v12 }
 0x384   : > { %5924 = vmatpush3.bf16.msra.mxu0 %v6445_v11  ;;  %5927 = vmatprep.mubr.msk.bf16.mxu0 %vm6587_vm1, %v6586_v2 }
 0x385   : > { %5925 = vmatprep.subr.bf16.mxu0 %v6586_v2 }
 0x388   : > { %5926 = vmatpush3.bf16.msra.mxu0 %v6446_v13 }
 0x389   : > { %5931 = vmatprep.subr.bf16.mxu0 %v6586_v2 }
 0x38f   : > { %5928 = vmatmul.mubr.msk.bf16.vlgmr.msra.gmra.mrb[24].mxu0 %vm572_vm4, %v2433_v17 }
 0x390   : > { %5932 = vmatpush3.bf16.msra.mxu0 %v6449_v16  ;;  %5935 = vmatprep.mubr.msk.bf16.mxu0 %vm6587_vm1, %v6586_v2 }
 0x391   : > { %5933 = vmatprep.subr.bf16.mxu0 %v6586_v2 }
 0x394   : > { %5934 = vmatpush3.bf16.msra.mxu0 %v6450_v18 }
 0x395   : > { %5939 = vmatprep.subr.bf16.mxu0 %v6586_v2 }
 0x39b   : > { %5936 = vmatmul.mubr.msk.bf16.vlgmr.msra.gmra.mrb[24].mxu0 %vm572_vm4, %v2504_v22 }
 0x39c   : > { %5940 = vmatpush3.bf16.msra.mxu0 %v6453_v21  ;;  %5943 = vmatprep.mubr.msk.bf16.mxu0 %vm6587_vm1, %v6586_v2 }
 0x39d   : > { %5941 = vmatprep.subr.bf16.mxu0 %v6586_v2 }
 0x3a0   : > { %5942 = vmatpush3.bf16.msra.mxu0 %v6454_v23 }
 0x3a1   : > { %6195 = vmatprep.subr.msk.bf16.mxu0 %vm6194_vm6, %v6193_v44 }
 0x3a7   : > { %5944 = vmatmul.mubr.msk.bf16.vlgmr.msra.gmra.mrb[24].mxu0 %vm572_vm4, %v2575_v26 }
 0x3a9   : > { %6198 = vmatpush3.bf16.xpose.msk.msra.mxu0 %vm6194_vm6, %v6193_v44 }
 0x3aa   : > { %6200 = vmatprep.subr.bf16.mxu0 %v6193_v44 }
 0x47a   : > { %v2625_v30 = vpop.f32.mrb[24].mxu0 }
 0x47b   : > { %v2634_v31 = vmax.f32 %v2625_v30, 0.0  ;;  %v5945_v32 = vpop.f32.mrb[25].mxu0 }
 0x47c   : > { %v2628_v33 = vpop.f32.mrb[26].mxu0 }
 0x47d   : > { %v2635_v34 = vmax.f32 %v2628_v33, 0.0  ;;  %v5946_v35 = vpop.f32.mrb[27].mxu0  ;;  %5949 = vmatprep.mubr.msk.f32.mxu1 %vm1866_vm5, %v2634_v31 }
 0x47f   : > { %5950 = vmatmul.mubr.msk.f32.vlgmr.msra.gmra.mrb[20].mxu1 %vm1866_vm5, %v2635_v34 }
 0x480   : > { %6188 = vmatpush3.bf16.msra.mxu1 %v6185_v29 }
 0x481   : > { %6190 = vmatprep.subr.bf16.mxu1 %v6189_v38 }
 0x484   : > { %6192 = vmatpush3.bf16.msra.mxu1 %v6189_v38 }
 0x485   : > { %5977 = vmatprep.subr.bf16.mxu1 %v6586_v2 }
 0x552   : > { %v5951_v45 = vpop.f32.mrb[20].mxu1 }
 0x553   : > { %v2720_v47 = vadd.f32 %v5951_v45, %v6932_v40  ;;  %v2710_v48 = vpop.f32.mrb[21].mxu1  ;;  %v3175_v45 = vsel %vm3126_vm15, %v3082_v41, 0 }
 0x554   : > { %v2719_v46 = vadd.f32 %v2710_v48, %v6935_v43 }
 0x555   : > { %v2722_v42 = vmax.f32 %v2720_v47, 0.0 }
 0x556   : > { %v2721_v49 = vmax.f32 %v2719_v46, 0.0 }
 0x558   : > { %5960 = vmatprep.mubr.msk.f32.mxu1 %vm572_vm4, %v2721_v49 }
 0x559   : > { %5961 = vmatmul.mubr.msk.f32.vlgmr.msra.gmra.mrb[22].mxu1 %vm572_vm4, %v2722_v42 }
 0x55a   : > { %5979 = vmatprep.mubr.msk.bf16.mxu1 %vm6587_vm1, %v6586_v2 }
 0x62c   : > { %v5962_v51 = vpop.f32.mrb[22].mxu1 }
 0x62d   : > { %v2806_v52 = vpop.f32.mrb[23].mxu1  ;;  %v7063_v53 = vadd.f32 %v5962_v51, %v5424_v50 }
 0x62e   : > { %v7065_v40 = vadd.f32 %v5424_v50, %v2806_v52 }
 0x62f   : > { %v2818_v55 = vmul.f32 %v7063_v53, %v7063_v53 }
 0x630   : > { %5967 = vmatprep.mubr.msk.f32.mxu0 %vm1866_vm5, %v7065_v40  ;;  %v2817_v43 = vmul.f32 %v7065_v40, %v7065_v40 }
 0x631   : > { %5968 = vmatmul.mubr.msk.f32.vlgmr.msra.gmra.mrb[22].mxu0 %vm1866_vm5, %v7063_v53  ;;  %v2822_v56 = vsel %vm1866_vm5, %v2818_v55, 0.0  ;;  %v3084_v55 = vld [vmem:[%s7445_s9 + $0x8] sm:$0xf] }
 0x632   : > { %v2819_v54 = vsel %vm1866_vm5, %v2817_v43, 0.0  ;;  %6202 = vmatpush3.bf16.msra.mxu0 %v6193_v44  ;;  %v3128_v44 = vsel %vm3126_vm15, %v3083_v39, 0 }
 0x633   : > { %2820 = vadd.xlane.f32.xlu0 %v2819_v54  ;;  %5983 = vmatprep.subr.bf16.mxu0 %v6586_v2 }
 0x634   : > { %5978 = vmatpush3.bf16.msra.mxu1 %v3128_v44  ;;  %v3057_v44 = vld [vmem:[#allocation4] sm:$0x1] }
 0x635   : > { %5989 = vmatprep.subr.bf16.mxu1 %v6586_v2 }
 0x637   : > { %2823 = vadd.xlane.f32.xlu0 %v2822_v56 }
 0x6c0   : > { %v2821_v57 = vpop.xlane.xlu0 %2820 }
 0x6c4   : > { %v2824_v62 = vpop.xlane.xlu0 %2823 }
 0x704   : > { %v5969_v58 = vpop.f32.mrb[22].mxu0 }
 0x705   : > { %v2913_v59 = vmul.f32 2.0, %v5969_v58  ;;  %v2903_v60 = vpop.f32.mrb[23].mxu0 }
 0x706   : > { %v2912_v61 = vmul.f32 2.0, %v2903_v60 }
 0x707   : > { %v2915_v0 = vsub.f32 %v2824_v62, %v2913_v59 }
 0x708   : > { %v2914_v1 = vsub.f32 %v2821_v57, %v2912_v61 }
 0x709   : > { %v2924_v5 = vadd.f32 %v5431_v63, %v2915_v0  ;;  %v3086_v0 = vld [vmem:[%s7445_s9 + $0x10] sm:$0xf] }
 0x70a   : > { %v2923_v3 = vadd.f32 %v5431_v63, %v2914_v1  ;;  %v3359_v7 = vsel %vm3126_vm15, %v3086_v0, 0 }
 0x70b   : > { %v2931_v6 = vsel %vm2927_vm7, %v2924_v5, inf }
 0x70c   : > { %v2928_v4 = vsel %vm2927_vm7, %v2923_v3, inf }
 0x70d   : > { %2929 = vmin.xlane.f32.xlu1 %v2928_v4 }
 0x711   : > { %2932 = vmin.xlane.f32.xlu1 %v2931_v6 }
 0x79a   : > { %v2930_v9 = vpop.xlane.xlu1 %2929 }
 0x79b   : > { %vm2934_vm8 = vcmp.le.f32.partialorder %v2923_v3, %v2930_v9  ;;  %v3087_v3 = vld [vmem:[%s7445_s9 + $0x14] sm:$0xf] }
 0x79c   : > { %v2936_v10 = vsel %vm2934_vm8, %v2926_v8, 16  ;;  %v3421_v9 = vsel %vm3126_vm15, %v3087_v3, 0 }
 0x79d   : > { %v2938_v11 = vsel %vm2927_vm7, %v2936_v10, 2147483647 }
 0x79e   : > { %v2933_v12 = vpop.xlane.xlu1 %2932  ;;  %v2940_v13 = vshra.s32 %v2938_v11, 16  ;;  %v2939_v19 = vand.u32 65535, %v2938_v11 }
 0x79f   : > { %vm2935_vm9 = vcmp.le.f32.partialorder %v2924_v5, %v2933_v12 }
 0x7a0   : > { %v2937_v14 = vsel %vm2935_vm9, %v2926_v8, 16  ;;  %v2942_v15 = vcvt.s32.f32 %v2940_v13  ;;  %v2941_v21 = vcvt.s32.f32 %v2939_v19 }
 0x7a1   : > { %v2953_v16 = vsel %vm2927_vm7, %v2937_v14, 2147483647  ;;  %v3088_v14 = vld [vmem:[%s7445_s9 + $0x18] sm:$0xf] }
 0x7a2   : > { %2943 = vmin.xlane.f32.xlu0 %v2942_v15  ;;  %v2955_v17 = vshra.s32 %v2953_v16, 16  ;;  %v2954_v22 = vand.u32 65535, %v2953_v16 }
 0x7a4   : > { %v2957_v18 = vcvt.s32.f32 %v2955_v17  ;;  %v2956_v25 = vcvt.s32.f32 %v2954_v22  ;;  %v3484_v17 = vsel %vm3126_vm15, %v3088_v14, 0  ;;  %v4347_v14 = vld [vmem:[%s7448_s12] sm:$0xff] }
 0x7a6   : > { %2958 = vmin.xlane.f32.xlu1 %v2957_v18 }
 0x82f   : > { %v2944_v20 = vpop.xlane.xlu0 %2943 }
 0x830   : > { %vm2945_vm10 = vcmp.eq.f32.partialorder %v2942_v15, %v2944_v20  ;;  %v2950_v27 = vcvt.f32.s32 %v2944_v20  ;;  %v3089_v15 = vld [vmem:[%s7445_s9 + $0x1c] sm:$0xf] }
 0x831   : > { %v2946_v23 = vsel %vm2945_vm10, %v2941_v21, inf  ;;  %v3546_v19 = vsel %vm3126_vm15, %v3089_v15, 0 }
 0x832   : > { %2947 = vmin.xlane.f32.xlu0 %v2946_v23  ;;  %v2951_v29 = vshll.u32 %v2950_v27, 16 }
 0x833   : > { %v2959_v24 = vpop.xlane.xlu1 %2958 }
 0x834   : > { %vm2960_vm11 = vcmp.eq.f32.partialorder %v2957_v18, %v2959_v24  ;;  %v2965_v30 = vcvt.f32.s32 %v2959_v24  ;;  %v3090_v24 = vld [vmem:[%s7445_s9 + $0x20] sm:$0xf] }
 0x835   : > { %v2961_v26 = vsel %vm2960_vm11, %v2956_v25, inf }
 0x836   : > { %2962 = vmin.xlane.f32.xlu1 %v2961_v26  ;;  %v2966_v34 = vshll.u32 %v2965_v30, 16  ;;  %v3608_v26 = vsel %vm3126_vm15, %v3090_v24, 0 }
 0x8bf   : > { %v2948_v28 = vpop.xlane.xlu0 %2947 }
 0x8c0   : > { %v2949_v31 = vcvt.f32.s32 %v2948_v28 }
 0x8c2   : > { %v2952_v32 = vadd.s32 %v2951_v29, %v2949_v31  ;;  %v6475_v31 = vld [vmem:[%s7447_s11 + $0x10] sm:$0xff]  }
 0x8c3   : > { %v2963_v33 = vpop.xlane.xlu1 %2962 }
 0x8c4   : > { %v2964_v35 = vcvt.f32.s32 %v2963_v33  ;;  %vm2968_vm13 = vcmp.eq.s32.totalorder %v2926_v8, %v2952_v32  ;;  %v6476_v32 = vld [vmem:[%s7447_s11 + $0x18] sm:$0xff]  }
 0x8c5   : > { %v5432_v36 = vsel %vm2968_vm13, 1.0, %v6586_v2 }
 0x8c6   : > { %v2967_v37 = vadd.s32 %v2966_v34, %v2964_v35  ;;  %5974 = vmatprep.mubr.msk.f32.mxu0 %vm2927_vm7, %v5432_v36 }
 0x8c8   : > { %vm2969_vm14 = vcmp.eq.s32.totalorder %v2926_v8, %v2967_v37 }
 0x8c9   : > { %v5433_v38 = vsel %vm2969_vm14, 1.0, %v6586_v2 }
 0x8ca   : > { %5975 = vmatmul.mubr.msk.f32.vlgmr.msra.gmra.mrb[28].mxu0 %vm2927_vm7, %v5433_v38 }
 0x8cb   : > { %5985 = vmatprep.mubr.msk.bf16.mxu0 %vm6587_vm1, %v6586_v2  ;;  %5984 = vmatpush3.bf16.msra.mxu0 %v3175_v45 }
 0x8cc   : > { %5995 = vmatprep.subr.bf16.mxu0 %v6586_v2 }
 0x99d   : > { %v5976_v47 = vpop.f32.mrb[28].mxu0 }
 0x99e   : > { %v3079_v48 = vcombine.high %v5976_v47, %v5976_v47  ;;  %3095 = vst.msk [vmem:[#allocation3 + $0x19] sm:$0xf] %vm3092_vm0, %v5976_v47  ;;  %v3046_v46 = vpop.f32.mrb[29].mxu0  ;;  %v3056_v49 = vsub.f32 %v5976_v47, %v7063_v53  ;;  %v3085_v53 = vld [vmem:[%s7445_s9 + $0xc] sm:$0xf] }
 0x99f   : > { %v3078_v42 = vcombine.high %v3046_v46, %v3046_v46  ;;  %3093 = vst.msk [vmem:[#allocation3 + $0x9] sm:$0xf] %vm3092_vm0, %v3046_v46  ;;  %v3055_v50 = vsub.f32 %v3046_v46, %v7065_v40  ;;  %v3235_v40 = vsel %vm3126_vm15, %v3084_v55, 0  ;;  %v3297_v62 = vsel %vm3126_vm15, %v3085_v53, 0 }
 0x9a0   : > { %3096 = vst.msk [vmem:[#allocation3 + $0x21] sm:$0xf] %vm3092_vm0, %v3079_v48  ;;  %v3059_v51 = vmul.f32 %v3056_v49, %v3056_v49 }
 0x9a1   : > { %3094 = vst.msk [vmem:[#allocation3 + $0x11] sm:$0xf] %vm3092_vm0, %v3078_v42  ;;  %v3058_v52 = vmul.f32 %v3055_v50, %v3055_v50 }
 0x9a2   : > { %v3063_v43 = vsel %vm1866_vm5, %v3059_v51, 0.0 }
 0x9a3   : > { %3064 = vadd.xlane.f32.xlu1 %v3063_v43  ;;  %v3060_v54 = vsel %vm1866_vm5, %v3058_v52, 0.0 }
 0x9a4   : > { %3061 = vadd.xlane.f32.xlu0 %v3060_v54 }
 0x9a6   : > { %v6457_v56 = vld [vmem:[#allocation3 + $0x1] ss:$8 sps:$4 sm:$0xff]  }
 0x9a7   : > { %v6459_v58 = vld [vmem:[#allocation3] ss:$8 sps:$4 sm:$0xff]  }
 0x9a8   : > { %v6458_v57 = vld [vmem:[#allocation3 + $0x11] ss:$8 sps:$4 sm:$0xff]   ;;  %v6461_v1 = vld [vmem:[#allocation3 + $0x2] ss:$8 sps:$4 sm:$0xff]  }
 0x9a9   : > { %v6460_v59 = vld [vmem:[#allocation3 + $0x10] ss:$8 sps:$4 sm:$0xff]   ;;  %v3122_v60 = vpack.c.bf16 %v6458_v57, %v6457_v56  ;;  %v6470_v21 = vld [vmem:[#allocation3 + $0x20] ss:$8 sps:$4 sm:$0xff]  }
 0x9aa   : > { %v3109_v61 = vpack.c.bf16 %v6460_v59, %v6459_v58  ;;  %v6462_v63 = vld [vmem:[#allocation3 + $0x12] ss:$8 sps:$4 sm:$0xff]   ;;  %v6472_v23 = vld [vmem:[#allocation3 + $0x21] ss:$8 sps:$4 sm:$0xff]  }
 0x9ab   : > { %5980 = vmatmul.mubr.msk.bf16.vlgmr.msra.gmra.mrb[24].mxu1 %vm1866_vm5, %v3122_v60  ;;  %v6463_v4 = vld [vmem:[#allocation3 + $0x8] ss:$8 sps:$4 sm:$0xff]   ;;  %v6464_v5 = vld [vmem:[#allocation3 + $0x18] ss:$8 sps:$4 sm:$0xff]   ;;  %v3230_v6 = vpack.c.bf16 %v6462_v63, %v6461_v1 }
 0x9ac   : > { %5986 = vmatmul.mubr.msk.bf16.vlgmr.msra.gmra.mrb[32].mxu0 %vm1866_vm5, %v3109_v61  ;;  %5990 = vmatpush3.bf16.msra.mxu1 %v3235_v40  ;;  %v3292_v8 = vpack.c.bf16 %v6464_v5, %v6463_v4  ;;  %v6465_v10 = vld [vmem:[#allocation3 + $0x9] ss:$8 sps:$4 sm:$0xff]   ;;  %v6466_v11 = vld [vmem:[#allocation3 + $0x19] ss:$8 sps:$4 sm:$0xff]  }
 0x9ad   : > { %5996 = vmatpush3.bf16.msra.mxu0 %v3297_v62  ;;  %5991 = vmatprep.mubr.msk.bf16.mxu1 %vm6587_vm1, %v6586_v2  ;;  %v6467_v12 = vld [vmem:[#allocation3 + $0xa] ss:$8 sps:$4 sm:$0xff]   ;;  %v6468_v13 = vld [vmem:[#allocation3 + $0x1a] ss:$8 sps:$4 sm:$0xff]   ;;  %v3354_v16 = vpack.c.bf16 %v6466_v11, %v6465_v10 }
 0x9ae   : > { %5997 = vmatprep.mubr.msk.bf16.mxu0 %vm6587_vm1, %v6586_v2  ;;  %6001 = vmatprep.subr.bf16.mxu1 %v6586_v2  ;;  %v3416_v18 = vpack.c.bf16 %v6468_v13, %v6467_v12  ;;  %v6469_v20 = vld [vmem:[#allocation3 + $0x10] ss:$8 sps:$4 sm:$0xff]   ;;  %v6474_v29 = vld [vmem:[#allocation3 + $0x22] ss:$8 sps:$4 sm:$0xff]  }
 0x9af   : > { %6007 = vmatprep.subr.bf16.mxu0 %v6586_v2  ;;  %v6471_v22 = vld [vmem:[#allocation3 + $0x11] ss:$8 sps:$4 sm:$0xff]   ;;  %v3479_v25 = vpack.c.bf16 %v6470_v21, %v6469_v20 }
 0x9b0   : > { %v3541_v27 = vpack.c.bf16 %v6472_v23, %v6471_v22  ;;  %v6473_v28 = vld [vmem:[#allocation3 + $0x12] ss:$8 sps:$4 sm:$0xff]  }
 0x9b1   : > { %v3603_v30 = vpack.c.bf16 %v6474_v29, %v6473_v28  ;;  %v5445_v29 = vld [vmem:[%s7446_s10] ss:$0 sm:$0xff] }
 0x9b3   : > { %5992 = vmatmul.mubr.msk.bf16.vlgmr.msra.gmra.mrb[28].mxu1 %vm1866_vm5, %v3230_v6 }
 0x9b4   : > { %5998 = vmatmul.mubr.msk.bf16.vlgmr.msra.gmra.mrb[36].mxu0 %vm1866_vm5, %v3292_v8  ;;  %6002 = vmatpush3.bf16.msra.mxu1 %v3359_v7 }
 0x9b5   : > { %6008 = vmatpush3.bf16.msra.mxu0 %v3421_v9  ;;  %6003 = vmatprep.mubr.msk.bf16.mxu1 %vm6587_vm1, %v6586_v2 }
 0x9b6   : > { %6009 = vmatprep.mubr.msk.bf16.mxu0 %vm6587_vm1, %v6586_v2  ;;  %6013 = vmatprep.subr.bf16.mxu1 %v6586_v2 }
 0x9b7   : > { %6019 = vmatprep.subr.bf16.mxu0 %v6586_v2 }
 0x9bb   : > { %6004 = vmatmul.mubr.msk.bf16.vlgmr.msra.gmra.mrb[32].mxu1 %vm1866_vm5, %v3354_v16 }
 0x9bc   : > { %6010 = vmatmul.mubr.msk.bf16.vlgmr.msra.gmra.mrb[40].mxu0 %vm1866_vm5, %v3416_v18  ;;  %6014 = vmatpush3.bf16.msra.mxu1 %v3484_v17 }
 0x9bd   : > { %6020 = vmatpush3.bf16.msra.mxu0 %v3546_v19  ;;  %6015 = vmatprep.mubr.msk.bf16.mxu1 %vm6587_vm1, %v6586_v2 }
 0x9be   : > { %6021 = vmatprep.mubr.msk.bf16.mxu0 %vm6587_vm1, %v6586_v2  ;;  %6025 = vmatprep.subr.bf16.mxu1 %v6586_v2 }
 0x9bf   : > { %6031 = vmatprep.subr.bf16.mxu0 %v6586_v2 }
 0x9c3   : > { %6016 = vmatmul.mubr.msk.bf16.vlgmr.msra.gmra.mrb[36].mxu1 %vm1866_vm5, %v3479_v25 }
 0x9c4   : > { %6022 = vmatmul.mubr.msk.bf16.vlgmr.msra.gmra.mrb[44].mxu0 %vm1866_vm5, %v3541_v27  ;;  %6026 = vmatpush3.bf16.msra.mxu1 %v3608_v26 }
 0x9c5   : > { %6027 = vmatprep.mubr.msk.bf16.mxu1 %vm6587_vm1, %v6586_v2  ;;  %6035 = vmatprep.mubr.msk.bf16.mxu0 %vm6587_vm1, %v6586_v2 }
 0x9c6   : > { %6032 = vmatpush3.bf16.msra.mxu0 %v6475_v31  ;;  %6103 = vmatprep.subr.mxu1 %v4347_v14 }
 0x9c7   : > { %6033 = vmatprep.subr.bf16.mxu0 %v6586_v2 }
 0x9ca   : > { %6034 = vmatpush3.bf16.msra.mxu0 %v6476_v32 }
 0x9cb   : > { %6028 = vmatmul.mubr.msk.bf16.vlgmr.msra.gmra.mrb[40].mxu1 %vm1866_vm5, %v3603_v30  ;;  %6039 = vmatprep.subr.bf16.mxu0 %v6586_v2 }
 0x9cc   : > { %6104 = vmatpush3.msra.mxu1 %v4347_v14 }
 0x9cd   : > { %6108 = vmatprep.subr.bf16.mxu1 %v6586_v2 }
 0xa30   : > { %v3065_v33 = vpop.xlane.xlu1 %3064 }
 0xa31   : > { %v3062_v34 = vpop.xlane.xlu0 %3061 }
 0xa32   : > { %v3066_v35 = vadd.f32 %v3065_v33, %v3062_v34 }
 0xa34   : > { %v3067_v36 = vrot.slane %v3066_v35, 4 }
 0xa36   : > { %v3068_v37 = vadd.f32 %v3067_v36, %v3066_v35 }
 0xa38   : > { %v3069_v38 = vrot.slane %v3068_v37, 2 }
 0xa3a   : > { %v3070_v39 = vadd.f32 %v3069_v38, %v3068_v37 }
 0xa3c   : > { %v3071_v41 = vrot.slane %v3070_v39, 1 }
 0xa3e   : > { %v3072_v45 = vadd.f32 %v3071_v41, %v3070_v39 }
 0xa40   : > { %v3073_v47 = vadd.f32 %v3072_v45, %v3057_v44 }
 0xa42   : > { %3075 = vst.msk [vmem:[#allocation4] sm:$0x1] %vm3074_vm2, %v3073_v47  ;;  %v6479_v47 = vld [vmem:[%s7447_s11] sm:$0xff]  }
 0xa7e   : > { %v3164_v48 = vpop.f32.mrb[24].mxu1 }
 0xa7f   : > { %v3211_v46 = vpop.f32.mrb[32].mxu0  ;;  %v5981_v49 = vpop.f32.mrb[25].mxu1 }
 0xa80   : > { %v3212_v42 = vadd.f32 %v3211_v46, %v3164_v48  ;;  %v5987_v50 = vpop.f32.mrb[33].mxu0  ;;  %v3167_v51 = vpop.f32.mrb[26].mxu1  ;;  %v6480_v46 = vld [vmem:[%s7447_s11 + $0x8] sm:$0xff]  }
 0xa81   : > { %v3214_v52 = vpop.f32.mrb[34].mxu0  ;;  %v5982_v43 = vpop.f32.mrb[27].mxu1  ;;  %v6483_v50 = vld [vmem:[%s7447_s11 + $0x20] sm:$0xff]  }
 0xa82   : > { %v3215_v54 = vadd.f32 %v3214_v52, %v3167_v51  ;;  %v5988_v55 = vpop.f32.mrb[35].mxu0  ;;  %v6484_v52 = vld [vmem:[%s7447_s11 + $0x28] sm:$0xff]  }
 0xa83   : > { %v6487_v55 = vld [vmem:[%s7447_s11 + $0x30] sm:$0xff]  }
 0xa86   : > { %v3271_v53 = vpop.f32.mrb[28].mxu1 }
 0xa87   : > { %v3278_v56 = vadd.f32 %v3271_v53, %v3212_v42  ;;  %v3333_v40 = vpop.f32.mrb[36].mxu0  ;;  %v5993_v57 = vpop.f32.mrb[29].mxu1 }
 0xa88   : > { %v5999_v58 = vpop.f32.mrb[37].mxu0  ;;  %v3274_v59 = vpop.f32.mrb[30].mxu1 }
 0xa89   : > { %v3340_v60 = vadd.f32 %v3333_v40, %v3278_v56  ;;  %v3279_v61 = vadd.f32 %v3274_v59, %v3215_v54  ;;  %v3336_v62 = vpop.f32.mrb[38].mxu0  ;;  %v5994_v63 = vpop.f32.mrb[31].mxu1  ;;  %v6488_v56 = vld [vmem:[%s7447_s11 + $0x38] sm:$0xff]   ;;  %v6491_v58 = vld [vmem:[%s7447_s11 + $0x40] sm:$0xff]  }
 0xa8a   : > { %v6000_v0 = vpop.f32.mrb[39].mxu0  ;;  %v6495_v63 = vld [vmem:[%s7447_s11 + $0x50] sm:$0xff]  }
 0xa8b   : > { %v3341_v1 = vadd.f32 %v3336_v62, %v3279_v61 }
 0xa8e   : > { %v3395_v3 = vpop.f32.mrb[32].mxu1 }
 0xa8f   : > { %v3402_v4 = vadd.f32 %v3395_v3, %v3340_v60  ;;  %v3457_v5 = vpop.f32.mrb[40].mxu0  ;;  %v6005_v6 = vpop.f32.mrb[33].mxu1  ;;  %v6492_v60 = vld [vmem:[%s7447_s11 + $0x48] sm:$0xff]  }
 0xa90   : > { %v6011_v7 = vpop.f32.mrb[41].mxu0  ;;  %v3398_v8 = vpop.f32.mrb[34].mxu1 }
 0xa91   : > { %v3464_v9 = vadd.f32 %v3457_v5, %v3402_v4  ;;  %v3403_v10 = vadd.f32 %v3398_v8, %v3341_v1  ;;  %v3460_v11 = vpop.f32.mrb[42].mxu0  ;;  %v6006_v12 = vpop.f32.mrb[35].mxu1  ;;  %v6496_v1 = vld [vmem:[%s7447_s11 + $0x58] sm:$0xff]   ;;  %v6499_v5 = vld [vmem:[%s7447_s11 + $0x60] sm:$0xff]   ;;  %v6500_v7 = vld [vmem:[%s7447_s11 + $0x68] sm:$0xff]  }
 0xa92   : > { %v6012_v13 = vpop.f32.mrb[43].mxu0  ;;  %v6504_v12 = vld [vmem:[%s7447_s11 + $0x78] sm:$0xff]  }
 0xa93   : > { %v3465_v15 = vadd.f32 %v3460_v11, %v3403_v10  ;;  %v6503_v10 = vld [vmem:[%s7447_s11 + $0x70] sm:$0xff]  }
 0xa96   : > { %v3520_v16 = vpop.f32.mrb[36].mxu1 }
 0xa97   : > { %v3527_v17 = vadd.f32 %v3520_v16, %v3464_v9  ;;  %v3582_v18 = vpop.f32.mrb[44].mxu0  ;;  %v6017_v19 = vpop.f32.mrb[37].mxu1 }
 0xa98   : > { %v6023_v20 = vpop.f32.mrb[45].mxu0  ;;  %v3523_v21 = vpop.f32.mrb[38].mxu1 }
 0xa99   : > { %v3589_v22 = vadd.f32 %v3582_v18, %v3527_v17  ;;  %v3528_v23 = vadd.f32 %v3523_v21, %v3465_v15  ;;  %v3585_v24 = vpop.f32.mrb[46].mxu0  ;;  %v6018_v25 = vpop.f32.mrb[39].mxu1  ;;  %v6507_v15 = vld [vmem:[%s7447_s11 + $0x80] sm:$0xff]   ;;  %v6508_v17 = vld [vmem:[%s7447_s11 + $0x88] sm:$0xff]  }
 0xa9a   : > { %v6024_v26 = vpop.f32.mrb[47].mxu0 }
 0xa9b   : > { %v3590_v27 = vadd.f32 %v3585_v24, %v3528_v23 }
 0xa9e   : > { %v3644_v28 = vpop.f32.mrb[40].mxu1 }
 0xa9f   : > { %v3651_v30 = vadd.f32 %v3644_v28, %v3589_v22  ;;  %v6029_v31 = vpop.f32.mrb[41].mxu1  ;;  %v6512_v28 = vld [vmem:[%s7447_s11 + $0xa8] sm:$0xff]  }
 0xaa0   : > { %v3647_v32 = vpop.f32.mrb[42].mxu1 }
 0xaa1   : > { %v7185_v33 = vadd.f32 %v5445_v29, %v3651_v30  ;;  %v3652_v34 = vadd.f32 %v3647_v32, %v3590_v27  ;;  %v6030_v35 = vpop.f32.mrb[43].mxu1  ;;  %v6511_v27 = vld [vmem:[%s7447_s11 + $0xa0] sm:$0xff]  }
 0xaa3   : > { %v3698_v36 = vmax.f32 %v7185_v33, 0.0  ;;  %v7188_v37 = vadd.f32 %v5445_v29, %v3652_v34  ;;  %v5538_v29 = vld [vmem:[%s7448_s12 + $0x8] sm:$0xff] }
 0xaa5   : > { %v3702_v38 = vcombine.high %v3698_v36, %v3698_v36  ;;  %3706 = vst.msk [vmem:[#allocation2 + $0x9] sm:$0xf] %vm529_vm3, %v3698_v36  ;;  %v3699_v39 = vmax.f32 %v7188_v37, 0.0 }
 0xaa7   : > { %3707 = vst.msk [vmem:[#allocation2 + $0x11] sm:$0xf] %vm529_vm3, %v3702_v38  ;;  %v3703_v41 = vcombine.high %v3699_v39, %v3699_v39  ;;  %3708 = vst.msk [vmem:[#allocation2 + $0x19] sm:$0xf] %vm529_vm3, %v3699_v39 }
 0xaa9   : > { %3709 = vst.msk [vmem:[#allocation2 + $0x21] sm:$0xf] %vm529_vm3, %v3703_v41 }
 0xaac   : > { %v6477_v44 = vld [vmem:[#allocation2 + $0x1] ss:$8 sps:$4 sm:$0xff]  }
 0xaad   : > { %v6481_v42 = vld [vmem:[#allocation2] ss:$8 sps:$4 sm:$0xff]  }
 0xaae   : > { %v6478_v45 = vld [vmem:[#allocation2 + $0x11] ss:$8 sps:$4 sm:$0xff]   ;;  %v6485_v54 = vld [vmem:[#allocation2 + $0x2] ss:$8 sps:$4 sm:$0xff]  }
 0xaaf   : > { %v3735_v48 = vpack.c.bf16 %v6478_v45, %v6477_v44  ;;  %v6482_v49 = vld [vmem:[#allocation2 + $0x10] ss:$8 sps:$4 sm:$0xff]  }
 0xab0   : > { %v3722_v51 = vpack.c.bf16 %v6482_v49, %v6481_v42  ;;  %v6486_v43 = vld [vmem:[#allocation2 + $0x12] ss:$8 sps:$4 sm:$0xff]   ;;  %v6502_v8 = vld [vmem:[#allocation2 + $0x20] ss:$8 sps:$4 sm:$0xff]  }
 0xab1   : > { %6036 = vmatmul.mubr.msk.bf16.vlgmr.msra.gmra.mrb[48].mxu0 %vm572_vm4, %v3735_v48  ;;  %v3860_v53 = vpack.c.bf16 %v6486_v43, %v6485_v54  ;;  %v6490_v40 = vld [vmem:[#allocation2 + $0x18] ss:$8 sps:$4 sm:$0xff]   ;;  %v6489_v57 = vld [vmem:[#allocation2 + $0x8] ss:$8 sps:$4 sm:$0xff]  }
 0xab2   : > { %6040 = vmatpush3.bf16.msra.mxu0 %v6479_v47  ;;  %6043 = vmatprep.mubr.msk.bf16.mxu0 %vm6587_vm1, %v6586_v2  ;;  %v3931_v59 = vpack.c.bf16 %v6490_v40, %v6489_v57  ;;  %v6494_v61 = vld [vmem:[#allocation2 + $0x19] ss:$8 sps:$4 sm:$0xff]   ;;  %v6493_v62 = vld [vmem:[#allocation2 + $0x9] ss:$8 sps:$4 sm:$0xff]  }
 0xab3   : > { %6041 = vmatprep.subr.bf16.mxu0 %v6586_v2  ;;  %v4002_v0 = vpack.c.bf16 %v6494_v61, %v6493_v62  ;;  %v6498_v3 = vld [vmem:[#allocation2 + $0x1a] ss:$8 sps:$4 sm:$0xff]   ;;  %v6497_v4 = vld [vmem:[#allocation2 + $0xa] ss:$8 sps:$4 sm:$0xff]  }
 0xab4   : > { %v4073_v6 = vpack.c.bf16 %v6498_v3, %v6497_v4  ;;  %v6501_v9 = vld [vmem:[#allocation2 + $0x10] ss:$8 sps:$4 sm:$0xff]   ;;  %v6506_v13 = vld [vmem:[#allocation2 + $0x21] ss:$8 sps:$4 sm:$0xff]  }
 0xab5   : > { %v4144_v11 = vpack.c.bf16 %v6502_v8, %v6501_v9  ;;  %v6505_v14 = vld [vmem:[#allocation2 + $0x11] ss:$8 sps:$4 sm:$0xff]   ;;  %v6510_v18 = vld [vmem:[#allocation2 + $0x22] ss:$8 sps:$4 sm:$0xff]  }
 0xab6   : > { %6042 = vmatpush3.bf16.msra.mxu0 %v6480_v46  ;;  %v4215_v16 = vpack.c.bf16 %v6506_v13, %v6505_v14  ;;  %v6509_v19 = vld [vmem:[#allocation2 + $0x12] ss:$8 sps:$4 sm:$0xff]   ;;  %v6524_v54 = vld [vmem:[%s7447_s11 + $0xc8] sm:$0xff]  }
 0xab7   : > { %6047 = vmatprep.subr.bf16.mxu0 %v6586_v2  ;;  %v4286_v20 = vpack.c.bf16 %v6510_v18, %v6509_v19  ;;  %v6516_v45 = vld [vmem:[%s7447_s11 + $0x98] sm:$0xff]   ;;  %v6519_v46 = vld [vmem:[%s7447_s11 + $0xb0] sm:$0xff]   ;;  %v6532_v62 = vld [vmem:[%s7447_s11 + $0xe8] sm:$0xff]  }
 0xab8   : > { %v6520_v42 = vld [vmem:[%s7447_s11 + $0xb8] sm:$0xff]   ;;  %v6540_v9 = vld [vmem:[%s7447_s11 + $0x108] sm:$0xff]  }
 0xab9   : > { %v6528_v57 = vld [vmem:[%s7447_s11 + $0xd8] sm:$0xff]  }
 0xaba   : > { %v6536_v4 = vld [vmem:[%s7447_s11 + $0xf8] sm:$0xff]  }
 0xabb   : > { %v6544_v14 = vld [vmem:[%s7447_s11 + $0x118] sm:$0xff]  }
 0xabd   : > { %6044 = vmatmul.mubr.msk.bf16.vlgmr.msra.gmra.mrb[48].mxu0 %vm572_vm4, %v3722_v51 }
 0xabe   : > { %6048 = vmatpush3.bf16.msra.mxu0 %v6483_v50  ;;  %6051 = vmatprep.mubr.msk.bf16.mxu0 %vm6587_vm1, %v6586_v2 }
 0xabf   : > { %6049 = vmatprep.subr.bf16.mxu0 %v6586_v2 }
 0xac2   : > { %6050 = vmatpush3.bf16.msra.mxu0 %v6484_v52  ;;  %v6523_v52 = vld [vmem:[%s7447_s11 + $0xc0] sm:$0xff]  }
 0xac3   : > { %6055 = vmatprep.subr.bf16.mxu0 %v6586_v2 }
 0xac9   : > { %6052 = vmatmul.mubr.msk.bf16.vlgmr.msra.gmra.mrb[48].mxu0 %vm572_vm4, %v3860_v53 }
 0xaca   : > { %6056 = vmatpush3.bf16.msra.mxu0 %v6487_v55  ;;  %6059 = vmatprep.mubr.msk.bf16.mxu0 %vm6587_vm1, %v6586_v2 }
 0xacb   : > { %6057 = vmatprep.subr.bf16.mxu0 %v6586_v2 }
 0xace   : > { %6058 = vmatpush3.bf16.msra.mxu0 %v6488_v56  ;;  %v6527_v56 = vld [vmem:[%s7447_s11 + $0xd0] sm:$0xff]  }
 0xacf   : > { %6063 = vmatprep.subr.bf16.mxu0 %v6586_v2 }
 0xad5   : > { %6060 = vmatmul.mubr.msk.bf16.vlgmr.msra.gmra.mrb[48].mxu0 %vm572_vm4, %v3931_v59 }
 0xad6   : > { %6064 = vmatpush3.bf16.msra.mxu0 %v6491_v58  ;;  %6067 = vmatprep.mubr.msk.bf16.mxu0 %vm6587_vm1, %v6586_v2 }
 0xad7   : > { %6065 = vmatprep.subr.bf16.mxu0 %v6586_v2 }
 0xada   : > { %6066 = vmatpush3.bf16.msra.mxu0 %v6492_v60  ;;  %v6531_v60 = vld [vmem:[%s7447_s11 + $0xe0] sm:$0xff]  }
 0xadb   : > { %6071 = vmatprep.subr.bf16.mxu0 %v6586_v2 }
 0xae1   : > { %6068 = vmatmul.mubr.msk.bf16.vlgmr.msra.gmra.mrb[48].mxu0 %vm572_vm4, %v4002_v0 }
 0xae2   : > { %6072 = vmatpush3.bf16.msra.mxu0 %v6495_v63  ;;  %6075 = vmatprep.mubr.msk.bf16.mxu0 %vm6587_vm1, %v6586_v2 }
 0xae3   : > { %6073 = vmatprep.subr.bf16.mxu0 %v6586_v2 }
 0xae6   : > { %6074 = vmatpush3.bf16.msra.mxu0 %v6496_v1  ;;  %v6535_v1 = vld [vmem:[%s7447_s11 + $0xf0] sm:$0xff]  }
 0xae7   : > { %6079 = vmatprep.subr.bf16.mxu0 %v6586_v2 }
 0xaed   : > { %6076 = vmatmul.mubr.msk.bf16.vlgmr.msra.gmra.mrb[48].mxu0 %vm572_vm4, %v4073_v6 }
 0xaee   : > { %6080 = vmatpush3.bf16.msra.mxu0 %v6499_v5  ;;  %6083 = vmatprep.mubr.msk.bf16.mxu0 %vm6587_vm1, %v6586_v2 }
 0xaef   : > { %6081 = vmatprep.subr.bf16.mxu0 %v6586_v2 }
 0xaf2   : > { %6082 = vmatpush3.bf16.msra.mxu0 %v6500_v7  ;;  %v6539_v7 = vld [vmem:[%s7447_s11 + $0x100] sm:$0xff]  }
 0xaf3   : > { %6087 = vmatprep.subr.bf16.mxu0 %v6586_v2 }
 0xaf9   : > { %6084 = vmatmul.mubr.msk.bf16.vlgmr.msra.gmra.mrb[48].mxu0 %vm572_vm4, %v4144_v11 }
 0xafa   : > { %6088 = vmatpush3.bf16.msra.mxu0 %v6503_v10  ;;  %6091 = vmatprep.mubr.msk.bf16.mxu0 %vm6587_vm1, %v6586_v2 }
 0xafb   : > { %6089 = vmatprep.subr.bf16.mxu0 %v6586_v2 }
 0xafe   : > { %6090 = vmatpush3.bf16.msra.mxu0 %v6504_v12  ;;  %v6543_v12 = vld [vmem:[%s7447_s11 + $0x110] sm:$0xff]  }
 0xaff   : > { %6095 = vmatprep.subr.bf16.mxu0 %v6586_v2 }
 0xb05   : > { %6092 = vmatmul.mubr.msk.bf16.vlgmr.msra.gmra.mrb[48].mxu0 %vm572_vm4, %v4215_v16 }
 0xb06   : > { %6096 = vmatpush3.bf16.msra.mxu0 %v6507_v15  ;;  %6099 = vmatprep.mubr.msk.bf16.mxu0 %vm6587_vm1, %v6586_v2 }
 0xb07   : > { %6097 = vmatprep.subr.bf16.mxu0 %v6586_v2 }
 0xb0a   : > { %6098 = vmatpush3.bf16.msra.mxu0 %v6508_v17 }
 0xb0b   : > { %6180 = vmatprep.subr.mxu0 %v5538_v29 }
 0xb11   : > { %6100 = vmatmul.mubr.msk.bf16.vlgmr.msra.gmra.mrb[48].mxu0 %vm572_vm4, %v4286_v20 }
 0xb12   : > { %6181 = vmatpush3.msra.mxu0 %v5538_v29 }
 0xbe4   : > { %v4336_v21 = vpop.f32.mrb[48].mxu0 }
 0xbe5   : > { %v4345_v22 = vmax.f32 %v4336_v21, 0.0  ;;  %v6101_v23 = vpop.f32.mrb[49].mxu0 }
 0xbe6   : > { %v4339_v24 = vpop.f32.mrb[50].mxu0 }
 0xbe7   : > { %v4346_v25 = vmax.f32 %v4339_v24, 0.0  ;;  %v6102_v26 = vpop.f32.mrb[51].mxu0  ;;  %6105 = vmatprep.mubr.msk.f32.mxu1 %vm1866_vm5, %v4345_v22 }
 0xbe9   : > { %6106 = vmatmul.mubr.msk.f32.vlgmr.msra.gmra.mrb[44].mxu1 %vm1866_vm5, %v4346_v25 }
 0xbea   : > { %6112 = vmatprep.mubr.msk.bf16.mxu1 %vm6587_vm1, %v6586_v2  ;;  %6109 = vmatpush3.bf16.msra.mxu1 %v6511_v27 }
 0xbeb   : > { %6110 = vmatprep.subr.bf16.mxu1 %v6586_v2 }
 0xbee   : > { %6111 = vmatpush3.bf16.msra.mxu1 %v6512_v28 }
 0xbef   : > { %6116 = vmatprep.subr.bf16.mxu1 %v6586_v2 }
 0xcbc   : > { %v6107_v30 = vpop.f32.mrb[44].mxu1 }
 0xcbd   : > { %v7299_v31 = vadd.f32 %v6107_v30, %v7188_v37  ;;  %v4420_v32 = vpop.f32.mrb[45].mxu1 }
 0xcbe   : > { %v7302_v34 = vadd.f32 %v4420_v32, %v7185_v33  ;;  %v6515_v33 = vld [vmem:[%s7447_s11 + $0x90] sm:$0xff]  }
 0xcbf   : > { %v4469_v35 = vmax.f32 %v7299_v31, 0.0 }
 0xcc0   : > { %v4468_v36 = vmax.f32 %v7302_v34, 0.0 }
 0xcc1   : > { %v4473_v38 = vcombine.high %v4469_v35, %v4469_v35  ;;  %4478 = vst.msk [vmem:[#allocation2 + $0x19] sm:$0xf] %vm529_vm3, %v4469_v35 }
 0xcc2   : > { %v4472_v39 = vcombine.high %v4468_v36, %v4468_v36  ;;  %4476 = vst.msk [vmem:[#allocation2 + $0x9] sm:$0xf] %vm529_vm3, %v4468_v36 }
 0xcc3   : > { %4479 = vst.msk [vmem:[#allocation2 + $0x21] sm:$0xf] %vm529_vm3, %v4473_v38 }
 0xcc4   : > { %4477 = vst.msk [vmem:[#allocation2 + $0x11] sm:$0xf] %vm529_vm3, %v4472_v39 }
 0xcc9   : > { %v6513_v37 = vld [vmem:[#allocation2 + $0x1] ss:$8 sps:$4 sm:$0xff]  }
 0xcca   : > { %v6517_v48 = vld [vmem:[#allocation2] ss:$8 sps:$4 sm:$0xff]  }
 0xccb   : > { %v6514_v41 = vld [vmem:[#allocation2 + $0x11] ss:$8 sps:$4 sm:$0xff]   ;;  %v6521_v51 = vld [vmem:[#allocation2 + $0x2] ss:$8 sps:$4 sm:$0xff]  }
 0xccc   : > { %v4505_v44 = vpack.c.bf16 %v6514_v41, %v6513_v37  ;;  %v6518_v47 = vld [vmem:[#allocation2 + $0x10] ss:$8 sps:$4 sm:$0xff]   ;;  %v6538_v6 = vld [vmem:[#allocation2 + $0x20] ss:$8 sps:$4 sm:$0xff]  }
 0xccd   : > { %v4492_v49 = vpack.c.bf16 %v6518_v47, %v6517_v48  ;;  %v6522_v50 = vld [vmem:[#allocation2 + $0x12] ss:$8 sps:$4 sm:$0xff]   ;;  %v6542_v11 = vld [vmem:[#allocation2 + $0x21] ss:$8 sps:$4 sm:$0xff]  }
 0xcce   : > { %6113 = vmatmul.mubr.msk.bf16.vlgmr.msra.gmra.mrb[48].mxu1 %vm572_vm4, %v4505_v44  ;;  %v4630_v43 = vpack.c.bf16 %v6522_v50, %v6521_v51  ;;  %v6525_v55 = vld [vmem:[#allocation2 + $0x8] ss:$8 sps:$4 sm:$0xff]   ;;  %v6526_v53 = vld [vmem:[#allocation2 + $0x18] ss:$8 sps:$4 sm:$0xff]  }
 0xccf   : > { %6117 = vmatpush3.bf16.msra.mxu1 %v6515_v33  ;;  %6120 = vmatprep.mubr.msk.bf16.mxu1 %vm6587_vm1, %v6586_v2  ;;  %v4701_v40 = vpack.c.bf16 %v6526_v53, %v6525_v55  ;;  %v6529_v58 = vld [vmem:[#allocation2 + $0x9] ss:$8 sps:$4 sm:$0xff]   ;;  %v6530_v59 = vld [vmem:[#allocation2 + $0x19] ss:$8 sps:$4 sm:$0xff]  }
 0xcd0   : > { %6118 = vmatprep.subr.bf16.mxu1 %v6586_v2  ;;  %v4772_v61 = vpack.c.bf16 %v6530_v59, %v6529_v58  ;;  %v6533_v63 = vld [vmem:[#allocation2 + $0xa] ss:$8 sps:$4 sm:$0xff]   ;;  %v6534_v0 = vld [vmem:[#allocation2 + $0x1a] ss:$8 sps:$4 sm:$0xff]  }
 0xcd1   : > { %v4843_v3 = vpack.c.bf16 %v6534_v0, %v6533_v63  ;;  %v6537_v5 = vld [vmem:[#allocation2 + $0x10] ss:$8 sps:$4 sm:$0xff]   ;;  %v6546_v16 = vld [vmem:[#allocation2 + $0x22] ss:$8 sps:$4 sm:$0xff]  }
 0xcd2   : > { %v4914_v8 = vpack.c.bf16 %v6538_v6, %v6537_v5  ;;  %v6541_v10 = vld [vmem:[#allocation2 + $0x11] ss:$8 sps:$4 sm:$0xff]  }
 0xcd3   : > { %6119 = vmatpush3.bf16.msra.mxu1 %v6516_v45  ;;  %v4985_v13 = vpack.c.bf16 %v6542_v11, %v6541_v10  ;;  %v6545_v15 = vld [vmem:[#allocation2 + $0x12] ss:$8 sps:$4 sm:$0xff]  }
 0xcd4   : > { %6124 = vmatprep.subr.bf16.mxu1 %v6586_v2  ;;  %v5056_v17 = vpack.c.bf16 %v6546_v16, %v6545_v15 }
 0xcda   : > { %6121 = vmatmul.mubr.msk.bf16.vlgmr.msra.gmra.mrb[48].mxu1 %vm572_vm4, %v4492_v49 }
 0xcdb   : > { %6125 = vmatpush3.bf16.msra.mxu1 %v6519_v46  ;;  %6128 = vmatprep.mubr.msk.bf16.mxu1 %vm6587_vm1, %v6586_v2 }
 0xcdc   : > { %6126 = vmatprep.subr.bf16.mxu1 %v6586_v2 }
 0xcdf   : > { %6127 = vmatpush3.bf16.msra.mxu1 %v6520_v42 }
 0xce0   : > { %6132 = vmatprep.subr.bf16.mxu1 %v6586_v2 }
 0xce6   : > { %6129 = vmatmul.mubr.msk.bf16.vlgmr.msra.gmra.mrb[48].mxu1 %vm572_vm4, %v4630_v43 }
 0xce7   : > { %6133 = vmatpush3.bf16.msra.mxu1 %v6523_v52  ;;  %6136 = vmatprep.mubr.msk.bf16.mxu1 %vm6587_vm1, %v6586_v2 }
 0xce8   : > { %6134 = vmatprep.subr.bf16.mxu1 %v6586_v2 }
 0xceb   : > { %6135 = vmatpush3.bf16.msra.mxu1 %v6524_v54 }
 0xcec   : > { %6140 = vmatprep.subr.bf16.mxu1 %v6586_v2 }
 0xcf2   : > { %6137 = vmatmul.mubr.msk.bf16.vlgmr.msra.gmra.mrb[48].mxu1 %vm572_vm4, %v4701_v40 }
 0xcf3   : > { %6141 = vmatpush3.bf16.msra.mxu1 %v6527_v56  ;;  %6144 = vmatprep.mubr.msk.bf16.mxu1 %vm6587_vm1, %v6586_v2 }
 0xcf4   : > { %6142 = vmatprep.subr.bf16.mxu1 %v6586_v2 }
 0xcf7   : > { %6143 = vmatpush3.bf16.msra.mxu1 %v6528_v57 }
 0xcf8   : > { %6148 = vmatprep.subr.bf16.mxu1 %v6586_v2 }
 0xcfe   : > { %6145 = vmatmul.mubr.msk.bf16.vlgmr.msra.gmra.mrb[48].mxu1 %vm572_vm4, %v4772_v61 }
 0xcff   : > { %6149 = vmatpush3.bf16.msra.mxu1 %v6531_v60  ;;  %6152 = vmatprep.mubr.msk.bf16.mxu1 %vm6587_vm1, %v6586_v2 }
 0xd00   : > { %6150 = vmatprep.subr.bf16.mxu1 %v6586_v2 }
 0xd03   : > { %6151 = vmatpush3.bf16.msra.mxu1 %v6532_v62 }
 0xd04   : > { %6156 = vmatprep.subr.bf16.mxu1 %v6586_v2 }
 0xd0a   : > { %6153 = vmatmul.mubr.msk.bf16.vlgmr.msra.gmra.mrb[48].mxu1 %vm572_vm4, %v4843_v3 }
 0xd0b   : > { %6157 = vmatpush3.bf16.msra.mxu1 %v6535_v1  ;;  %6160 = vmatprep.mubr.msk.bf16.mxu1 %vm6587_vm1, %v6586_v2 }
 0xd0c   : > { %6158 = vmatprep.subr.bf16.mxu1 %v6586_v2 }
 0xd0f   : > { %6159 = vmatpush3.bf16.msra.mxu1 %v6536_v4 }
 0xd10   : > { %6164 = vmatprep.subr.bf16.mxu1 %v6586_v2 }
 0xd16   : > { %6161 = vmatmul.mubr.msk.bf16.vlgmr.msra.gmra.mrb[48].mxu1 %vm572_vm4, %v4914_v8 }
 0xd17   : > { %6165 = vmatpush3.bf16.msra.mxu1 %v6539_v7  ;;  %6168 = vmatprep.mubr.msk.bf16.mxu1 %vm6587_vm1, %v6586_v2 }
 0xd18   : > { %6166 = vmatprep.subr.bf16.mxu1 %v6586_v2 }
 0xd1b   : > { %6167 = vmatpush3.bf16.msra.mxu1 %v6540_v9 }
 0xd1c   : > { %6172 = vmatprep.subr.bf16.mxu1 %v6586_v2 }
 0xd22   : > { %6169 = vmatmul.mubr.msk.bf16.vlgmr.msra.gmra.mrb[48].mxu1 %vm572_vm4, %v4985_v13 }
 0xd23   : > { %6173 = vmatpush3.bf16.msra.mxu1 %v6543_v12  ;;  %6176 = vmatprep.mubr.msk.bf16.mxu1 %vm6587_vm1, %v6586_v2 }
 0xd24   : > { %6174 = vmatprep.subr.bf16.mxu1 %v6586_v2 }
 0xd27   : > { %6175 = vmatpush3.bf16.msra.mxu1 %v6544_v14 }
 0xd2e   : > { %6177 = vmatmul.mubr.msk.bf16.vlgmr.msra.gmra.mrb[48].mxu1 %vm572_vm4, %v5056_v17 }
 0xe01   : > { %v5106_v18 = vpop.f32.mrb[48].mxu1 }
 0xe02   : > { %v5115_v19 = vmax.f32 %v5106_v18, 0.0  ;;  %v6178_v20 = vpop.f32.mrb[49].mxu1 }
 0xe03   : > { %v5109_v21 = vpop.f32.mrb[50].mxu1 }
 0xe04   : > { %v5116_v22 = vmax.f32 %v5109_v21, 0.0  ;;  %v6179_v23 = vpop.f32.mrb[51].mxu1  ;;  %6182 = vmatprep.mubr.msk.f32.mxu0 %vm1866_vm5, %v5115_v19 }
 0xe06   : > { %6183 = vmatmul.mubr.msk.f32.vlgmr.msra.gmra.mrb[30].mxu0 %vm1866_vm5, %v5116_v22 }
 0xe07   : > { %6560 = shalt.err (!%p6557_p12)
}
 0xe08   : > { %s6561_s21 = scalar_lea.hbm %s7450_s14, 16 }
 0xe09   : > { %p6562_p13 = scmp.ne.s32.totalorder %s7450_s14, %s6561_s21  ;;  %p6567_p2 = scmp.lt.u32.totalorder %s6561_s21, %s7450_s14 }
 0xe0b   : > { %p6563_p0 = pnand %p6562_p13, %p6335_p5 }
 0xe0d   : > { %p6564_p1 = pneg %p6563_p0 }
 0xe0f   : > { %p6569_p3 = pnand %p6567_p2, %p6564_p1 }
 0xe11   : > { %6572 = shalt.err (!%p6569_p3)
}
 0xe12   : > { %6332 = dma.vmem_to_hbm [thread:$0]  (%p6335_p5), %s5228_s15, 16, %s7450_s14, [#allocation5]  }
 0xed9   : > { %v6184_v2 = vpop.f32.mrb[30].mxu0 }
 0xeda   : > { %v5201_v24 = vadd.f32 %v6184_v2, %v7299_v31  ;;  %v5191_v25 = vpop.f32.mrb[31].mxu0 }
 0xedb   : > { %v5200_v26 = vadd.f32 %v5191_v25, %v7302_v34 }
 0xedc   : > { %v5205_v27 = vcombine.high %v5201_v24, %v5201_v24  ;;  %5210 = vst.msk [vmem:[%s6684_s22 + $0x8] sm:$0xf] %vm529_vm3, %v5201_v24 }
 0xedd   : > { %v5204_v28 = vcombine.high %v5200_v26, %v5200_v26  ;;  %5208 = vst.msk [vmem:[%s6684_s22] sm:$0xf] %vm529_vm3, %v5200_v26 }
 0xede   : > { %5211 = vst.msk [vmem:[%s6684_s22 + $0xc] sm:$0xf] %vm529_vm3, %v5205_v27 }
 0xedf   : > { %5209 = vst.msk [vmem:[%s6684_s22 + $0x4] sm:$0xf] %vm529_vm3, %v5204_v28 }
 0xee0   : > { %6578 = dma.done.wait (%p6335_p5), [#allocation5], 16  }
 0xee1   : > { %6580 = vsyncadd (%p6335_p5), [#allocation5], 4294967280 }
 0xee2 PF: > { %s26_s29 = sadd.s32 1, %s6583_s29  }
 0xee3   : > { %p23_p4 = scmp.ge.s32.totalorder %s26_s29, 4  }
 0xee5   :  { %25 = sbr.rel (!%p23_p4) target bundleno = 1 (0x1), region = 123 }
 0xeec   :  { %5248 = vsyncpa [#allocation5], 1 }
 0xeed   :  { %5250 = vsyncpa [#allocation5 + $0x1], 1 }

</bundles_post_ra>
